<compile_context>
chip_gen: v6e
topology: v6e:2x2x1
jax: 0.10.0
libtpu: 0.0.40
codegen_flags: <defaults>
</compile_context>

<pallas_src>
import math

import jax
import jax.numpy as jnp
from jax.experimental import pallas as pl
from jax.experimental.pallas import tpu as pltpu


def _round_up(x, m):
    return (x + m - 1) // m * m


# ----------------------------------------------------------------------------
# Pallas kernel
# ----------------------------------------------------------------------------
def _make_lstm_kernel(num_layers, Hp, Bp, Tc, unroll):
    """Kernel over one time chunk of Tc steps, all layers, flat (Tc*Bp, .) tiles."""

    def kernel(*refs):
        # refs = [x, (wih, whh, b) * L, out, (h, c) * L, xg_scratch, seq_scratch]
        x_ref = refs[0]
        w_refs = refs[1:1 + 3 * num_layers]
        out_ref = refs[1 + 3 * num_layers]
        scratch = refs[2 + 3 * num_layers:]
        hc_refs = scratch[:2 * num_layers]          # per-layer (Bp, Hp) h, c
        xg_ref = scratch[2 * num_layers]            # (Tc*Bp, 4*Hp) hoisted gates
        seq_ref = scratch[2 * num_layers + 1]       # (Tc*Bp, Hp) layer output seq

        chunk = pl.program_id(0)

        @pl.when(chunk == 0)
        def _init():
            for s in hc_refs:
                s[...] = jnp.zeros(s.shape, s.dtype)

        for l in range(num_layers):
            wih_ref = w_refs[3 * l]                 # (D_in, 4*Hp)
            whh_ref = w_refs[3 * l + 1]             # (Hp, 4*Hp)
            b_ref = w_refs[3 * l + 2]               # (1, 4*Hp)
            h_ref = hc_refs[2 * l]                  # (Bp, Hp)
            c_ref = hc_refs[2 * l + 1]              # (Bp, Hp)

            # ---- hoisted input projection for the whole chunk: one big matmul
            inp = x_ref[...] if l == 0 else seq_ref[...]
            xg_ref[...] = (
                jnp.dot(inp.astype(jnp.float32), wih_ref[...],
                        preferred_element_type=jnp.float32)
                + b_ref[...])

            whh = whh_ref[...]                      # load once per chunk

            # ---- serial recurrence: only h @ W_hh inside the time loop
            def step(t, carry):
                row = pl.multiple_of(t * Bp, Bp)
                g = xg_ref[pl.ds(row, Bp), :] + jnp.dot(
                    h_ref[...], whh, preferred_element_type=jnp.float32)
                # PyTorch gate order [i, f, g, o]; each gate 128-lane aligned.
                i_g = jax.nn.sigmoid(g[:, 0 * Hp:1 * Hp])
                f_g = jax.nn.sigmoid(g[:, 1 * Hp:2 * Hp])
                g_g = jnp.tanh(g[:, 2 * Hp:3 * Hp])
                o_g = jax.nn.sigmoid(g[:, 3 * Hp:4 * Hp])
                c_new = f_g * c_ref[...] + i_g * g_g
                h_new = o_g * jnp.tanh(c_new)
                c_ref[...] = c_new
                h_ref[...] = h_new
                seq_ref[pl.ds(row, Bp), :] = h_new
                return carry

            jax.lax.fori_loop(0, Tc, step, 0, unroll=unroll)

        # seq_ref now holds the last layer's outputs for this chunk (lane-dense).
        out_ref[...] = seq_ref[...].astype(out_ref.dtype)

    return kernel


# ----------------------------------------------------------------------------
# Weight padding: widen each gate's columns H -> Hp and (for recurrent / deep
# layers) the input rows H -> Hp with zeros.  Phantom gate columns get exactly
# zero pre-activation, so the padded hidden/cell lanes stay identically zero
# and never affect real lanes.
# ----------------------------------------------------------------------------
def _pad_gate_cols(w, H, Hp):
    rows = w.shape[0]
    w4 = w.reshape(rows, 4, H)
    w4 = jnp.pad(w4, ((0, 0), (0, 0), (0, Hp - H)))
    return w4.reshape(rows, 4 * Hp)


# ----------------------------------------------------------------------------
# Wrapper: (B, D, T) -> (B, H, T)
# ----------------------------------------------------------------------------
def lstm_forward(x, layer_weights, hidden_size, chunk_size=128):
    B, D, T = x.shape
    H = hidden_size
    L = len(layer_weights)

    Hp = _round_up(H, 128)        # gate/lane padding -> aligned slices, dense stores
    Bp = _round_up(B, 8)          # sublane padding -> full f32 vregs
    Tc = min(chunk_size, T)       # timesteps per grid step
    T_pad = _round_up(T, Tc)
    n_chunks = T_pad // Tc
    unroll = Tc if Tc <= 16 else 8

    # (B, D, T) -> (T_pad, Bp, D) -> flat (T_pad*Bp, D); zero-padding at the
    # end of time / extra batch rows never influences real outputs.
    x_t = jnp.transpose(x, (2, 0, 1))
    x_t = jnp.pad(x_t, ((0, T_pad - T), (0, Bp - B), (0, 0)))
    x_flat = x_t.reshape(T_pad * Bp, D).astype(jnp.float32)

    flat_w = []
    in_specs = [pl.BlockSpec((Tc * Bp, D), lambda c: (c, 0))]
    for l, (wih_t, whh_t, b) in enumerate(layer_weights):
        wih_p = _pad_gate_cols(wih_t.astype(jnp.float32), H, Hp)
        if l > 0:  # deeper layers consume the padded (Hp-wide) hidden state
            wih_p = jnp.pad(wih_p, ((0, Hp - H), (0, 0)))
        whh_p = jnp.pad(_pad_gate_cols(whh_t.astype(jnp.float32), H, Hp),
                        ((0, Hp - H), (0, 0)))
        b_p = _pad_gate_cols(b.astype(jnp.float32), H, Hp)
        for w in (wih_p, whh_p, b_p):
            flat_w.append(w)
            in_specs.append(pl.BlockSpec(w.shape, lambda c: (0, 0)))

    out_specs = pl.BlockSpec((Tc * Bp, Hp), lambda c: (c, 0))
    scratch_shapes = ([pltpu.VMEM((Bp, Hp), jnp.float32)] * (2 * L)
                      + [pltpu.VMEM((Tc * Bp, 4 * Hp), jnp.float32),
                         pltpu.VMEM((Tc * Bp, Hp), jnp.float32)])

    kernel = _make_lstm_kernel(L, Hp, Bp, Tc, unroll)

    y_flat = pl.pallas_call(
        kernel,
        out_shape=jax.ShapeDtypeStruct((T_pad * Bp, Hp), x.dtype),
        grid_spec=pltpu.PrefetchScalarGridSpec(
            num_scalar_prefetch=0,
            grid=(n_chunks,),
            in_specs=in_specs,
            out_specs=out_specs,
            scratch_shapes=scratch_shapes,
        ),
        compiler_params=pltpu.CompilerParams(
            dimension_semantics=("arbitrary",),   # time chunks are sequential
        ),
    )(x_flat, *flat_w)

    y = y_flat.reshape(T_pad, Bp, Hp)[:T, :B, :H]   # drop time/batch/lane padding
    return jnp.transpose(y, (1, 2, 0))              # (B, H, T)


# ----------------------------------------------------------------------------
# Deterministic parameter init (mirrors the PyTorch module's __init__):
#   bias -> 0, weight_ih -> xavier normal, weight_hh -> orthogonal.
# Stored transposed so the kernel computes x @ W.  Gate order [i, f, g, o].
# ----------------------------------------------------------------------------
def init_lstm_params(key, input_size, hidden_size, num_layers):
    layers = []
    for l in range(num_layers):
        key, k1, k2 = jax.random.split(key, 3)
        in_dim = input_size if l == 0 else hidden_size
        std = math.sqrt(2.0 / (4 * hidden_size + in_dim))       # xavier normal
        wih = jax.random.normal(k1, (4 * hidden_size, in_dim), jnp.float32) * std
        a = jax.random.normal(k2, (4 * hidden_size, hidden_size), jnp.float32)
        q, r = jnp.linalg.qr(a)                                  # orthogonal
        whh = q * jnp.sign(jnp.diag(r))[None, :]
        b = jnp.zeros((1, 4 * hidden_size), jnp.float32)         # bias_ih + bias_hh
        layers.append((wih.T, whh.T, b))
    return layers


# ----------------------------------------------------------------------------
# Pure-JAX reference (lax.scan) for correctness check.
# ----------------------------------------------------------------------------
def lstm_ref(x, layer_weights, hidden_size):
    B, D, T = x.shape
    H = hidden_size
    h_in = jnp.transpose(x, (2, 0, 1))               # (T, B, D)
    for (wih_t, whh_t, b) in layer_weights:
        def step(carry, xt):
            h, c = carry
            gates = xt @ wih_t + h @ whh_t + b
            i = jax.nn.sigmoid(gates[:, 0:H])
            f = jax.nn.sigmoid(gates[:, H:2 * H])
            g = jnp.tanh(gates[:, 2 * H:3 * H])
            o = jax.nn.sigmoid(gates[:, 3 * H:4 * H])
            c = f * c + i * g
            h = o * jnp.tanh(c)
            return (h, c), h

        init = (jnp.zeros((B, H), jnp.float32), jnp.zeros((B, H), jnp.float32))
        _, h_in = jax.lax.scan(step, init, h_in)
    return jnp.transpose(h_in, (1, 2, 0))            # (B, H, T)


if __name__ == "__main__":
    # Module defaults: input_size=64, hidden_size=64, num_layers=2.
    INPUT_SIZE = 64
    HIDDEN_SIZE = 64
    NUM_LAYERS = 2
    BATCH = 2
    SEQ = 8

    key = jax.random.PRNGKey(0)
    k_x, k_w = jax.random.split(key)

    x = jax.random.normal(k_x, (BATCH, INPUT_SIZE, SEQ), jnp.float32)  # (N, C, L)
    params = init_lstm_params(k_w, INPUT_SIZE, HIDDEN_SIZE, NUM_LAYERS)

    y = lstm_forward(x, params, HIDDEN_SIZE)
    y = jax.block_until_ready(y)

    y_ref = jax.block_until_ready(lstm_ref(x, params, HIDDEN_SIZE))
    assert y.shape == (BATCH, HIDDEN_SIZE, SEQ)
    assert jnp.allclose(y, y_ref, atol=1e-4, rtol=1e-4), float(
        jnp.max(jnp.abs(y - y_ref)))

    print("KERNEL_OK")
</pallas_src>

<mosaic_0001>
module attributes {stable_mosaic.version = 11 : i64} {
  func.func @kernel(%arg0: i32, %arg1: memref<64x64xf32, #tpu.memory_space<vmem>>, %arg2: memref<64x512xf32, #tpu.memory_space<vmem>>, %arg3: memref<128x512xf32, #tpu.memory_space<vmem>>, %arg4: memref<1x512xf32, #tpu.memory_space<vmem>>, %arg5: memref<128x512xf32, #tpu.memory_space<vmem>>, %arg6: memref<128x512xf32, #tpu.memory_space<vmem>>, %arg7: memref<1x512xf32, #tpu.memory_space<vmem>>, %arg8: memref<64x128xf32, #tpu.memory_space<vmem>>, %arg9: memref<8x128xf32, #tpu.memory_space<vmem>>, %arg10: memref<8x128xf32, #tpu.memory_space<vmem>>, %arg11: memref<8x128xf32, #tpu.memory_space<vmem>>, %arg12: memref<8x128xf32, #tpu.memory_space<vmem>>, %arg13: memref<64x512xf32, #tpu.memory_space<vmem>>, %arg14: memref<64x128xf32, #tpu.memory_space<vmem>>) attributes {dimension_semantics = [#tpu.dimension_semantics<arbitrary>], iteration_bounds = array<i64: 1>, scalar_prefetch = 0 : i64, scratch_operands = 6 : i64, tpu.core_type = #tpu.core_type<tc>, window_params = [{transform_indices = @transform_0, window_bounds = array<i64: 64, 64>}, {pipeline_mode = #tpu.pipeline_mode<synchronous>, transform_indices = @transform_1, window_bounds = array<i64: 64, 512>}, {pipeline_mode = #tpu.pipeline_mode<synchronous>, transform_indices = @transform_2, window_bounds = array<i64: 128, 512>}, {pipeline_mode = #tpu.pipeline_mode<synchronous>, transform_indices = @transform_3, window_bounds = array<i64: 1, 512>}, {pipeline_mode = #tpu.pipeline_mode<synchronous>, transform_indices = @transform_4, window_bounds = array<i64: 128, 512>}, {pipeline_mode = #tpu.pipeline_mode<synchronous>, transform_indices = @transform_5, window_bounds = array<i64: 128, 512>}, {pipeline_mode = #tpu.pipeline_mode<synchronous>, transform_indices = @transform_6, window_bounds = array<i64: 1, 512>}, {transform_indices = @transform_7, window_bounds = array<i64: 64, 128>}]} {
    %c0_i32 = arith.constant 0 : i32
    %0 = arith.cmpi eq, %arg0, %c0_i32 : i32
    %1 = arith.extui %0 : i1 to i32
    %c0_i32_0 = arith.constant 0 : i32
    %2 = arith.cmpi ne, %1, %c0_i32_0 : i32
    scf.if %2 {
      %cst_275 = arith.constant 0.000000e+00 : f32
      %613 = vector.broadcast %cst_275 : f32 to vector<8x128xf32>
      %c0_276 = arith.constant 0 : index
      %c0_277 = arith.constant 0 : index
      %614 = vector.load %arg9[%c0_276, %c0_277] : memref<8x128xf32, #tpu.memory_space<vmem>>, vector<8x128xf32>
      tpu.vector_store %arg9[%c0_276, %c0_277], %613 {strides = array<i32>} : memref<8x128xf32, #tpu.memory_space<vmem>>, vector<8x128xf32>,
      %cst_278 = arith.constant 0.000000e+00 : f32
      %615 = vector.broadcast %cst_278 : f32 to vector<8x128xf32>
      %c0_279 = arith.constant 0 : index
      %c0_280 = arith.constant 0 : index
      %616 = vector.load %arg10[%c0_279, %c0_280] : memref<8x128xf32, #tpu.memory_space<vmem>>, vector<8x128xf32>
      tpu.vector_store %arg10[%c0_279, %c0_280], %615 {strides = array<i32>} : memref<8x128xf32, #tpu.memory_space<vmem>>, vector<8x128xf32>,
      %cst_281 = arith.constant 0.000000e+00 : f32
      %617 = vector.broadcast %cst_281 : f32 to vector<8x128xf32>
      %c0_282 = arith.constant 0 : index
      %c0_283 = arith.constant 0 : index
      %618 = vector.load %arg11[%c0_282, %c0_283] : memref<8x128xf32, #tpu.memory_space<vmem>>, vector<8x128xf32>
      tpu.vector_store %arg11[%c0_282, %c0_283], %617 {strides = array<i32>} : memref<8x128xf32, #tpu.memory_space<vmem>>, vector<8x128xf32>,
      %cst_284 = arith.constant 0.000000e+00 : f32
      %619 = vector.broadcast %cst_284 : f32 to vector<8x128xf32>
      %c0_285 = arith.constant 0 : index
      %c0_286 = arith.constant 0 : index
      %620 = vector.load %arg12[%c0_285, %c0_286] : memref<8x128xf32, #tpu.memory_space<vmem>>, vector<8x128xf32>
      tpu.vector_store %arg12[%c0_285, %c0_286], %619 {strides = array<i32>} : memref<8x128xf32, #tpu.memory_space<vmem>>, vector<8x128xf32>,
    } else {
    }
    %c0 = arith.constant 0 : index
    %c0_1 = arith.constant 0 : index
    %3 = vector.load %arg1[%c0, %c0_1] : memref<64x64xf32, #tpu.memory_space<vmem>>, vector<64x64xf32>
    %c0_2 = arith.constant 0 : index
    %c0_3 = arith.constant 0 : index
    %4 = vector.load %arg2[%c0_2, %c0_3] : memref<64x512xf32, #tpu.memory_space<vmem>>, vector<64x512xf32>
    %cst = arith.constant dense<0.000000e+00> : vector<64x512xf32>
    %5 = tpu.matmul %3, %4, %cst {dimension_numbers = #tpu.dot_dimension_numbers<[1], [0], [0], [1], [0, 0, 1, 1], [], []>} : vector<64x64xf32>, vector<64x512xf32>, vector<64x512xf32> -> vector<64x512xf32>
    %c0_4 = arith.constant 0 : index
    %c0_5 = arith.constant 0 : index
    %6 = vector.load %arg4[%c0_4, %c0_5] : memref<1x512xf32, #tpu.memory_space<vmem>>, vector<1x512xf32>
    %7 = vector.broadcast %6 : vector<1x512xf32> to vector<64x512xf32>
    %8 = arith.addf %5, %7 : vector<64x512xf32>
    %c0_6 = arith.constant 0 : index
    %c0_7 = arith.constant 0 : index
    %9 = vector.load %arg13[%c0_6, %c0_7] : memref<64x512xf32, #tpu.memory_space<vmem>>, vector<64x512xf32>
    tpu.vector_store %arg13[%c0_6, %c0_7], %8 {strides = array<i32>} : memref<64x512xf32, #tpu.memory_space<vmem>>, vector<64x512xf32>,
    %c0_8 = arith.constant 0 : index
    %c0_9 = arith.constant 0 : index
    %10 = vector.load %arg3[%c0_8, %c0_9] : memref<128x512xf32, #tpu.memory_space<vmem>>, vector<128x512xf32>
    %c0_i32_10 = arith.constant 0 : i32
    %c8_i32 = arith.constant 8 : i32
    %11 = arith.muli %c0_i32_10, %c8_i32 : i32
    %12 = tpu.assume_multiple %11, 8 : i32
    %13 = arith.index_cast %12 : i32 to index
    %c0_11 = arith.constant 0 : index
    %14 = vector.load %arg13[%13, %c0_11] : memref<64x512xf32, #tpu.memory_space<vmem>>, vector<8x512xf32>
    %c0_12 = arith.constant 0 : index
    %c0_13 = arith.constant 0 : index
    %15 = vector.load %arg9[%c0_12, %c0_13] : memref<8x128xf32, #tpu.memory_space<vmem>>, vector<8x128xf32>
    %cst_14 = arith.constant dense<0.000000e+00> : vector<8x512xf32>
    %16 = tpu.matmul %15, %10, %cst_14 {dimension_numbers = #tpu.dot_dimension_numbers<[1], [0], [0], [1], [0, 0, 1, 1], [], []>} : vector<8x128xf32>, vector<128x512xf32>, vector<8x512xf32> -> vector<8x512xf32>
    %17 = arith.addf %14, %16 : vector<8x512xf32>
    %18 = vector.extract_strided_slice %17 {offsets = [0, 0], sizes = [8, 128], strides = [1, 1]} : vector<8x512xf32> to vector<8x128xf32>
    %19 = arith.negf %18 : vector<8x128xf32>
    %20 = math.exp %19 : vector<8x128xf32>
    %cst_15 = arith.constant 1.000000e+00 : f32
    %21 = vector.broadcast %cst_15 : f32 to vector<8x128xf32>
    %22 = arith.addf %21, %20 : vector<8x128xf32>
    %23 = arith.divf %21, %22 : vector<8x128xf32>
    %24 = vector.extract_strided_slice %17 {offsets = [0, 128], sizes = [8, 128], strides = [1, 1]} : vector<8x512xf32> to vector<8x128xf32>
    %25 = arith.negf %24 : vector<8x128xf32>
    %26 = math.exp %25 : vector<8x128xf32>
    %cst_16 = arith.constant 1.000000e+00 : f32
    %27 = vector.broadcast %cst_16 : f32 to vector<8x128xf32>
    %28 = arith.addf %27, %26 : vector<8x128xf32>
    %29 = arith.divf %27, %28 : vector<8x128xf32>
    %30 = vector.extract_strided_slice %17 {offsets = [0, 256], sizes = [8, 128], strides = [1, 1]} : vector<8x512xf32> to vector<8x128xf32>
    %31 = math.tanh %30 : vector<8x128xf32>
    %32 = vector.extract_strided_slice %17 {offsets = [0, 384], sizes = [8, 128], strides = [1, 1]} : vector<8x512xf32> to vector<8x128xf32>
    %33 = arith.negf %32 : vector<8x128xf32>
    %34 = math.exp %33 : vector<8x128xf32>
    %cst_17 = arith.constant 1.000000e+00 : f32
    %35 = vector.broadcast %cst_17 : f32 to vector<8x128xf32>
    %36 = arith.addf %35, %34 : vector<8x128xf32>
    %37 = arith.divf %35, %36 : vector<8x128xf32>
    %c0_18 = arith.constant 0 : index
    %c0_19 = arith.constant 0 : index
    %38 = vector.load %arg10[%c0_18, %c0_19] : memref<8x128xf32, #tpu.memory_space<vmem>>, vector<8x128xf32>
    %39 = arith.mulf %29, %38 : vector<8x128xf32>
    %40 = arith.mulf %23, %31 : vector<8x128xf32>
    %41 = arith.addf %39, %40 : vector<8x128xf32>
    %42 = math.tanh %41 : vector<8x128xf32>
    %43 = arith.mulf %37, %42 : vector<8x128xf32>
    %c0_20 = arith.constant 0 : index
    %c0_21 = arith.constant 0 : index
    %44 = vector.load %arg10[%c0_20, %c0_21] : memref<8x128xf32, #tpu.memory_space<vmem>>, vector<8x128xf32>
    tpu.vector_store %arg10[%c0_20, %c0_21], %41 {strides = array<i32>} : memref<8x128xf32, #tpu.memory_space<vmem>>, vector<8x128xf32>,
    %c0_22 = arith.constant 0 : index
    %c0_23 = arith.constant 0 : index
    %45 = vector.load %arg9[%c0_22, %c0_23] : memref<8x128xf32, #tpu.memory_space<vmem>>, vector<8x128xf32>
    tpu.vector_store %arg9[%c0_22, %c0_23], %43 {strides = array<i32>} : memref<8x128xf32, #tpu.memory_space<vmem>>, vector<8x128xf32>,
    %46 = arith.index_cast %12 : i32 to index
    %c0_24 = arith.constant 0 : index
    %47 = vector.load %arg14[%46, %c0_24] : memref<64x128xf32, #tpu.memory_space<vmem>>, vector<8x128xf32>
    tpu.vector_store %arg14[%46, %c0_24], %43 {strides = array<i32>} : memref<64x128xf32, #tpu.memory_space<vmem>>, vector<8x128xf32>,
    %c1_i32 = arith.constant 1 : i32
    %c8_i32_25 = arith.constant 8 : i32
    %48 = arith.muli %c1_i32, %c8_i32_25 : i32
    %49 = tpu.assume_multiple %48, 8 : i32
    %50 = arith.index_cast %49 : i32 to index
    %c0_26 = arith.constant 0 : index
    %51 = vector.load %arg13[%50, %c0_26] : memref<64x512xf32, #tpu.memory_space<vmem>>, vector<8x512xf32>
    %c0_27 = arith.constant 0 : index
    %c0_28 = arith.constant 0 : index
    %52 = vector.load %arg9[%c0_27, %c0_28] : memref<8x128xf32, #tpu.memory_space<vmem>>, vector<8x128xf32>
    %cst_29 = arith.constant dense<0.000000e+00> : vector<8x512xf32>
    %53 = tpu.matmul %52, %10, %cst_29 {dimension_numbers = #tpu.dot_dimension_numbers<[1], [0], [0], [1], [0, 0, 1, 1], [], []>} : vector<8x128xf32>, vector<128x512xf32>, vector<8x512xf32> -> vector<8x512xf32>
    %54 = arith.addf %51, %53 : vector<8x512xf32>
    %55 = vector.extract_strided_slice %54 {offsets = [0, 0], sizes = [8, 128], strides = [1, 1]} : vector<8x512xf32> to vector<8x128xf32>
    %56 = arith.negf %55 : vector<8x128xf32>
    %57 = math.exp %56 : vector<8x128xf32>
    %cst_30 = arith.constant 1.000000e+00 : f32
    %58 = vector.broadcast %cst_30 : f32 to vector<8x128xf32>
    %59 = arith.addf %58, %57 : vector<8x128xf32>
    %60 = arith.divf %58, %59 : vector<8x128xf32>
    %61 = vector.extract_strided_slice %54 {offsets = [0, 128], sizes = [8, 128], strides = [1, 1]} : vector<8x512xf32> to vector<8x128xf32>
    %62 = arith.negf %61 : vector<8x128xf32>
    %63 = math.exp %62 : vector<8x128xf32>
    %cst_31 = arith.constant 1.000000e+00 : f32
    %64 = vector.broadcast %cst_31 : f32 to vector<8x128xf32>
    %65 = arith.addf %64, %63 : vector<8x128xf32>
    %66 = arith.divf %64, %65 : vector<8x128xf32>
    %67 = vector.extract_strided_slice %54 {offsets = [0, 256], sizes = [8, 128], strides = [1, 1]} : vector<8x512xf32> to vector<8x128xf32>
    %68 = math.tanh %67 : vector<8x128xf32>
    %69 = vector.extract_strided_slice %54 {offsets = [0, 384], sizes = [8, 128], strides = [1, 1]} : vector<8x512xf32> to vector<8x128xf32>
    %70 = arith.negf %69 : vector<8x128xf32>
    %71 = math.exp %70 : vector<8x128xf32>
    %cst_32 = arith.constant 1.000000e+00 : f32
    %72 = vector.broadcast %cst_32 : f32 to vector<8x128xf32>
    %73 = arith.addf %72, %71 : vector<8x128xf32>
    %74 = arith.divf %72, %73 : vector<8x128xf32>
    %c0_33 = arith.constant 0 : index
    %c0_34 = arith.constant 0 : index
    %75 = vector.load %arg10[%c0_33, %c0_34] : memref<8x128xf32, #tpu.memory_space<vmem>>, vector<8x128xf32>
    %76 = arith.mulf %66, %75 : vector<8x128xf32>
    %77 = arith.mulf %60, %68 : vector<8x128xf32>
    %78 = arith.addf %76, %77 : vector<8x128xf32>
    %79 = math.tanh %78 : vector<8x128xf32>
    %80 = arith.mulf %74, %79 : vector<8x128xf32>
    %c0_35 = arith.constant 0 : index
    %c0_36 = arith.constant 0 : index
    %81 = vector.load %arg10[%c0_35, %c0_36] : memref<8x128xf32, #tpu.memory_space<vmem>>, vector<8x128xf32>
    tpu.vector_store %arg10[%c0_35, %c0_36], %78 {strides = array<i32>} : memref<8x128xf32, #tpu.memory_space<vmem>>, vector<8x128xf32>,
    %c0_37 = arith.constant 0 : index
    %c0_38 = arith.constant 0 : index
    %82 = vector.load %arg9[%c0_37, %c0_38] : memref<8x128xf32, #tpu.memory_space<vmem>>, vector<8x128xf32>
    tpu.vector_store %arg9[%c0_37, %c0_38], %80 {strides = array<i32>} : memref<8x128xf32, #tpu.memory_space<vmem>>, vector<8x128xf32>,
    %83 = arith.index_cast %49 : i32 to index
    %c0_39 = arith.constant 0 : index
    %84 = vector.load %arg14[%83, %c0_39] : memref<64x128xf32, #tpu.memory_space<vmem>>, vector<8x128xf32>
    tpu.vector_store %arg14[%83, %c0_39], %80 {strides = array<i32>} : memref<64x128xf32, #tpu.memory_space<vmem>>, vector<8x128xf32>,
    %c2_i32 = arith.constant 2 : i32
    %c8_i32_40 = arith.constant 8 : i32
    %85 = arith.muli %c2_i32, %c8_i32_40 : i32
    %86 = tpu.assume_multiple %85, 8 : i32
    %87 = arith.index_cast %86 : i32 to index
    %c0_41 = arith.constant 0 : index
    %88 = vector.load %arg13[%87, %c0_41] : memref<64x512xf32, #tpu.memory_space<vmem>>, vector<8x512xf32>
    %c0_42 = arith.constant 0 : index
    %c0_43 = arith.constant 0 : index
    %89 = vector.load %arg9[%c0_42, %c0_43] : memref<8x128xf32, #tpu.memory_space<vmem>>, vector<8x128xf32>
    %cst_44 = arith.constant dense<0.000000e+00> : vector<8x512xf32>
    %90 = tpu.matmul %89, %10, %cst_44 {dimension_numbers = #tpu.dot_dimension_numbers<[1], [0], [0], [1], [0, 0, 1, 1], [], []>} : vector<8x128xf32>, vector<128x512xf32>, vector<8x512xf32> -> vector<8x512xf32>
    %91 = arith.addf %88, %90 : vector<8x512xf32>
    %92 = vector.extract_strided_slice %91 {offsets = [0, 0], sizes = [8, 128], strides = [1, 1]} : vector<8x512xf32> to vector<8x128xf32>
    %93 = arith.negf %92 : vector<8x128xf32>
    %94 = math.exp %93 : vector<8x128xf32>
    %cst_45 = arith.constant 1.000000e+00 : f32
    %95 = vector.broadcast %cst_45 : f32 to vector<8x128xf32>
    %96 = arith.addf %95, %94 : vector<8x128xf32>
    %97 = arith.divf %95, %96 : vector<8x128xf32>
    %98 = vector.extract_strided_slice %91 {offsets = [0, 128], sizes = [8, 128], strides = [1, 1]} : vector<8x512xf32> to vector<8x128xf32>
    %99 = arith.negf %98 : vector<8x128xf32>
    %100 = math.exp %99 : vector<8x128xf32>
    %cst_46 = arith.constant 1.000000e+00 : f32
    %101 = vector.broadcast %cst_46 : f32 to vector<8x128xf32>
    %102 = arith.addf %101, %100 : vector<8x128xf32>
    %103 = arith.divf %101, %102 : vector<8x128xf32>
    %104 = vector.extract_strided_slice %91 {offsets = [0, 256], sizes = [8, 128], strides = [1, 1]} : vector<8x512xf32> to vector<8x128xf32>
    %105 = math.tanh %104 : vector<8x128xf32>
    %106 = vector.extract_strided_slice %91 {offsets = [0, 384], sizes = [8, 128], strides = [1, 1]} : vector<8x512xf32> to vector<8x128xf32>
    %107 = arith.negf %106 : vector<8x128xf32>
    %108 = math.exp %107 : vector<8x128xf32>
    %cst_47 = arith.constant 1.000000e+00 : f32
    %109 = vector.broadcast %cst_47 : f32 to vector<8x128xf32>
    %110 = arith.addf %109, %108 : vector<8x128xf32>
    %111 = arith.divf %109, %110 : vector<8x128xf32>
    %c0_48 = arith.constant 0 : index
    %c0_49 = arith.constant 0 : index
    %112 = vector.load %arg10[%c0_48, %c0_49] : memref<8x128xf32, #tpu.memory_space<vmem>>, vector<8x128xf32>
    %113 = arith.mulf %103, %112 : vector<8x128xf32>
    %114 = arith.mulf %97, %105 : vector<8x128xf32>
    %115 = arith.addf %113, %114 : vector<8x128xf32>
    %116 = math.tanh %115 : vector<8x128xf32>
    %117 = arith.mulf %111, %116 : vector<8x128xf32>
    %c0_50 = arith.constant 0 : index
    %c0_51 = arith.constant 0 : index
    %118 = vector.load %arg10[%c0_50, %c0_51] : memref<8x128xf32, #tpu.memory_space<vmem>>, vector<8x128xf32>
    tpu.vector_store %arg10[%c0_50, %c0_51], %115 {strides = array<i32>} : memref<8x128xf32, #tpu.memory_space<vmem>>, vector<8x128xf32>,
    %c0_52 = arith.constant 0 : index
    %c0_53 = arith.constant 0 : index
    %119 = vector.load %arg9[%c0_52, %c0_53] : memref<8x128xf32, #tpu.memory_space<vmem>>, vector<8x128xf32>
    tpu.vector_store %arg9[%c0_52, %c0_53], %117 {strides = array<i32>} : memref<8x128xf32, #tpu.memory_space<vmem>>, vector<8x128xf32>,
    %120 = arith.index_cast %86 : i32 to index
    %c0_54 = arith.constant 0 : index
    %121 = vector.load %arg14[%120, %c0_54] : memref<64x128xf32, #tpu.memory_space<vmem>>, vector<8x128xf32>
    tpu.vector_store %arg14[%120, %c0_54], %117 {strides = array<i32>} : memref<64x128xf32, #tpu.memory_space<vmem>>, vector<8x128xf32>,
    %c3_i32 = arith.constant 3 : i32
    %c8_i32_55 = arith.constant 8 : i32
    %122 = arith.muli %c3_i32, %c8_i32_55 : i32
    %123 = tpu.assume_multiple %122, 8 : i32
    %124 = arith.index_cast %123 : i32 to index
    %c0_56 = arith.constant 0 : index
    %125 = vector.load %arg13[%124, %c0_56] : memref<64x512xf32, #tpu.memory_space<vmem>>, vector<8x512xf32>
    %c0_57 = arith.constant 0 : index
    %c0_58 = arith.constant 0 : index
    %126 = vector.load %arg9[%c0_57, %c0_58] : memref<8x128xf32, #tpu.memory_space<vmem>>, vector<8x128xf32>
    %cst_59 = arith.constant dense<0.000000e+00> : vector<8x512xf32>
    %127 = tpu.matmul %126, %10, %cst_59 {dimension_numbers = #tpu.dot_dimension_numbers<[1], [0], [0], [1], [0, 0, 1, 1], [], []>} : vector<8x128xf32>, vector<128x512xf32>, vector<8x512xf32> -> vector<8x512xf32>
    %128 = arith.addf %125, %127 : vector<8x512xf32>
    %129 = vector.extract_strided_slice %128 {offsets = [0, 0], sizes = [8, 128], strides = [1, 1]} : vector<8x512xf32> to vector<8x128xf32>
    %130 = arith.negf %129 : vector<8x128xf32>
    %131 = math.exp %130 : vector<8x128xf32>
    %cst_60 = arith.constant 1.000000e+00 : f32
    %132 = vector.broadcast %cst_60 : f32 to vector<8x128xf32>
    %133 = arith.addf %132, %131 : vector<8x128xf32>
    %134 = arith.divf %132, %133 : vector<8x128xf32>
    %135 = vector.extract_strided_slice %128 {offsets = [0, 128], sizes = [8, 128], strides = [1, 1]} : vector<8x512xf32> to vector<8x128xf32>
    %136 = arith.negf %135 : vector<8x128xf32>
    %137 = math.exp %136 : vector<8x128xf32>
    %cst_61 = arith.constant 1.000000e+00 : f32
    %138 = vector.broadcast %cst_61 : f32 to vector<8x128xf32>
    %139 = arith.addf %138, %137 : vector<8x128xf32>
    %140 = arith.divf %138, %139 : vector<8x128xf32>
    %141 = vector.extract_strided_slice %128 {offsets = [0, 256], sizes = [8, 128], strides = [1, 1]} : vector<8x512xf32> to vector<8x128xf32>
    %142 = math.tanh %141 : vector<8x128xf32>
    %143 = vector.extract_strided_slice %128 {offsets = [0, 384], sizes = [8, 128], strides = [1, 1]} : vector<8x512xf32> to vector<8x128xf32>
    %144 = arith.negf %143 : vector<8x128xf32>
    %145 = math.exp %144 : vector<8x128xf32>
    %cst_62 = arith.constant 1.000000e+00 : f32
    %146 = vector.broadcast %cst_62 : f32 to vector<8x128xf32>
    %147 = arith.addf %146, %145 : vector<8x128xf32>
    %148 = arith.divf %146, %147 : vector<8x128xf32>
    %c0_63 = arith.constant 0 : index
    %c0_64 = arith.constant 0 : index
    %149 = vector.load %arg10[%c0_63, %c0_64] : memref<8x128xf32, #tpu.memory_space<vmem>>, vector<8x128xf32>
    %150 = arith.mulf %140, %149 : vector<8x128xf32>
    %151 = arith.mulf %134, %142 : vector<8x128xf32>
    %152 = arith.addf %150, %151 : vector<8x128xf32>
    %153 = math.tanh %152 : vector<8x128xf32>
    %154 = arith.mulf %148, %153 : vector<8x128xf32>
    %c0_65 = arith.constant 0 : index
    %c0_66 = arith.constant 0 : index
    %155 = vector.load %arg10[%c0_65, %c0_66] : memref<8x128xf32, #tpu.memory_space<vmem>>, vector<8x128xf32>
    tpu.vector_store %arg10[%c0_65, %c0_66], %152 {strides = array<i32>} : memref<8x128xf32, #tpu.memory_space<vmem>>, vector<8x128xf32>,
    %c0_67 = arith.constant 0 : index
    %c0_68 = arith.constant 0 : index
    %156 = vector.load %arg9[%c0_67, %c0_68] : memref<8x128xf32, #tpu.memory_space<vmem>>, vector<8x128xf32>
    tpu.vector_store %arg9[%c0_67, %c0_68], %154 {strides = array<i32>} : memref<8x128xf32, #tpu.memory_space<vmem>>, vector<8x128xf32>,
    %157 = arith.index_cast %123 : i32 to index
    %c0_69 = arith.constant 0 : index
    %158 = vector.load %arg14[%157, %c0_69] : memref<64x128xf32, #tpu.memory_space<vmem>>, vector<8x128xf32>
    tpu.vector_store %arg14[%157, %c0_69], %154 {strides = array<i32>} : memref<64x128xf32, #tpu.memory_space<vmem>>, vector<8x128xf32>,
    %c4_i32 = arith.constant 4 : i32
    %c8_i32_70 = arith.constant 8 : i32
    %159 = arith.muli %c4_i32, %c8_i32_70 : i32
    %160 = tpu.assume_multiple %159, 8 : i32
    %161 = arith.index_cast %160 : i32 to index
    %c0_71 = arith.constant 0 : index
    %162 = vector.load %arg13[%161, %c0_71] : memref<64x512xf32, #tpu.memory_space<vmem>>, vector<8x512xf32>
    %c0_72 = arith.constant 0 : index
    %c0_73 = arith.constant 0 : index
    %163 = vector.load %arg9[%c0_72, %c0_73] : memref<8x128xf32, #tpu.memory_space<vmem>>, vector<8x128xf32>
    %cst_74 = arith.constant dense<0.000000e+00> : vector<8x512xf32>
    %164 = tpu.matmul %163, %10, %cst_74 {dimension_numbers = #tpu.dot_dimension_numbers<[1], [0], [0], [1], [0, 0, 1, 1], [], []>} : vector<8x128xf32>, vector<128x512xf32>, vector<8x512xf32> -> vector<8x512xf32>
    %165 = arith.addf %162, %164 : vector<8x512xf32>
    %166 = vector.extract_strided_slice %165 {offsets = [0, 0], sizes = [8, 128], strides = [1, 1]} : vector<8x512xf32> to vector<8x128xf32>
    %167 = arith.negf %166 : vector<8x128xf32>
    %168 = math.exp %167 : vector<8x128xf32>
    %cst_75 = arith.constant 1.000000e+00 : f32
    %169 = vector.broadcast %cst_75 : f32 to vector<8x128xf32>
    %170 = arith.addf %169, %168 : vector<8x128xf32>
    %171 = arith.divf %169, %170 : vector<8x128xf32>
    %172 = vector.extract_strided_slice %165 {offsets = [0, 128], sizes = [8, 128], strides = [1, 1]} : vector<8x512xf32> to vector<8x128xf32>
    %173 = arith.negf %172 : vector<8x128xf32>
    %174 = math.exp %173 : vector<8x128xf32>
    %cst_76 = arith.constant 1.000000e+00 : f32
    %175 = vector.broadcast %cst_76 : f32 to vector<8x128xf32>
    %176 = arith.addf %175, %174 : vector<8x128xf32>
    %177 = arith.divf %175, %176 : vector<8x128xf32>
    %178 = vector.extract_strided_slice %165 {offsets = [0, 256], sizes = [8, 128], strides = [1, 1]} : vector<8x512xf32> to vector<8x128xf32>
    %179 = math.tanh %178 : vector<8x128xf32>
    %180 = vector.extract_strided_slice %165 {offsets = [0, 384], sizes = [8, 128], strides = [1, 1]} : vector<8x512xf32> to vector<8x128xf32>
    %181 = arith.negf %180 : vector<8x128xf32>
    %182 = math.exp %181 : vector<8x128xf32>
    %cst_77 = arith.constant 1.000000e+00 : f32
    %183 = vector.broadcast %cst_77 : f32 to vector<8x128xf32>
    %184 = arith.addf %183, %182 : vector<8x128xf32>
    %185 = arith.divf %183, %184 : vector<8x128xf32>
    %c0_78 = arith.constant 0 : index
    %c0_79 = arith.constant 0 : index
    %186 = vector.load %arg10[%c0_78, %c0_79] : memref<8x128xf32, #tpu.memory_space<vmem>>, vector<8x128xf32>
    %187 = arith.mulf %177, %186 : vector<8x128xf32>
    %188 = arith.mulf %171, %179 : vector<8x128xf32>
    %189 = arith.addf %187, %188 : vector<8x128xf32>
    %190 = math.tanh %189 : vector<8x128xf32>
    %191 = arith.mulf %185, %190 : vector<8x128xf32>
    %c0_80 = arith.constant 0 : index
    %c0_81 = arith.constant 0 : index
    %192 = vector.load %arg10[%c0_80, %c0_81] : memref<8x128xf32, #tpu.memory_space<vmem>>, vector<8x128xf32>
    tpu.vector_store %arg10[%c0_80, %c0_81], %189 {strides = array<i32>} : memref<8x128xf32, #tpu.memory_space<vmem>>, vector<8x128xf32>,
    %c0_82 = arith.constant 0 : index
    %c0_83 = arith.constant 0 : index
    %193 = vector.load %arg9[%c0_82, %c0_83] : memref<8x128xf32, #tpu.memory_space<vmem>>, vector<8x128xf32>
    tpu.vector_store %arg9[%c0_82, %c0_83], %191 {strides = array<i32>} : memref<8x128xf32, #tpu.memory_space<vmem>>, vector<8x128xf32>,
    %194 = arith.index_cast %160 : i32 to index
    %c0_84 = arith.constant 0 : index
    %195 = vector.load %arg14[%194, %c0_84] : memref<64x128xf32, #tpu.memory_space<vmem>>, vector<8x128xf32>
    tpu.vector_store %arg14[%194, %c0_84], %191 {strides = array<i32>} : memref<64x128xf32, #tpu.memory_space<vmem>>, vector<8x128xf32>,
    %c5_i32 = arith.constant 5 : i32
    %c8_i32_85 = arith.constant 8 : i32
    %196 = arith.muli %c5_i32, %c8_i32_85 : i32
    %197 = tpu.assume_multiple %196, 8 : i32
    %198 = arith.index_cast %197 : i32 to index
    %c0_86 = arith.constant 0 : index
    %199 = vector.load %arg13[%198, %c0_86] : memref<64x512xf32, #tpu.memory_space<vmem>>, vector<8x512xf32>
    %c0_87 = arith.constant 0 : index
    %c0_88 = arith.constant 0 : index
    %200 = vector.load %arg9[%c0_87, %c0_88] : memref<8x128xf32, #tpu.memory_space<vmem>>, vector<8x128xf32>
    %cst_89 = arith.constant dense<0.000000e+00> : vector<8x512xf32>
    %201 = tpu.matmul %200, %10, %cst_89 {dimension_numbers = #tpu.dot_dimension_numbers<[1], [0], [0], [1], [0, 0, 1, 1], [], []>} : vector<8x128xf32>, vector<128x512xf32>, vector<8x512xf32> -> vector<8x512xf32>
    %202 = arith.addf %199, %201 : vector<8x512xf32>
    %203 = vector.extract_strided_slice %202 {offsets = [0, 0], sizes = [8, 128], strides = [1, 1]} : vector<8x512xf32> to vector<8x128xf32>
    %204 = arith.negf %203 : vector<8x128xf32>
    %205 = math.exp %204 : vector<8x128xf32>
    %cst_90 = arith.constant 1.000000e+00 : f32
    %206 = vector.broadcast %cst_90 : f32 to vector<8x128xf32>
    %207 = arith.addf %206, %205 : vector<8x128xf32>
    %208 = arith.divf %206, %207 : vector<8x128xf32>
    %209 = vector.extract_strided_slice %202 {offsets = [0, 128], sizes = [8, 128], strides = [1, 1]} : vector<8x512xf32> to vector<8x128xf32>
    %210 = arith.negf %209 : vector<8x128xf32>
    %211 = math.exp %210 : vector<8x128xf32>
    %cst_91 = arith.constant 1.000000e+00 : f32
    %212 = vector.broadcast %cst_91 : f32 to vector<8x128xf32>
    %213 = arith.addf %212, %211 : vector<8x128xf32>
    %214 = arith.divf %212, %213 : vector<8x128xf32>
    %215 = vector.extract_strided_slice %202 {offsets = [0, 256], sizes = [8, 128], strides = [1, 1]} : vector<8x512xf32> to vector<8x128xf32>
    %216 = math.tanh %215 : vector<8x128xf32>
    %217 = vector.extract_strided_slice %202 {offsets = [0, 384], sizes = [8, 128], strides = [1, 1]} : vector<8x512xf32> to vector<8x128xf32>
    %218 = arith.negf %217 : vector<8x128xf32>
    %219 = math.exp %218 : vector<8x128xf32>
    %cst_92 = arith.constant 1.000000e+00 : f32
    %220 = vector.broadcast %cst_92 : f32 to vector<8x128xf32>
    %221 = arith.addf %220, %219 : vector<8x128xf32>
    %222 = arith.divf %220, %221 : vector<8x128xf32>
    %c0_93 = arith.constant 0 : index
    %c0_94 = arith.constant 0 : index
    %223 = vector.load %arg10[%c0_93, %c0_94] : memref<8x128xf32, #tpu.memory_space<vmem>>, vector<8x128xf32>
    %224 = arith.mulf %214, %223 : vector<8x128xf32>
    %225 = arith.mulf %208, %216 : vector<8x128xf32>
    %226 = arith.addf %224, %225 : vector<8x128xf32>
    %227 = math.tanh %226 : vector<8x128xf32>
    %228 = arith.mulf %222, %227 : vector<8x128xf32>
    %c0_95 = arith.constant 0 : index
    %c0_96 = arith.constant 0 : index
    %229 = vector.load %arg10[%c0_95, %c0_96] : memref<8x128xf32, #tpu.memory_space<vmem>>, vector<8x128xf32>
    tpu.vector_store %arg10[%c0_95, %c0_96], %226 {strides = array<i32>} : memref<8x128xf32, #tpu.memory_space<vmem>>, vector<8x128xf32>,
    %c0_97 = arith.constant 0 : index
    %c0_98 = arith.constant 0 : index
    %230 = vector.load %arg9[%c0_97, %c0_98] : memref<8x128xf32, #tpu.memory_space<vmem>>, vector<8x128xf32>
    tpu.vector_store %arg9[%c0_97, %c0_98], %228 {strides = array<i32>} : memref<8x128xf32, #tpu.memory_space<vmem>>, vector<8x128xf32>,
    %231 = arith.index_cast %197 : i32 to index
    %c0_99 = arith.constant 0 : index
    %232 = vector.load %arg14[%231, %c0_99] : memref<64x128xf32, #tpu.memory_space<vmem>>, vector<8x128xf32>
    tpu.vector_store %arg14[%231, %c0_99], %228 {strides = array<i32>} : memref<64x128xf32, #tpu.memory_space<vmem>>, vector<8x128xf32>,
    %c6_i32 = arith.constant 6 : i32
    %c8_i32_100 = arith.constant 8 : i32
    %233 = arith.muli %c6_i32, %c8_i32_100 : i32
    %234 = tpu.assume_multiple %233, 8 : i32
    %235 = arith.index_cast %234 : i32 to index
    %c0_101 = arith.constant 0 : index
    %236 = vector.load %arg13[%235, %c0_101] : memref<64x512xf32, #tpu.memory_space<vmem>>, vector<8x512xf32>
    %c0_102 = arith.constant 0 : index
    %c0_103 = arith.constant 0 : index
    %237 = vector.load %arg9[%c0_102, %c0_103] : memref<8x128xf32, #tpu.memory_space<vmem>>, vector<8x128xf32>
    %cst_104 = arith.constant dense<0.000000e+00> : vector<8x512xf32>
    %238 = tpu.matmul %237, %10, %cst_104 {dimension_numbers = #tpu.dot_dimension_numbers<[1], [0], [0], [1], [0, 0, 1, 1], [], []>} : vector<8x128xf32>, vector<128x512xf32>, vector<8x512xf32> -> vector<8x512xf32>
    %239 = arith.addf %236, %238 : vector<8x512xf32>
    %240 = vector.extract_strided_slice %239 {offsets = [0, 0], sizes = [8, 128], strides = [1, 1]} : vector<8x512xf32> to vector<8x128xf32>
    %241 = arith.negf %240 : vector<8x128xf32>
    %242 = math.exp %241 : vector<8x128xf32>
    %cst_105 = arith.constant 1.000000e+00 : f32
    %243 = vector.broadcast %cst_105 : f32 to vector<8x128xf32>
    %244 = arith.addf %243, %242 : vector<8x128xf32>
    %245 = arith.divf %243, %244 : vector<8x128xf32>
    %246 = vector.extract_strided_slice %239 {offsets = [0, 128], sizes = [8, 128], strides = [1, 1]} : vector<8x512xf32> to vector<8x128xf32>
    %247 = arith.negf %246 : vector<8x128xf32>
    %248 = math.exp %247 : vector<8x128xf32>
    %cst_106 = arith.constant 1.000000e+00 : f32
    %249 = vector.broadcast %cst_106 : f32 to vector<8x128xf32>
    %250 = arith.addf %249, %248 : vector<8x128xf32>
    %251 = arith.divf %249, %250 : vector<8x128xf32>
    %252 = vector.extract_strided_slice %239 {offsets = [0, 256], sizes = [8, 128], strides = [1, 1]} : vector<8x512xf32> to vector<8x128xf32>
    %253 = math.tanh %252 : vector<8x128xf32>
    %254 = vector.extract_strided_slice %239 {offsets = [0, 384], sizes = [8, 128], strides = [1, 1]} : vector<8x512xf32> to vector<8x128xf32>
    %255 = arith.negf %254 : vector<8x128xf32>
    %256 = math.exp %255 : vector<8x128xf32>
    %cst_107 = arith.constant 1.000000e+00 : f32
    %257 = vector.broadcast %cst_107 : f32 to vector<8x128xf32>
    %258 = arith.addf %257, %256 : vector<8x128xf32>
    %259 = arith.divf %257, %258 : vector<8x128xf32>
    %c0_108 = arith.constant 0 : index
    %c0_109 = arith.constant 0 : index
    %260 = vector.load %arg10[%c0_108, %c0_109] : memref<8x128xf32, #tpu.memory_space<vmem>>, vector<8x128xf32>
    %261 = arith.mulf %251, %260 : vector<8x128xf32>
    %262 = arith.mulf %245, %253 : vector<8x128xf32>
    %263 = arith.addf %261, %262 : vector<8x128xf32>
    %264 = math.tanh %263 : vector<8x128xf32>
    %265 = arith.mulf %259, %264 : vector<8x128xf32>
    %c0_110 = arith.constant 0 : index
    %c0_111 = arith.constant 0 : index
    %266 = vector.load %arg10[%c0_110, %c0_111] : memref<8x128xf32, #tpu.memory_space<vmem>>, vector<8x128xf32>
    tpu.vector_store %arg10[%c0_110, %c0_111], %263 {strides = array<i32>} : memref<8x128xf32, #tpu.memory_space<vmem>>, vector<8x128xf32>,
    %c0_112 = arith.constant 0 : index
    %c0_113 = arith.constant 0 : index
    %267 = vector.load %arg9[%c0_112, %c0_113] : memref<8x128xf32, #tpu.memory_space<vmem>>, vector<8x128xf32>
    tpu.vector_store %arg9[%c0_112, %c0_113], %265 {strides = array<i32>} : memref<8x128xf32, #tpu.memory_space<vmem>>, vector<8x128xf32>,
    %268 = arith.index_cast %234 : i32 to index
    %c0_114 = arith.constant 0 : index
    %269 = vector.load %arg14[%268, %c0_114] : memref<64x128xf32, #tpu.memory_space<vmem>>, vector<8x128xf32>
    tpu.vector_store %arg14[%268, %c0_114], %265 {strides = array<i32>} : memref<64x128xf32, #tpu.memory_space<vmem>>, vector<8x128xf32>,
    %c7_i32 = arith.constant 7 : i32
    %c8_i32_115 = arith.constant 8 : i32
    %270 = arith.muli %c7_i32, %c8_i32_115 : i32
    %271 = tpu.assume_multiple %270, 8 : i32
    %272 = arith.index_cast %271 : i32 to index
    %c0_116 = arith.constant 0 : index
    %273 = vector.load %arg13[%272, %c0_116] : memref<64x512xf32, #tpu.memory_space<vmem>>, vector<8x512xf32>
    %c0_117 = arith.constant 0 : index
    %c0_118 = arith.constant 0 : index
    %274 = vector.load %arg9[%c0_117, %c0_118] : memref<8x128xf32, #tpu.memory_space<vmem>>, vector<8x128xf32>
    %cst_119 = arith.constant dense<0.000000e+00> : vector<8x512xf32>
    %275 = tpu.matmul %274, %10, %cst_119 {dimension_numbers = #tpu.dot_dimension_numbers<[1], [0], [0], [1], [0, 0, 1, 1], [], []>} : vector<8x128xf32>, vector<128x512xf32>, vector<8x512xf32> -> vector<8x512xf32>
    %276 = arith.addf %273, %275 : vector<8x512xf32>
    %277 = vector.extract_strided_slice %276 {offsets = [0, 0], sizes = [8, 128], strides = [1, 1]} : vector<8x512xf32> to vector<8x128xf32>
    %278 = arith.negf %277 : vector<8x128xf32>
    %279 = math.exp %278 : vector<8x128xf32>
    %cst_120 = arith.constant 1.000000e+00 : f32
    %280 = vector.broadcast %cst_120 : f32 to vector<8x128xf32>
    %281 = arith.addf %280, %279 : vector<8x128xf32>
    %282 = arith.divf %280, %281 : vector<8x128xf32>
    %283 = vector.extract_strided_slice %276 {offsets = [0, 128], sizes = [8, 128], strides = [1, 1]} : vector<8x512xf32> to vector<8x128xf32>
    %284 = arith.negf %283 : vector<8x128xf32>
    %285 = math.exp %284 : vector<8x128xf32>
    %cst_121 = arith.constant 1.000000e+00 : f32
    %286 = vector.broadcast %cst_121 : f32 to vector<8x128xf32>
    %287 = arith.addf %286, %285 : vector<8x128xf32>
    %288 = arith.divf %286, %287 : vector<8x128xf32>
    %289 = vector.extract_strided_slice %276 {offsets = [0, 256], sizes = [8, 128], strides = [1, 1]} : vector<8x512xf32> to vector<8x128xf32>
    %290 = math.tanh %289 : vector<8x128xf32>
    %291 = vector.extract_strided_slice %276 {offsets = [0, 384], sizes = [8, 128], strides = [1, 1]} : vector<8x512xf32> to vector<8x128xf32>
    %292 = arith.negf %291 : vector<8x128xf32>
    %293 = math.exp %292 : vector<8x128xf32>
    %cst_122 = arith.constant 1.000000e+00 : f32
    %294 = vector.broadcast %cst_122 : f32 to vector<8x128xf32>
    %295 = arith.addf %294, %293 : vector<8x128xf32>
    %296 = arith.divf %294, %295 : vector<8x128xf32>
    %c0_123 = arith.constant 0 : index
    %c0_124 = arith.constant 0 : index
    %297 = vector.load %arg10[%c0_123, %c0_124] : memref<8x128xf32, #tpu.memory_space<vmem>>, vector<8x128xf32>
    %298 = arith.mulf %288, %297 : vector<8x128xf32>
    %299 = arith.mulf %282, %290 : vector<8x128xf32>
    %300 = arith.addf %298, %299 : vector<8x128xf32>
    %301 = math.tanh %300 : vector<8x128xf32>
    %302 = arith.mulf %296, %301 : vector<8x128xf32>
    %c0_125 = arith.constant 0 : index
    %c0_126 = arith.constant 0 : index
    %303 = vector.load %arg10[%c0_125, %c0_126] : memref<8x128xf32, #tpu.memory_space<vmem>>, vector<8x128xf32>
    tpu.vector_store %arg10[%c0_125, %c0_126], %300 {strides = array<i32>} : memref<8x128xf32, #tpu.memory_space<vmem>>, vector<8x128xf32>,
    %c0_127 = arith.constant 0 : index
    %c0_128 = arith.constant 0 : index
    %304 = vector.load %arg9[%c0_127, %c0_128] : memref<8x128xf32, #tpu.memory_space<vmem>>, vector<8x128xf32>
    tpu.vector_store %arg9[%c0_127, %c0_128], %302 {strides = array<i32>} : memref<8x128xf32, #tpu.memory_space<vmem>>, vector<8x128xf32>,
    %305 = arith.index_cast %271 : i32 to index
    %c0_129 = arith.constant 0 : index
    %306 = vector.load %arg14[%305, %c0_129] : memref<64x128xf32, #tpu.memory_space<vmem>>, vector<8x128xf32>
    tpu.vector_store %arg14[%305, %c0_129], %302 {strides = array<i32>} : memref<64x128xf32, #tpu.memory_space<vmem>>, vector<8x128xf32>,
    %c8_i32_130 = arith.constant 8 : i32
    %c0_131 = arith.constant 0 : index
    %c0_132 = arith.constant 0 : index
    %307 = vector.load %arg14[%c0_131, %c0_132] : memref<64x128xf32, #tpu.memory_space<vmem>>, vector<64x128xf32>
    %c0_133 = arith.constant 0 : index
    %c0_134 = arith.constant 0 : index
    %308 = vector.load %arg5[%c0_133, %c0_134] : memref<128x512xf32, #tpu.memory_space<vmem>>, vector<128x512xf32>
    %cst_135 = arith.constant dense<0.000000e+00> : vector<64x512xf32>
    %309 = tpu.matmul %307, %308, %cst_135 {dimension_numbers = #tpu.dot_dimension_numbers<[1], [0], [0], [1], [0, 0, 1, 1], [], []>} : vector<64x128xf32>, vector<128x512xf32>, vector<64x512xf32> -> vector<64x512xf32>
    %c0_136 = arith.constant 0 : index
    %c0_137 = arith.constant 0 : index
    %310 = vector.load %arg7[%c0_136, %c0_137] : memref<1x512xf32, #tpu.memory_space<vmem>>, vector<1x512xf32>
    %311 = vector.broadcast %310 : vector<1x512xf32> to vector<64x512xf32>
    %312 = arith.addf %309, %311 : vector<64x512xf32>
    %c0_138 = arith.constant 0 : index
    %c0_139 = arith.constant 0 : index
    %313 = vector.load %arg13[%c0_138, %c0_139] : memref<64x512xf32, #tpu.memory_space<vmem>>, vector<64x512xf32>
    tpu.vector_store %arg13[%c0_138, %c0_139], %312 {strides = array<i32>} : memref<64x512xf32, #tpu.memory_space<vmem>>, vector<64x512xf32>,
    %c0_140 = arith.constant 0 : index
    %c0_141 = arith.constant 0 : index
    %314 = vector.load %arg6[%c0_140, %c0_141] : memref<128x512xf32, #tpu.memory_space<vmem>>, vector<128x512xf32>
    %c0_i32_142 = arith.constant 0 : i32
    %c8_i32_143 = arith.constant 8 : i32
    %315 = arith.muli %c0_i32_142, %c8_i32_143 : i32
    %316 = tpu.assume_multiple %315, 8 : i32
    %317 = arith.index_cast %316 : i32 to index
    %c0_144 = arith.constant 0 : index
    %318 = vector.load %arg13[%317, %c0_144] : memref<64x512xf32, #tpu.memory_space<vmem>>, vector<8x512xf32>
    %c0_145 = arith.constant 0 : index
    %c0_146 = arith.constant 0 : index
    %319 = vector.load %arg11[%c0_145, %c0_146] : memref<8x128xf32, #tpu.memory_space<vmem>>, vector<8x128xf32>
    %cst_147 = arith.constant dense<0.000000e+00> : vector<8x512xf32>
    %320 = tpu.matmul %319, %314, %cst_147 {dimension_numbers = #tpu.dot_dimension_numbers<[1], [0], [0], [1], [0, 0, 1, 1], [], []>} : vector<8x128xf32>, vector<128x512xf32>, vector<8x512xf32> -> vector<8x512xf32>
    %321 = arith.addf %318, %320 : vector<8x512xf32>
    %322 = vector.extract_strided_slice %321 {offsets = [0, 0], sizes = [8, 128], strides = [1, 1]} : vector<8x512xf32> to vector<8x128xf32>
    %323 = arith.negf %322 : vector<8x128xf32>
    %324 = math.exp %323 : vector<8x128xf32>
    %cst_148 = arith.constant 1.000000e+00 : f32
    %325 = vector.broadcast %cst_148 : f32 to vector<8x128xf32>
    %326 = arith.addf %325, %324 : vector<8x128xf32>
    %327 = arith.divf %325, %326 : vector<8x128xf32>
    %328 = vector.extract_strided_slice %321 {offsets = [0, 128], sizes = [8, 128], strides = [1, 1]} : vector<8x512xf32> to vector<8x128xf32>
    %329 = arith.negf %328 : vector<8x128xf32>
    %330 = math.exp %329 : vector<8x128xf32>
    %cst_149 = arith.constant 1.000000e+00 : f32
    %331 = vector.broadcast %cst_149 : f32 to vector<8x128xf32>
    %332 = arith.addf %331, %330 : vector<8x128xf32>
    %333 = arith.divf %331, %332 : vector<8x128xf32>
    %334 = vector.extract_strided_slice %321 {offsets = [0, 256], sizes = [8, 128], strides = [1, 1]} : vector<8x512xf32> to vector<8x128xf32>
    %335 = math.tanh %334 : vector<8x128xf32>
    %336 = vector.extract_strided_slice %321 {offsets = [0, 384], sizes = [8, 128], strides = [1, 1]} : vector<8x512xf32> to vector<8x128xf32>
    %337 = arith.negf %336 : vector<8x128xf32>
    %338 = math.exp %337 : vector<8x128xf32>
    %cst_150 = arith.constant 1.000000e+00 : f32
    %339 = vector.broadcast %cst_150 : f32 to vector<8x128xf32>
    %340 = arith.addf %339, %338 : vector<8x128xf32>
    %341 = arith.divf %339, %340 : vector<8x128xf32>
    %c0_151 = arith.constant 0 : index
    %c0_152 = arith.constant 0 : index
    %342 = vector.load %arg12[%c0_151, %c0_152] : memref<8x128xf32, #tpu.memory_space<vmem>>, vector<8x128xf32>
    %343 = arith.mulf %333, %342 : vector<8x128xf32>
    %344 = arith.mulf %327, %335 : vector<8x128xf32>
    %345 = arith.addf %343, %344 : vector<8x128xf32>
    %346 = math.tanh %345 : vector<8x128xf32>
    %347 = arith.mulf %341, %346 : vector<8x128xf32>
    %c0_153 = arith.constant 0 : index
    %c0_154 = arith.constant 0 : index
    %348 = vector.load %arg12[%c0_153, %c0_154] : memref<8x128xf32, #tpu.memory_space<vmem>>, vector<8x128xf32>
    tpu.vector_store %arg12[%c0_153, %c0_154], %345 {strides = array<i32>} : memref<8x128xf32, #tpu.memory_space<vmem>>, vector<8x128xf32>,
    %c0_155 = arith.constant 0 : index
    %c0_156 = arith.constant 0 : index
    %349 = vector.load %arg11[%c0_155, %c0_156] : memref<8x128xf32, #tpu.memory_space<vmem>>, vector<8x128xf32>
    tpu.vector_store %arg11[%c0_155, %c0_156], %347 {strides = array<i32>} : memref<8x128xf32, #tpu.memory_space<vmem>>, vector<8x128xf32>,
    %350 = arith.index_cast %316 : i32 to index
    %c0_157 = arith.constant 0 : index
    %351 = vector.load %arg14[%350, %c0_157] : memref<64x128xf32, #tpu.memory_space<vmem>>, vector<8x128xf32>
    tpu.vector_store %arg14[%350, %c0_157], %347 {strides = array<i32>} : memref<64x128xf32, #tpu.memory_space<vmem>>, vector<8x128xf32>,
    %c1_i32_158 = arith.constant 1 : i32
    %c8_i32_159 = arith.constant 8 : i32
    %352 = arith.muli %c1_i32_158, %c8_i32_159 : i32
    %353 = tpu.assume_multiple %352, 8 : i32
    %354 = arith.index_cast %353 : i32 to index
    %c0_160 = arith.constant 0 : index
    %355 = vector.load %arg13[%354, %c0_160] : memref<64x512xf32, #tpu.memory_space<vmem>>, vector<8x512xf32>
    %c0_161 = arith.constant 0 : index
    %c0_162 = arith.constant 0 : index
    %356 = vector.load %arg11[%c0_161, %c0_162] : memref<8x128xf32, #tpu.memory_space<vmem>>, vector<8x128xf32>
    %cst_163 = arith.constant dense<0.000000e+00> : vector<8x512xf32>
    %357 = tpu.matmul %356, %314, %cst_163 {dimension_numbers = #tpu.dot_dimension_numbers<[1], [0], [0], [1], [0, 0, 1, 1], [], []>} : vector<8x128xf32>, vector<128x512xf32>, vector<8x512xf32> -> vector<8x512xf32>
    %358 = arith.addf %355, %357 : vector<8x512xf32>
    %359 = vector.extract_strided_slice %358 {offsets = [0, 0], sizes = [8, 128], strides = [1, 1]} : vector<8x512xf32> to vector<8x128xf32>
    %360 = arith.negf %359 : vector<8x128xf32>
    %361 = math.exp %360 : vector<8x128xf32>
    %cst_164 = arith.constant 1.000000e+00 : f32
    %362 = vector.broadcast %cst_164 : f32 to vector<8x128xf32>
    %363 = arith.addf %362, %361 : vector<8x128xf32>
    %364 = arith.divf %362, %363 : vector<8x128xf32>
    %365 = vector.extract_strided_slice %358 {offsets = [0, 128], sizes = [8, 128], strides = [1, 1]} : vector<8x512xf32> to vector<8x128xf32>
    %366 = arith.negf %365 : vector<8x128xf32>
    %367 = math.exp %366 : vector<8x128xf32>
    %cst_165 = arith.constant 1.000000e+00 : f32
    %368 = vector.broadcast %cst_165 : f32 to vector<8x128xf32>
    %369 = arith.addf %368, %367 : vector<8x128xf32>
    %370 = arith.divf %368, %369 : vector<8x128xf32>
    %371 = vector.extract_strided_slice %358 {offsets = [0, 256], sizes = [8, 128], strides = [1, 1]} : vector<8x512xf32> to vector<8x128xf32>
    %372 = math.tanh %371 : vector<8x128xf32>
    %373 = vector.extract_strided_slice %358 {offsets = [0, 384], sizes = [8, 128], strides = [1, 1]} : vector<8x512xf32> to vector<8x128xf32>
    %374 = arith.negf %373 : vector<8x128xf32>
    %375 = math.exp %374 : vector<8x128xf32>
    %cst_166 = arith.constant 1.000000e+00 : f32
    %376 = vector.broadcast %cst_166 : f32 to vector<8x128xf32>
    %377 = arith.addf %376, %375 : vector<8x128xf32>
    %378 = arith.divf %376, %377 : vector<8x128xf32>
    %c0_167 = arith.constant 0 : index
    %c0_168 = arith.constant 0 : index
    %379 = vector.load %arg12[%c0_167, %c0_168] : memref<8x128xf32, #tpu.memory_space<vmem>>, vector<8x128xf32>
    %380 = arith.mulf %370, %379 : vector<8x128xf32>
    %381 = arith.mulf %364, %372 : vector<8x128xf32>
    %382 = arith.addf %380, %381 : vector<8x128xf32>
    %383 = math.tanh %382 : vector<8x128xf32>
    %384 = arith.mulf %378, %383 : vector<8x128xf32>
    %c0_169 = arith.constant 0 : index
    %c0_170 = arith.constant 0 : index
    %385 = vector.load %arg12[%c0_169, %c0_170] : memref<8x128xf32, #tpu.memory_space<vmem>>, vector<8x128xf32>
    tpu.vector_store %arg12[%c0_169, %c0_170], %382 {strides = array<i32>} : memref<8x128xf32, #tpu.memory_space<vmem>>, vector<8x128xf32>,
    %c0_171 = arith.constant 0 : index
    %c0_172 = arith.constant 0 : index
    %386 = vector.load %arg11[%c0_171, %c0_172] : memref<8x128xf32, #tpu.memory_space<vmem>>, vector<8x128xf32>
    tpu.vector_store %arg11[%c0_171, %c0_172], %384 {strides = array<i32>} : memref<8x128xf32, #tpu.memory_space<vmem>>, vector<8x128xf32>,
    %387 = arith.index_cast %353 : i32 to index
    %c0_173 = arith.constant 0 : index
    %388 = vector.load %arg14[%387, %c0_173] : memref<64x128xf32, #tpu.memory_space<vmem>>, vector<8x128xf32>
    tpu.vector_store %arg14[%387, %c0_173], %384 {strides = array<i32>} : memref<64x128xf32, #tpu.memory_space<vmem>>, vector<8x128xf32>,
    %c2_i32_174 = arith.constant 2 : i32
    %c8_i32_175 = arith.constant 8 : i32
    %389 = arith.muli %c2_i32_174, %c8_i32_175 : i32
    %390 = tpu.assume_multiple %389, 8 : i32
    %391 = arith.index_cast %390 : i32 to index
    %c0_176 = arith.constant 0 : index
    %392 = vector.load %arg13[%391, %c0_176] : memref<64x512xf32, #tpu.memory_space<vmem>>, vector<8x512xf32>
    %c0_177 = arith.constant 0 : index
    %c0_178 = arith.constant 0 : index
    %393 = vector.load %arg11[%c0_177, %c0_178] : memref<8x128xf32, #tpu.memory_space<vmem>>, vector<8x128xf32>
    %cst_179 = arith.constant dense<0.000000e+00> : vector<8x512xf32>
    %394 = tpu.matmul %393, %314, %cst_179 {dimension_numbers = #tpu.dot_dimension_numbers<[1], [0], [0], [1], [0, 0, 1, 1], [], []>} : vector<8x128xf32>, vector<128x512xf32>, vector<8x512xf32> -> vector<8x512xf32>
    %395 = arith.addf %392, %394 : vector<8x512xf32>
    %396 = vector.extract_strided_slice %395 {offsets = [0, 0], sizes = [8, 128], strides = [1, 1]} : vector<8x512xf32> to vector<8x128xf32>
    %397 = arith.negf %396 : vector<8x128xf32>
    %398 = math.exp %397 : vector<8x128xf32>
    %cst_180 = arith.constant 1.000000e+00 : f32
    %399 = vector.broadcast %cst_180 : f32 to vector<8x128xf32>
    %400 = arith.addf %399, %398 : vector<8x128xf32>
    %401 = arith.divf %399, %400 : vector<8x128xf32>
    %402 = vector.extract_strided_slice %395 {offsets = [0, 128], sizes = [8, 128], strides = [1, 1]} : vector<8x512xf32> to vector<8x128xf32>
    %403 = arith.negf %402 : vector<8x128xf32>
    %404 = math.exp %403 : vector<8x128xf32>
    %cst_181 = arith.constant 1.000000e+00 : f32
    %405 = vector.broadcast %cst_181 : f32 to vector<8x128xf32>
    %406 = arith.addf %405, %404 : vector<8x128xf32>
    %407 = arith.divf %405, %406 : vector<8x128xf32>
    %408 = vector.extract_strided_slice %395 {offsets = [0, 256], sizes = [8, 128], strides = [1, 1]} : vector<8x512xf32> to vector<8x128xf32>
    %409 = math.tanh %408 : vector<8x128xf32>
    %410 = vector.extract_strided_slice %395 {offsets = [0, 384], sizes = [8, 128], strides = [1, 1]} : vector<8x512xf32> to vector<8x128xf32>
    %411 = arith.negf %410 : vector<8x128xf32>
    %412 = math.exp %411 : vector<8x128xf32>
    %cst_182 = arith.constant 1.000000e+00 : f32
    %413 = vector.broadcast %cst_182 : f32 to vector<8x128xf32>
    %414 = arith.addf %413, %412 : vector<8x128xf32>
    %415 = arith.divf %413, %414 : vector<8x128xf32>
    %c0_183 = arith.constant 0 : index
    %c0_184 = arith.constant 0 : index
    %416 = vector.load %arg12[%c0_183, %c0_184] : memref<8x128xf32, #tpu.memory_space<vmem>>, vector<8x128xf32>
    %417 = arith.mulf %407, %416 : vector<8x128xf32>
    %418 = arith.mulf %401, %409 : vector<8x128xf32>
    %419 = arith.addf %417, %418 : vector<8x128xf32>
    %420 = math.tanh %419 : vector<8x128xf32>
    %421 = arith.mulf %415, %420 : vector<8x128xf32>
    %c0_185 = arith.constant 0 : index
    %c0_186 = arith.constant 0 : index
    %422 = vector.load %arg12[%c0_185, %c0_186] : memref<8x128xf32, #tpu.memory_space<vmem>>, vector<8x128xf32>
    tpu.vector_store %arg12[%c0_185, %c0_186], %419 {strides = array<i32>} : memref<8x128xf32, #tpu.memory_space<vmem>>, vector<8x128xf32>,
    %c0_187 = arith.constant 0 : index
    %c0_188 = arith.constant 0 : index
    %423 = vector.load %arg11[%c0_187, %c0_188] : memref<8x128xf32, #tpu.memory_space<vmem>>, vector<8x128xf32>
    tpu.vector_store %arg11[%c0_187, %c0_188], %421 {strides = array<i32>} : memref<8x128xf32, #tpu.memory_space<vmem>>, vector<8x128xf32>,
    %424 = arith.index_cast %390 : i32 to index
    %c0_189 = arith.constant 0 : index
    %425 = vector.load %arg14[%424, %c0_189] : memref<64x128xf32, #tpu.memory_space<vmem>>, vector<8x128xf32>
    tpu.vector_store %arg14[%424, %c0_189], %421 {strides = array<i32>} : memref<64x128xf32, #tpu.memory_space<vmem>>, vector<8x128xf32>,
    %c3_i32_190 = arith.constant 3 : i32
    %c8_i32_191 = arith.constant 8 : i32
    %426 = arith.muli %c3_i32_190, %c8_i32_191 : i32
    %427 = tpu.assume_multiple %426, 8 : i32
    %428 = arith.index_cast %427 : i32 to index
    %c0_192 = arith.constant 0 : index
    %429 = vector.load %arg13[%428, %c0_192] : memref<64x512xf32, #tpu.memory_space<vmem>>, vector<8x512xf32>
    %c0_193 = arith.constant 0 : index
    %c0_194 = arith.constant 0 : index
    %430 = vector.load %arg11[%c0_193, %c0_194] : memref<8x128xf32, #tpu.memory_space<vmem>>, vector<8x128xf32>
    %cst_195 = arith.constant dense<0.000000e+00> : vector<8x512xf32>
    %431 = tpu.matmul %430, %314, %cst_195 {dimension_numbers = #tpu.dot_dimension_numbers<[1], [0], [0], [1], [0, 0, 1, 1], [], []>} : vector<8x128xf32>, vector<128x512xf32>, vector<8x512xf32> -> vector<8x512xf32>
    %432 = arith.addf %429, %431 : vector<8x512xf32>
    %433 = vector.extract_strided_slice %432 {offsets = [0, 0], sizes = [8, 128], strides = [1, 1]} : vector<8x512xf32> to vector<8x128xf32>
    %434 = arith.negf %433 : vector<8x128xf32>
    %435 = math.exp %434 : vector<8x128xf32>
    %cst_196 = arith.constant 1.000000e+00 : f32
    %436 = vector.broadcast %cst_196 : f32 to vector<8x128xf32>
    %437 = arith.addf %436, %435 : vector<8x128xf32>
    %438 = arith.divf %436, %437 : vector<8x128xf32>
    %439 = vector.extract_strided_slice %432 {offsets = [0, 128], sizes = [8, 128], strides = [1, 1]} : vector<8x512xf32> to vector<8x128xf32>
    %440 = arith.negf %439 : vector<8x128xf32>
    %441 = math.exp %440 : vector<8x128xf32>
    %cst_197 = arith.constant 1.000000e+00 : f32
    %442 = vector.broadcast %cst_197 : f32 to vector<8x128xf32>
    %443 = arith.addf %442, %441 : vector<8x128xf32>
    %444 = arith.divf %442, %443 : vector<8x128xf32>
    %445 = vector.extract_strided_slice %432 {offsets = [0, 256], sizes = [8, 128], strides = [1, 1]} : vector<8x512xf32> to vector<8x128xf32>
    %446 = math.tanh %445 : vector<8x128xf32>
    %447 = vector.extract_strided_slice %432 {offsets = [0, 384], sizes = [8, 128], strides = [1, 1]} : vector<8x512xf32> to vector<8x128xf32>
    %448 = arith.negf %447 : vector<8x128xf32>
    %449 = math.exp %448 : vector<8x128xf32>
    %cst_198 = arith.constant 1.000000e+00 : f32
    %450 = vector.broadcast %cst_198 : f32 to vector<8x128xf32>
    %451 = arith.addf %450, %449 : vector<8x128xf32>
    %452 = arith.divf %450, %451 : vector<8x128xf32>
    %c0_199 = arith.constant 0 : index
    %c0_200 = arith.constant 0 : index
    %453 = vector.load %arg12[%c0_199, %c0_200] : memref<8x128xf32, #tpu.memory_space<vmem>>, vector<8x128xf32>
    %454 = arith.mulf %444, %453 : vector<8x128xf32>
    %455 = arith.mulf %438, %446 : vector<8x128xf32>
    %456 = arith.addf %454, %455 : vector<8x128xf32>
    %457 = math.tanh %456 : vector<8x128xf32>
    %458 = arith.mulf %452, %457 : vector<8x128xf32>
    %c0_201 = arith.constant 0 : index
    %c0_202 = arith.constant 0 : index
    %459 = vector.load %arg12[%c0_201, %c0_202] : memref<8x128xf32, #tpu.memory_space<vmem>>, vector<8x128xf32>
    tpu.vector_store %arg12[%c0_201, %c0_202], %456 {strides = array<i32>} : memref<8x128xf32, #tpu.memory_space<vmem>>, vector<8x128xf32>,
    %c0_203 = arith.constant 0 : index
    %c0_204 = arith.constant 0 : index
    %460 = vector.load %arg11[%c0_203, %c0_204] : memref<8x128xf32, #tpu.memory_space<vmem>>, vector<8x128xf32>
    tpu.vector_store %arg11[%c0_203, %c0_204], %458 {strides = array<i32>} : memref<8x128xf32, #tpu.memory_space<vmem>>, vector<8x128xf32>,
    %461 = arith.index_cast %427 : i32 to index
    %c0_205 = arith.constant 0 : index
    %462 = vector.load %arg14[%461, %c0_205] : memref<64x128xf32, #tpu.memory_space<vmem>>, vector<8x128xf32>
    tpu.vector_store %arg14[%461, %c0_205], %458 {strides = array<i32>} : memref<64x128xf32, #tpu.memory_space<vmem>>, vector<8x128xf32>,
    %c4_i32_206 = arith.constant 4 : i32
    %c8_i32_207 = arith.constant 8 : i32
    %463 = arith.muli %c4_i32_206, %c8_i32_207 : i32
    %464 = tpu.assume_multiple %463, 8 : i32
    %465 = arith.index_cast %464 : i32 to index
    %c0_208 = arith.constant 0 : index
    %466 = vector.load %arg13[%465, %c0_208] : memref<64x512xf32, #tpu.memory_space<vmem>>, vector<8x512xf32>
    %c0_209 = arith.constant 0 : index
    %c0_210 = arith.constant 0 : index
    %467 = vector.load %arg11[%c0_209, %c0_210] : memref<8x128xf32, #tpu.memory_space<vmem>>, vector<8x128xf32>
    %cst_211 = arith.constant dense<0.000000e+00> : vector<8x512xf32>
    %468 = tpu.matmul %467, %314, %cst_211 {dimension_numbers = #tpu.dot_dimension_numbers<[1], [0], [0], [1], [0, 0, 1, 1], [], []>} : vector<8x128xf32>, vector<128x512xf32>, vector<8x512xf32> -> vector<8x512xf32>
    %469 = arith.addf %466, %468 : vector<8x512xf32>
    %470 = vector.extract_strided_slice %469 {offsets = [0, 0], sizes = [8, 128], strides = [1, 1]} : vector<8x512xf32> to vector<8x128xf32>
    %471 = arith.negf %470 : vector<8x128xf32>
    %472 = math.exp %471 : vector<8x128xf32>
    %cst_212 = arith.constant 1.000000e+00 : f32
    %473 = vector.broadcast %cst_212 : f32 to vector<8x128xf32>
    %474 = arith.addf %473, %472 : vector<8x128xf32>
    %475 = arith.divf %473, %474 : vector<8x128xf32>
    %476 = vector.extract_strided_slice %469 {offsets = [0, 128], sizes = [8, 128], strides = [1, 1]} : vector<8x512xf32> to vector<8x128xf32>
    %477 = arith.negf %476 : vector<8x128xf32>
    %478 = math.exp %477 : vector<8x128xf32>
    %cst_213 = arith.constant 1.000000e+00 : f32
    %479 = vector.broadcast %cst_213 : f32 to vector<8x128xf32>
    %480 = arith.addf %479, %478 : vector<8x128xf32>
    %481 = arith.divf %479, %480 : vector<8x128xf32>
    %482 = vector.extract_strided_slice %469 {offsets = [0, 256], sizes = [8, 128], strides = [1, 1]} : vector<8x512xf32> to vector<8x128xf32>
    %483 = math.tanh %482 : vector<8x128xf32>
    %484 = vector.extract_strided_slice %469 {offsets = [0, 384], sizes = [8, 128], strides = [1, 1]} : vector<8x512xf32> to vector<8x128xf32>
    %485 = arith.negf %484 : vector<8x128xf32>
    %486 = math.exp %485 : vector<8x128xf32>
    %cst_214 = arith.constant 1.000000e+00 : f32
    %487 = vector.broadcast %cst_214 : f32 to vector<8x128xf32>
    %488 = arith.addf %487, %486 : vector<8x128xf32>
    %489 = arith.divf %487, %488 : vector<8x128xf32>
    %c0_215 = arith.constant 0 : index
    %c0_216 = arith.constant 0 : index
    %490 = vector.load %arg12[%c0_215, %c0_216] : memref<8x128xf32, #tpu.memory_space<vmem>>, vector<8x128xf32>
    %491 = arith.mulf %481, %490 : vector<8x128xf32>
    %492 = arith.mulf %475, %483 : vector<8x128xf32>
    %493 = arith.addf %491, %492 : vector<8x128xf32>
    %494 = math.tanh %493 : vector<8x128xf32>
    %495 = arith.mulf %489, %494 : vector<8x128xf32>
    %c0_217 = arith.constant 0 : index
    %c0_218 = arith.constant 0 : index
    %496 = vector.load %arg12[%c0_217, %c0_218] : memref<8x128xf32, #tpu.memory_space<vmem>>, vector<8x128xf32>
    tpu.vector_store %arg12[%c0_217, %c0_218], %493 {strides = array<i32>} : memref<8x128xf32, #tpu.memory_space<vmem>>, vector<8x128xf32>,
    %c0_219 = arith.constant 0 : index
    %c0_220 = arith.constant 0 : index
    %497 = vector.load %arg11[%c0_219, %c0_220] : memref<8x128xf32, #tpu.memory_space<vmem>>, vector<8x128xf32>
    tpu.vector_store %arg11[%c0_219, %c0_220], %495 {strides = array<i32>} : memref<8x128xf32, #tpu.memory_space<vmem>>, vector<8x128xf32>,
    %498 = arith.index_cast %464 : i32 to index
    %c0_221 = arith.constant 0 : index
    %499 = vector.load %arg14[%498, %c0_221] : memref<64x128xf32, #tpu.memory_space<vmem>>, vector<8x128xf32>
    tpu.vector_store %arg14[%498, %c0_221], %495 {strides = array<i32>} : memref<64x128xf32, #tpu.memory_space<vmem>>, vector<8x128xf32>,
    %c5_i32_222 = arith.constant 5 : i32
    %c8_i32_223 = arith.constant 8 : i32
    %500 = arith.muli %c5_i32_222, %c8_i32_223 : i32
    %501 = tpu.assume_multiple %500, 8 : i32
    %502 = arith.index_cast %501 : i32 to index
    %c0_224 = arith.constant 0 : index
    %503 = vector.load %arg13[%502, %c0_224] : memref<64x512xf32, #tpu.memory_space<vmem>>, vector<8x512xf32>
    %c0_225 = arith.constant 0 : index
    %c0_226 = arith.constant 0 : index
    %504 = vector.load %arg11[%c0_225, %c0_226] : memref<8x128xf32, #tpu.memory_space<vmem>>, vector<8x128xf32>
    %cst_227 = arith.constant dense<0.000000e+00> : vector<8x512xf32>
    %505 = tpu.matmul %504, %314, %cst_227 {dimension_numbers = #tpu.dot_dimension_numbers<[1], [0], [0], [1], [0, 0, 1, 1], [], []>} : vector<8x128xf32>, vector<128x512xf32>, vector<8x512xf32> -> vector<8x512xf32>
    %506 = arith.addf %503, %505 : vector<8x512xf32>
    %507 = vector.extract_strided_slice %506 {offsets = [0, 0], sizes = [8, 128], strides = [1, 1]} : vector<8x512xf32> to vector<8x128xf32>
    %508 = arith.negf %507 : vector<8x128xf32>
    %509 = math.exp %508 : vector<8x128xf32>
    %cst_228 = arith.constant 1.000000e+00 : f32
    %510 = vector.broadcast %cst_228 : f32 to vector<8x128xf32>
    %511 = arith.addf %510, %509 : vector<8x128xf32>
    %512 = arith.divf %510, %511 : vector<8x128xf32>
    %513 = vector.extract_strided_slice %506 {offsets = [0, 128], sizes = [8, 128], strides = [1, 1]} : vector<8x512xf32> to vector<8x128xf32>
    %514 = arith.negf %513 : vector<8x128xf32>
    %515 = math.exp %514 : vector<8x128xf32>
    %cst_229 = arith.constant 1.000000e+00 : f32
    %516 = vector.broadcast %cst_229 : f32 to vector<8x128xf32>
    %517 = arith.addf %516, %515 : vector<8x128xf32>
    %518 = arith.divf %516, %517 : vector<8x128xf32>
    %519 = vector.extract_strided_slice %506 {offsets = [0, 256], sizes = [8, 128], strides = [1, 1]} : vector<8x512xf32> to vector<8x128xf32>
    %520 = math.tanh %519 : vector<8x128xf32>
    %521 = vector.extract_strided_slice %506 {offsets = [0, 384], sizes = [8, 128], strides = [1, 1]} : vector<8x512xf32> to vector<8x128xf32>
    %522 = arith.negf %521 : vector<8x128xf32>
    %523 = math.exp %522 : vector<8x128xf32>
    %cst_230 = arith.constant 1.000000e+00 : f32
    %524 = vector.broadcast %cst_230 : f32 to vector<8x128xf32>
    %525 = arith.addf %524, %523 : vector<8x128xf32>
    %526 = arith.divf %524, %525 : vector<8x128xf32>
    %c0_231 = arith.constant 0 : index
    %c0_232 = arith.constant 0 : index
    %527 = vector.load %arg12[%c0_231, %c0_232] : memref<8x128xf32, #tpu.memory_space<vmem>>, vector<8x128xf32>
    %528 = arith.mulf %518, %527 : vector<8x128xf32>
    %529 = arith.mulf %512, %520 : vector<8x128xf32>
    %530 = arith.addf %528, %529 : vector<8x128xf32>
    %531 = math.tanh %530 : vector<8x128xf32>
    %532 = arith.mulf %526, %531 : vector<8x128xf32>
    %c0_233 = arith.constant 0 : index
    %c0_234 = arith.constant 0 : index
    %533 = vector.load %arg12[%c0_233, %c0_234] : memref<8x128xf32, #tpu.memory_space<vmem>>, vector<8x128xf32>
    tpu.vector_store %arg12[%c0_233, %c0_234], %530 {strides = array<i32>} : memref<8x128xf32, #tpu.memory_space<vmem>>, vector<8x128xf32>,
    %c0_235 = arith.constant 0 : index
    %c0_236 = arith.constant 0 : index
    %534 = vector.load %arg11[%c0_235, %c0_236] : memref<8x128xf32, #tpu.memory_space<vmem>>, vector<8x128xf32>
    tpu.vector_store %arg11[%c0_235, %c0_236], %532 {strides = array<i32>} : memref<8x128xf32, #tpu.memory_space<vmem>>, vector<8x128xf32>,
    %535 = arith.index_cast %501 : i32 to index
    %c0_237 = arith.constant 0 : index
    %536 = vector.load %arg14[%535, %c0_237] : memref<64x128xf32, #tpu.memory_space<vmem>>, vector<8x128xf32>
    tpu.vector_store %arg14[%535, %c0_237], %532 {strides = array<i32>} : memref<64x128xf32, #tpu.memory_space<vmem>>, vector<8x128xf32>,
    %c6_i32_238 = arith.constant 6 : i32
    %c8_i32_239 = arith.constant 8 : i32
    %537 = arith.muli %c6_i32_238, %c8_i32_239 : i32
    %538 = tpu.assume_multiple %537, 8 : i32
    %539 = arith.index_cast %538 : i32 to index
    %c0_240 = arith.constant 0 : index
    %540 = vector.load %arg13[%539, %c0_240] : memref<64x512xf32, #tpu.memory_space<vmem>>, vector<8x512xf32>
    %c0_241 = arith.constant 0 : index
    %c0_242 = arith.constant 0 : index
    %541 = vector.load %arg11[%c0_241, %c0_242] : memref<8x128xf32, #tpu.memory_space<vmem>>, vector<8x128xf32>
    %cst_243 = arith.constant dense<0.000000e+00> : vector<8x512xf32>
    %542 = tpu.matmul %541, %314, %cst_243 {dimension_numbers = #tpu.dot_dimension_numbers<[1], [0], [0], [1], [0, 0, 1, 1], [], []>} : vector<8x128xf32>, vector<128x512xf32>, vector<8x512xf32> -> vector<8x512xf32>
    %543 = arith.addf %540, %542 : vector<8x512xf32>
    %544 = vector.extract_strided_slice %543 {offsets = [0, 0], sizes = [8, 128], strides = [1, 1]} : vector<8x512xf32> to vector<8x128xf32>
    %545 = arith.negf %544 : vector<8x128xf32>
    %546 = math.exp %545 : vector<8x128xf32>
    %cst_244 = arith.constant 1.000000e+00 : f32
    %547 = vector.broadcast %cst_244 : f32 to vector<8x128xf32>
    %548 = arith.addf %547, %546 : vector<8x128xf32>
    %549 = arith.divf %547, %548 : vector<8x128xf32>
    %550 = vector.extract_strided_slice %543 {offsets = [0, 128], sizes = [8, 128], strides = [1, 1]} : vector<8x512xf32> to vector<8x128xf32>
    %551 = arith.negf %550 : vector<8x128xf32>
    %552 = math.exp %551 : vector<8x128xf32>
    %cst_245 = arith.constant 1.000000e+00 : f32
    %553 = vector.broadcast %cst_245 : f32 to vector<8x128xf32>
    %554 = arith.addf %553, %552 : vector<8x128xf32>
    %555 = arith.divf %553, %554 : vector<8x128xf32>
    %556 = vector.extract_strided_slice %543 {offsets = [0, 256], sizes = [8, 128], strides = [1, 1]} : vector<8x512xf32> to vector<8x128xf32>
    %557 = math.tanh %556 : vector<8x128xf32>
    %558 = vector.extract_strided_slice %543 {offsets = [0, 384], sizes = [8, 128], strides = [1, 1]} : vector<8x512xf32> to vector<8x128xf32>
    %559 = arith.negf %558 : vector<8x128xf32>
    %560 = math.exp %559 : vector<8x128xf32>
    %cst_246 = arith.constant 1.000000e+00 : f32
    %561 = vector.broadcast %cst_246 : f32 to vector<8x128xf32>
    %562 = arith.addf %561, %560 : vector<8x128xf32>
    %563 = arith.divf %561, %562 : vector<8x128xf32>
    %c0_247 = arith.constant 0 : index
    %c0_248 = arith.constant 0 : index
    %564 = vector.load %arg12[%c0_247, %c0_248] : memref<8x128xf32, #tpu.memory_space<vmem>>, vector<8x128xf32>
    %565 = arith.mulf %555, %564 : vector<8x128xf32>
    %566 = arith.mulf %549, %557 : vector<8x128xf32>
    %567 = arith.addf %565, %566 : vector<8x128xf32>
    %568 = math.tanh %567 : vector<8x128xf32>
    %569 = arith.mulf %563, %568 : vector<8x128xf32>
    %c0_249 = arith.constant 0 : index
    %c0_250 = arith.constant 0 : index
    %570 = vector.load %arg12[%c0_249, %c0_250] : memref<8x128xf32, #tpu.memory_space<vmem>>, vector<8x128xf32>
    tpu.vector_store %arg12[%c0_249, %c0_250], %567 {strides = array<i32>} : memref<8x128xf32, #tpu.memory_space<vmem>>, vector<8x128xf32>,
    %c0_251 = arith.constant 0 : index
    %c0_252 = arith.constant 0 : index
    %571 = vector.load %arg11[%c0_251, %c0_252] : memref<8x128xf32, #tpu.memory_space<vmem>>, vector<8x128xf32>
    tpu.vector_store %arg11[%c0_251, %c0_252], %569 {strides = array<i32>} : memref<8x128xf32, #tpu.memory_space<vmem>>, vector<8x128xf32>,
    %572 = arith.index_cast %538 : i32 to index
    %c0_253 = arith.constant 0 : index
    %573 = vector.load %arg14[%572, %c0_253] : memref<64x128xf32, #tpu.memory_space<vmem>>, vector<8x128xf32>
    tpu.vector_store %arg14[%572, %c0_253], %569 {strides = array<i32>} : memref<64x128xf32, #tpu.memory_space<vmem>>, vector<8x128xf32>,
    %c7_i32_254 = arith.constant 7 : i32
    %c8_i32_255 = arith.constant 8 : i32
    %574 = arith.muli %c7_i32_254, %c8_i32_255 : i32
    %575 = tpu.assume_multiple %574, 8 : i32
    %576 = arith.index_cast %575 : i32 to index
    %c0_256 = arith.constant 0 : index
    %577 = vector.load %arg13[%576, %c0_256] : memref<64x512xf32, #tpu.memory_space<vmem>>, vector<8x512xf32>
    %c0_257 = arith.constant 0 : index
    %c0_258 = arith.constant 0 : index
    %578 = vector.load %arg11[%c0_257, %c0_258] : memref<8x128xf32, #tpu.memory_space<vmem>>, vector<8x128xf32>
    %cst_259 = arith.constant dense<0.000000e+00> : vector<8x512xf32>
    %579 = tpu.matmul %578, %314, %cst_259 {dimension_numbers = #tpu.dot_dimension_numbers<[1], [0], [0], [1], [0, 0, 1, 1], [], []>} : vector<8x128xf32>, vector<128x512xf32>, vector<8x512xf32> -> vector<8x512xf32>
    %580 = arith.addf %577, %579 : vector<8x512xf32>
    %581 = vector.extract_strided_slice %580 {offsets = [0, 0], sizes = [8, 128], strides = [1, 1]} : vector<8x512xf32> to vector<8x128xf32>
    %582 = arith.negf %581 : vector<8x128xf32>
    %583 = math.exp %582 : vector<8x128xf32>
    %cst_260 = arith.constant 1.000000e+00 : f32
    %584 = vector.broadcast %cst_260 : f32 to vector<8x128xf32>
    %585 = arith.addf %584, %583 : vector<8x128xf32>
    %586 = arith.divf %584, %585 : vector<8x128xf32>
    %587 = vector.extract_strided_slice %580 {offsets = [0, 128], sizes = [8, 128], strides = [1, 1]} : vector<8x512xf32> to vector<8x128xf32>
    %588 = arith.negf %587 : vector<8x128xf32>
    %589 = math.exp %588 : vector<8x128xf32>
    %cst_261 = arith.constant 1.000000e+00 : f32
    %590 = vector.broadcast %cst_261 : f32 to vector<8x128xf32>
    %591 = arith.addf %590, %589 : vector<8x128xf32>
    %592 = arith.divf %590, %591 : vector<8x128xf32>
    %593 = vector.extract_strided_slice %580 {offsets = [0, 256], sizes = [8, 128], strides = [1, 1]} : vector<8x512xf32> to vector<8x128xf32>
    %594 = math.tanh %593 : vector<8x128xf32>
    %595 = vector.extract_strided_slice %580 {offsets = [0, 384], sizes = [8, 128], strides = [1, 1]} : vector<8x512xf32> to vector<8x128xf32>
    %596 = arith.negf %595 : vector<8x128xf32>
    %597 = math.exp %596 : vector<8x128xf32>
    %cst_262 = arith.constant 1.000000e+00 : f32
    %598 = vector.broadcast %cst_262 : f32 to vector<8x128xf32>
    %599 = arith.addf %598, %597 : vector<8x128xf32>
    %600 = arith.divf %598, %599 : vector<8x128xf32>
    %c0_263 = arith.constant 0 : index
    %c0_264 = arith.constant 0 : index
    %601 = vector.load %arg12[%c0_263, %c0_264] : memref<8x128xf32, #tpu.memory_space<vmem>>, vector<8x128xf32>
    %602 = arith.mulf %592, %601 : vector<8x128xf32>
    %603 = arith.mulf %586, %594 : vector<8x128xf32>
    %604 = arith.addf %602, %603 : vector<8x128xf32>
    %605 = math.tanh %604 : vector<8x128xf32>
    %606 = arith.mulf %600, %605 : vector<8x128xf32>
    %c0_265 = arith.constant 0 : index
    %c0_266 = arith.constant 0 : index
    %607 = vector.load %arg12[%c0_265, %c0_266] : memref<8x128xf32, #tpu.memory_space<vmem>>, vector<8x128xf32>
    tpu.vector_store %arg12[%c0_265, %c0_266], %604 {strides = array<i32>} : memref<8x128xf32, #tpu.memory_space<vmem>>, vector<8x128xf32>,
    %c0_267 = arith.constant 0 : index
    %c0_268 = arith.constant 0 : index
    %608 = vector.load %arg11[%c0_267, %c0_268] : memref<8x128xf32, #tpu.memory_space<vmem>>, vector<8x128xf32>
    tpu.vector_store %arg11[%c0_267, %c0_268], %606 {strides = array<i32>} : memref<8x128xf32, #tpu.memory_space<vmem>>, vector<8x128xf32>,
    %609 = arith.index_cast %575 : i32 to index
    %c0_269 = arith.constant 0 : index
    %610 = vector.load %arg14[%609, %c0_269] : memref<64x128xf32, #tpu.memory_space<vmem>>, vector<8x128xf32>
    tpu.vector_store %arg14[%609, %c0_269], %606 {strides = array<i32>} : memref<64x128xf32, #tpu.memory_space<vmem>>, vector<8x128xf32>,
    %c8_i32_270 = arith.constant 8 : i32
    %c0_271 = arith.constant 0 : index
    %c0_272 = arith.constant 0 : index
    %611 = vector.load %arg14[%c0_271, %c0_272] : memref<64x128xf32, #tpu.memory_space<vmem>>, vector<64x128xf32>
    %c0_273 = arith.constant 0 : index
    %c0_274 = arith.constant 0 : index
    %612 = vector.load %arg8[%c0_273, %c0_274] : memref<64x128xf32, #tpu.memory_space<vmem>>, vector<64x128xf32>
    tpu.vector_store %arg8[%c0_273, %c0_274], %611 {strides = array<i32>} : memref<64x128xf32, #tpu.memory_space<vmem>>, vector<64x128xf32>,
    return
  }
  func.func @transform_0(%arg0: i32) -> (i32, i32) {
    %c0_i32 = arith.constant 0 : i32
    %c0_i32_0 = arith.constant 0 : i32
    return %arg0, %c0_i32 : i32, i32
  }
  func.func @transform_1(%arg0: i32) -> (i32, i32) {
    %c0_i32 = arith.constant 0 : i32
    %c0_i32_0 = arith.constant 0 : i32
    %c0_i32_1 = arith.constant 0 : i32
    return %c0_i32, %c0_i32_0 : i32, i32
  }
  func.func @transform_2(%arg0: i32) -> (i32, i32) {
    %c0_i32 = arith.constant 0 : i32
    %c0_i32_0 = arith.constant 0 : i32
    %c0_i32_1 = arith.constant 0 : i32
    return %c0_i32, %c0_i32_0 : i32, i32
  }
  func.func @transform_3(%arg0: i32) -> (i32, i32) {
    %c0_i32 = arith.constant 0 : i32
    %c0_i32_0 = arith.constant 0 : i32
    %c0_i32_1 = arith.constant 0 : i32
    return %c0_i32, %c0_i32_0 : i32, i32
  }
  func.func @transform_4(%arg0: i32) -> (i32, i32) {
    %c0_i32 = arith.constant 0 : i32
    %c0_i32_0 = arith.constant 0 : i32
    %c0_i32_1 = arith.constant 0 : i32
    return %c0_i32, %c0_i32_0 : i32, i32
  }
  func.func @transform_5(%arg0: i32) -> (i32, i32) {
    %c0_i32 = arith.constant 0 : i32
    %c0_i32_0 = arith.constant 0 : i32
    %c0_i32_1 = arith.constant 0 : i32
    return %c0_i32, %c0_i32_0 : i32, i32
  }
  func.func @transform_6(%arg0: i32) -> (i32, i32) {
    %c0_i32 = arith.constant 0 : i32
    %c0_i32_0 = arith.constant 0 : i32
    %c0_i32_1 = arith.constant 0 : i32
    return %c0_i32, %c0_i32_0 : i32, i32
  }
  func.func @transform_7(%arg0: i32) -> (i32, i32) {
    %c0_i32 = arith.constant 0 : i32
    %c0_i32_0 = arith.constant 0 : i32
    return %arg0, %c0_i32 : i32, i32
  }
}

</mosaic_0001>

<bundles_post_ra>
// kernel: tpu_custom_call.1
= control target key start
LH: loop header
LB: loop body
LE: loop exit
PB: predicated region body
PF: predicated region fallthrough
CT: control target
= control target key end

     0   :  { %12 = vsyncpa [#allocation9], 0  ;;  %s6521_s0 = inlined_call_operand.hbm [shape: f32[64,64], index: 0, kind: input, shape index: {}]   ;;  %s6522_s1 = inlined_call_operand.hbm [shape: f32[64,512], index: 1, kind: input, shape index: {}]   ;;  %s6523_s2 = inlined_call_operand.hbm [shape: f32[128,512], index: 2, kind: input, shape index: {}]   ;;  %s6524_s3 = inlined_call_operand.vmem [shape: f32[1,512], index: 3, kind: input, shape index: {}]   ;;  %s6525_s4 = inlined_call_operand.hbm [shape: f32[128,512], index: 4, kind: input, shape index: {}]   ;;  %s6526_s5 = inlined_call_operand.hbm [shape: f32[128,512], index: 5, kind: input, shape index: {}]   ;;  %s6527_s6 = inlined_call_operand.vmem [shape: f32[1,512], index: 6, kind: input, shape index: {}]   ;;  %s6528_s7 = inlined_call_operand.hbm [shape: f32[64,128], index: 7, kind: output, shape index: {}]  }
   0x1   :  { %13 = vsyncpa [#allocation12], 0 }
   0x2   :  { %14 = vsyncpa [#allocation15], 0 }
   0x3   :  { %15 = vsyncpa [#allocation10], 0  ;;  %s4452_s24 = smov [#allocation11]  }
   0x4   :  { %s33_s25 = sshll.u32 %s4452_s24, 4  ;;  %s34_s25 = int_to_ptr.vmem [resolvable:$true] %s33_s25 }
   0x5   :  { %s4332_s26 = scalar_lea.vmem %s34_s25, 4096  ;;  %p4337_p1 = scmp.lt.s32.totalorder %s34_s25, %s34_s25 }
   0x6   :  { %p4333_p0 = scmp.ne.s32.totalorder %s34_s25, %s4332_s26  ;;  %p4338_p2 = scmp.lt.s32.totalorder %s4332_s26, %s4332_s26 }
   0x8   :  { %p4339_p3 = por %p4338_p2, %p4337_p1 }
   0xa   :  { %p4340_p4 = pnand %p4339_p3, %p4333_p0 }
   0xc   :  { %4343 = shalt.err (!%p4340_p4)
}
   0xd   :  { %s4453_s27 = smov 512   ;;  %s4454_s28 = smov 32  }
   0xe   :  { %39 = dma.hbm_to_vmem [thread:$0]  %s6522_s1, 4096, %s34_s25, [#allocation12], %s4453_s27, %s4453_s27, %s4454_s28  }
   0xf   :  { %s4455_s8 = smov [#allocation14]   ;;  %s4456_s10 = smov [#allocation8]  }
  0x10   :  { %s59_s9 = sshll.u32 %s4455_s8, 4  ;;  %s21_s11 = sshll.u32 %s4456_s10, 4  ;;  %s60_s9 = int_to_ptr.vmem [resolvable:$true] %s59_s9  ;;  %s22_s11 = int_to_ptr.vmem [resolvable:$true] %s21_s11 }
  0x11   :  { %s4352_s12 = scalar_lea.vmem %s60_s9, 8192  ;;  %p4357_p6 = scmp.lt.s32.totalorder %s60_s9, %s60_s9 }
  0x12   :  { %p4353_p5 = scmp.ne.s32.totalorder %s60_s9, %s4352_s12  ;;  %p4358_p7 = scmp.lt.s32.totalorder %s4352_s12, %s4352_s12 }
  0x14   :  { %p4359_p8 = por %p4358_p7, %p4357_p6 }
  0x16   :  { %p4360_p9 = pnand %p4359_p8, %p4353_p5 }
  0x18   :  { %4363 = shalt.err (!%p4360_p9)
}
  0x19   :  { %65 = dma.hbm_to_vmem [thread:$0]  %s6525_s4, 8192, %s60_s9, [#allocation15], %s4453_s27, %s4453_s27, %s4454_s28  }
  0x1a   :  { %s4372_s1 = scalar_lea.vmem %s22_s11, 1024  ;;  %p4377_p11 = scmp.lt.s32.totalorder %s22_s11, %s22_s11 }
  0x1b   :  { %p4373_p10 = scmp.ne.s32.totalorder %s22_s11, %s4372_s1  ;;  %p4378_p12 = scmp.lt.s32.totalorder %s4372_s1, %s4372_s1 }
  0x1d   :  { %p4379_p13 = por %p4378_p12, %p4377_p11 }
  0x1f   :  { %p4380_p0 = pnand %p4379_p13, %p4373_p10 }
  0x21   :  { %4383 = shalt.err (!%p4380_p0)
}
  0x22   :  { %s4457_s15 = smov 128   ;;  %s4458_s16 = smov 8  }
  0x23   :  { %27 = dma.hbm_to_vmem [thread:$0]  %s6521_s0, 1024, %s22_s11, [#allocation9], %s4457_s15, %s4457_s15, %s4458_s16  }
  0x24   :  { %s4459_s19 = smov [#allocation13]   ;;  %s4460_s4 = smov [#allocation16]  }
  0x25   :  { %s45_s20 = sshll.u32 %s4459_s19, 4  ;;  %s71_s21 = sshll.u32 %s4460_s4, 4  ;;  %s46_s20 = int_to_ptr.vmem [resolvable:$true] %s45_s20  ;;  %s72_s21 = int_to_ptr.vmem [resolvable:$true] %s71_s21 }
  0x26   :  { %s4392_s22 = scalar_lea.vmem %s46_s20, 8192  ;;  %p4397_p2 = scmp.lt.s32.totalorder %s46_s20, %s46_s20 }
  0x27   :  { %p4393_p1 = scmp.ne.s32.totalorder %s46_s20, %s4392_s22  ;;  %p4398_p3 = scmp.lt.s32.totalorder %s4392_s22, %s4392_s22 }
  0x29   :  { %p4399_p4 = por %p4398_p3, %p4397_p2 }
  0x2b   :  { %p4400_p5 = pnand %p4399_p4, %p4393_p1 }
  0x2d   :  { %4403 = shalt.err (!%p4400_p5)
}
  0x2e   :  { %51 = dma.hbm_to_vmem [thread:$0]  %s6523_s2, 8192, %s46_s20, [#allocation12], %s4453_s27, %s4453_s27, %s4454_s28  }
  0x2f   :  { %s4412_s0 = scalar_lea.vmem %s72_s21, 8192  ;;  %p4417_p7 = scmp.lt.s32.totalorder %s72_s21, %s72_s21 }
  0x30   :  { %p4413_p6 = scmp.ne.s32.totalorder %s72_s21, %s4412_s0  ;;  %p4418_p8 = scmp.lt.s32.totalorder %s4412_s0, %s4412_s0 }
  0x32   :  { %p4419_p9 = por %p4418_p8, %p4417_p7 }
  0x34   :  { %p4420_p10 = pnand %p4419_p9, %p4413_p6 }
  0x36   :  { %4423 = shalt.err (!%p4420_p10)
}
  0x37   :  { %77 = dma.hbm_to_vmem [thread:$0]  %s6526_s5, 8192, %s72_s21, [#allocation15], %s4453_s27, %s4453_s27, %s4454_s28  }
  0x38   :  { %4444 = dma.done.wait [#allocation9], 1024  }
  0x39   :  { %4445 = vsyncadd [#allocation9], 4294966272 }
  0x3a   :  { %4446 = dma.done.wait [#allocation12], 12288  }
  0x3b   :  { %4447 = vsyncadd [#allocation12], 4294955008 }
  0x3c   :  { %4448 = dma.done.wait [#allocation15], 16384  }
  0x3d   :  { %4449 = vsyncadd [#allocation15], 4294950912  ;;  %v6529_v0 = vmov 0.0   ;;  %v140_v1 = vld [vmem:[#allocation11 + $0xe8] sm:$0xff]  ;;  %v142_v2 = vld [vmem:[#allocation11 + $0xf8] sm:$0xff]  ;;  %vm165_vm0 = vcmask 523264  }
  0x3e   :  { %254 = vmatprep.mubr.f32.mxu0 %v6529_v0  ;;  %367 = vmatprep.mubr.f32.mxu1 %v6529_v0  ;;  %v139_v3 = vld [vmem:[#allocation11 + $0xe0] sm:$0xff]  ;;  %v141_v4 = vld [vmem:[#allocation11 + $0xf0] sm:$0xff]  ;;  %v136_v5 = vld [vmem:[#allocation11 + $0xc8] sm:$0xff] }
  0x3f   :  { %206 = vmatprep.subr.mxu0 %v140_v1  ;;  %319 = vmatprep.subr.mxu1 %v142_v2  ;;  %v138_v6 = vld [vmem:[#allocation11 + $0xd8] sm:$0xff]  ;;  %v135_v7 = vld [vmem:[#allocation11 + $0xc0] sm:$0xff]  ;;  %v137_v8 = vld [vmem:[#allocation11 + $0xd0] sm:$0xff] }
  0x40   :  { %207 = vmatpush1.msra.mxu0 %v139_v3  ;;  %320 = vmatpush1.msra.mxu1 %v141_v4  ;;  %v132_v9 = vld [vmem:[#allocation11 + $0xa8] sm:$0xff]  ;;  %v134_v10 = vld [vmem:[#allocation11 + $0xb8] sm:$0xff]  ;;  %v131_v11 = vld [vmem:[#allocation11 + $0xa0] sm:$0xff] }
  0x41   :  { %208 = vmatprep.subr.mxu0 %v136_v5  ;;  %321 = vmatprep.subr.mxu1 %v138_v6  ;;  %v133_v12 = vld [vmem:[#allocation11 + $0xb0] sm:$0xff]  ;;  %v128_v13 = vld [vmem:[#allocation11 + $0x88] sm:$0xff]  ;;  %v130_v14 = vld [vmem:[#allocation11 + $0x98] sm:$0xff] }
  0x42   :  { %209 = vmatpush1.msra.mxu0 %v135_v7  ;;  %322 = vmatpush1.msra.mxu1 %v137_v8  ;;  %v127_v15 = vld [vmem:[#allocation11 + $0x80] sm:$0xff]  ;;  %v129_v16 = vld [vmem:[#allocation11 + $0x90] sm:$0xff]  ;;  %v124_v17 = vld [vmem:[#allocation11 + $0x68] sm:$0xff] }
  0x43   :  { %210 = vmatprep.subr.mxu0 %v132_v9  ;;  %323 = vmatprep.subr.mxu1 %v134_v10  ;;  %v126_v18 = vld [vmem:[#allocation11 + $0x78] sm:$0xff]  ;;  %v123_v19 = vld [vmem:[#allocation11 + $0x60] sm:$0xff]  ;;  %v125_v20 = vld [vmem:[#allocation11 + $0x70] sm:$0xff] }
  0x44   :  { %211 = vmatpush1.msra.mxu0 %v131_v11  ;;  %324 = vmatpush1.msra.mxu1 %v133_v12  ;;  %v120_v21 = vld [vmem:[#allocation11 + $0x48] sm:$0xff]  ;;  %v122_v22 = vld [vmem:[#allocation11 + $0x58] sm:$0xff]  ;;  %v119_v23 = vld [vmem:[#allocation11 + $0x40] sm:$0xff] }
  0x45   :  { %212 = vmatprep.subr.mxu0 %v128_v13  ;;  %325 = vmatprep.subr.mxu1 %v130_v14  ;;  %v121_v24 = vld [vmem:[#allocation11 + $0x50] sm:$0xff]  ;;  %v116_v25 = vld [vmem:[#allocation11 + $0x28] sm:$0xff]  ;;  %v118_v26 = vld [vmem:[#allocation11 + $0x38] sm:$0xff] }
  0x46   :  { %213 = vmatpush1.msra.mxu0 %v127_v15  ;;  %326 = vmatpush1.msra.mxu1 %v129_v16  ;;  %v115_v27 = vld [vmem:[#allocation11 + $0x20] sm:$0xff]  ;;  %v117_v28 = vld [vmem:[#allocation11 + $0x30] sm:$0xff]  ;;  %v112_v29 = vld [vmem:[#allocation11 + $0x8] sm:$0xff] }
  0x47   :  { %214 = vmatprep.subr.mxu0 %v124_v17  ;;  %327 = vmatprep.subr.mxu1 %v126_v18  ;;  %v114_v30 = vld [vmem:[#allocation11 + $0x18] sm:$0xff]  ;;  %v111_v31 = vld [vmem:[#allocation11] sm:$0xff]  ;;  %v113_v32 = vld [vmem:[#allocation11 + $0x10] sm:$0xff] }
  0x48   :  { %215 = vmatpush1.msra.mxu0 %v123_v19  ;;  %328 = vmatpush1.msra.mxu1 %v125_v20  ;;  %v103_v33 = vld [vmem:[#allocation8] sm:$0xff]  ;;  %v4535_v34 = vld [vmem:[#allocation13 + $0x1e8] sm:$0xff]  ;;  %v4537_v35 = vld [vmem:[#allocation13 + $0x1f8] sm:$0xff] }
  0x49   :  { %216 = vmatprep.subr.mxu0 %v120_v21  ;;  %329 = vmatprep.subr.mxu1 %v122_v22  ;;  %6735 = vst [vmem:[#allocation22_spill] sm:$0xff] %v4535_v34  ;;  %6736 = vst [vmem:[#allocation23_spill] sm:$0xff] %v4537_v35  ;;  %v4539_v36 = vld [vmem:[#allocation13 + $0x1e0] sm:$0xff]  ;;  %v4541_v37 = vld [vmem:[#allocation13 + $0x1f0] sm:$0xff] }
  0x4a   :  { %217 = vmatpush1.msra.mxu0 %v119_v23  ;;  %330 = vmatpush1.msra.mxu1 %v121_v24  ;;  %v4545_v38 = vld [vmem:[#allocation13 + $0x1c8] sm:$0xff]  ;;  %v4547_v39 = vld [vmem:[#allocation13 + $0x1d8] sm:$0xff]  ;;  %v4553_v40 = vld [vmem:[#allocation13 + $0x1c0] sm:$0xff] }
  0x4b   :  { %218 = vmatprep.subr.mxu0 %v116_v25  ;;  %331 = vmatprep.subr.mxu1 %v118_v26  ;;  %v4555_v41 = vld [vmem:[#allocation13 + $0x1d0] sm:$0xff]  ;;  %v104_v42 = vld [vmem:[#allocation8 + $0x8] sm:$0xff]  ;;  %v4563_v44 = vld [vmem:[#allocation13 + $0x1b8] sm:$0xff] }
  0x4c   :  { %219 = vmatpush1.msra.mxu0 %v115_v27  ;;  %332 = vmatpush1.msra.mxu1 %v117_v28  ;;  %v4561_v43 = vld [vmem:[#allocation13 + $0x1a8] sm:$0xff]  ;;  %v4567_v45 = vld [vmem:[#allocation13 + $0x1a0] sm:$0xff]  ;;  %v4569_v46 = vld [vmem:[#allocation13 + $0x1b0] sm:$0xff] }
  0x4d   :  { %220 = vmatprep.subr.mxu0 %v112_v29  ;;  %333 = vmatprep.subr.mxu1 %v114_v30  ;;  %v4573_v47 = vld [vmem:[#allocation13 + $0x188] sm:$0xff]  ;;  %v4575_v48 = vld [vmem:[#allocation13 + $0x198] sm:$0xff]  ;;  %v4581_v49 = vld [vmem:[#allocation13 + $0x180] sm:$0xff] }
  0x4e   :  { %221 = vmatpush1.msra.mxu0 %v111_v31  ;;  %334 = vmatpush1.msra.mxu1 %v113_v32  ;;  %v4583_v50 = vld [vmem:[#allocation13 + $0x190] sm:$0xff]  ;;  %v4589_v52 = vld [vmem:[#allocation13 + $0x168] sm:$0xff]  ;;  %v4591_v53 = vld [vmem:[#allocation13 + $0x178] sm:$0xff] }
  0x4f   :  { %3865 = vmatmul.mubr.msk.f32.vlgmr.msra.gmra.mxu0 %vm165_vm0, %v103_v33  ;;  %3873 = vmatmul.mubr.msk.f32.vlgmr.msra.gmra.mxu1 %vm165_vm0, %v103_v33  ;;  %v105_v51 = vld [vmem:[#allocation8 + $0x10] sm:$0xff]  ;;  %v4595_v54 = vld [vmem:[#allocation13 + $0x160] sm:$0xff]  ;;  %v4601_v56 = vld [vmem:[#allocation13 + $0x148] sm:$0xff] }
  0x50   :  { %520 = vmatprep.subr.mxu0 %v4535_v34  ;;  %591 = vmatprep.subr.mxu1 %v4537_v35  ;;  %v4597_v55 = vld [vmem:[#allocation13 + $0x170] sm:$0xff]  ;;  %v4603_v57 = vld [vmem:[#allocation13 + $0x158] sm:$0xff]  ;;  %v4609_v58 = vld [vmem:[#allocation13 + $0x140] sm:$0xff] }
  0x51   :  { %521 = vmatpush1.msra.mxu0 %v4539_v36  ;;  %592 = vmatpush1.msra.mxu1 %v4541_v37  ;;  %v4611_v59 = vld [vmem:[#allocation13 + $0x150] sm:$0xff]  ;;  %v106_v60 = vld [vmem:[#allocation8 + $0x18] sm:$0xff]  ;;  %v4617_v61 = vld [vmem:[#allocation13 + $0x128] sm:$0xff] }
  0x52   :  { %522 = vmatprep.subr.mxu0 %v4545_v38  ;;  %593 = vmatprep.subr.mxu1 %v4547_v39  ;;  %v4619_v62 = vld [vmem:[#allocation13 + $0x138] sm:$0xff]  ;;  %v4623_v63 = vld [vmem:[#allocation13 + $0x120] sm:$0xff]  ;;  %v4625_v1 = vld [vmem:[#allocation13 + $0x130] sm:$0xff] }
  0x53   :  { %260 = vmatprep.mubr.f32.mxu0 %v6529_v0  ;;  %373 = vmatprep.mubr.f32.mxu1 %v6529_v0  ;;  %v4629_v2 = vld [vmem:[#allocation13 + $0x108] sm:$0xff]  ;;  %v4631_v3 = vld [vmem:[#allocation13 + $0x118] sm:$0xff]  ;;  %v4637_v4 = vld [vmem:[#allocation13 + $0x100] sm:$0xff] }
  0x54   :  { %523 = vmatpush1.msra.mxu0 %v4553_v40  ;;  %594 = vmatpush1.msra.mxu1 %v4555_v41  ;;  %v4639_v5 = vld [vmem:[#allocation13 + $0x110] sm:$0xff]  ;;  %v107_v6 = vld [vmem:[#allocation8 + $0x20] sm:$0xff]  ;;  %v4645_v7 = vld [vmem:[#allocation13 + $0xe8] sm:$0xff] }
  0x55   :  { %3866 = vmatmul.mubr.msk.f32.gmra.mxu0 %vm165_vm0, %v104_v42  ;;  %3874 = vmatmul.mubr.msk.f32.gmra.mxu1 %vm165_vm0, %v104_v42  ;;  %v4647_v8 = vld [vmem:[#allocation13 + $0xf8] sm:$0xff]  ;;  %v4651_v9 = vld [vmem:[#allocation13 + $0xe0] sm:$0xff]  ;;  %v4653_v10 = vld [vmem:[#allocation13 + $0xf0] sm:$0xff] }
  0x56   :  { %524 = vmatprep.subr.mxu0 %v4561_v43  ;;  %595 = vmatprep.subr.mxu1 %v4563_v44  ;;  %v4657_v11 = vld [vmem:[#allocation13 + $0xc8] sm:$0xff]  ;;  %v4659_v12 = vld [vmem:[#allocation13 + $0xd8] sm:$0xff]  ;;  %v4665_v13 = vld [vmem:[#allocation13 + $0xc0] sm:$0xff] }
  0x57   :  { %525 = vmatpush1.msra.mxu0 %v4567_v45  ;;  %596 = vmatpush1.msra.mxu1 %v4569_v46  ;;  %v4667_v14 = vld [vmem:[#allocation13 + $0xd0] sm:$0xff]  ;;  %v108_v15 = vld [vmem:[#allocation8 + $0x28] sm:$0xff]  ;;  %v4675_v17 = vld [vmem:[#allocation13 + $0xb8] sm:$0xff] }
  0x58   :  { %526 = vmatprep.subr.mxu0 %v4573_v47  ;;  %597 = vmatprep.subr.mxu1 %v4575_v48  ;;  %v4673_v16 = vld [vmem:[#allocation13 + $0xa8] sm:$0xff]  ;;  %v4679_v18 = vld [vmem:[#allocation13 + $0xa0] sm:$0xff]  ;;  %v4681_v19 = vld [vmem:[#allocation13 + $0xb0] sm:$0xff] }
  0x59   :  { %266 = vmatprep.mubr.f32.mxu0 %v6529_v0  ;;  %379 = vmatprep.mubr.f32.mxu1 %v6529_v0  ;;  %6737 = vst [vmem:[#allocation24_spill] sm:$0xff] %v4681_v19  ;;  %v4685_v20 = vld [vmem:[#allocation13 + $0x88] sm:$0xff]  ;;  %v4687_v21 = vld [vmem:[#allocation13 + $0x98] sm:$0xff]  ;;  %v4693_v22 = vld [vmem:[#allocation13 + $0x80] sm:$0xff] }
  0x5a   :  { %527 = vmatpush1.msra.mxu0 %v4581_v49  ;;  %598 = vmatpush1.msra.mxu1 %v4583_v50  ;;  %6738 = vst [vmem:[#allocation25_spill] sm:$0xff] %v4685_v20  ;;  %6739 = vst [vmem:[#allocation26_spill] sm:$0xff] %v4687_v21  ;;  %v4695_v23 = vld [vmem:[#allocation13 + $0x90] sm:$0xff]  ;;  %v4701_v25 = vld [vmem:[#allocation13 + $0x68] sm:$0xff] }
  0x5b   :  { %3867 = vmatmul.mubr.msk.f32.gmra.mxu0 %vm165_vm0, %v105_v51  ;;  %3875 = vmatmul.mubr.msk.f32.gmra.mxu1 %vm165_vm0, %v105_v51  ;;  %6740 = vst [vmem:[#allocation27_spill] sm:$0xff] %v4693_v22  ;;  %6741 = vst [vmem:[#allocation28_spill] sm:$0xff] %v4695_v23  ;;  %v109_v24 = vld [vmem:[#allocation8 + $0x30] sm:$0xff]  ;;  %v4703_v26 = vld [vmem:[#allocation13 + $0x78] sm:$0xff] }
  0x5c   :  { %528 = vmatprep.subr.mxu0 %v4589_v52  ;;  %599 = vmatprep.subr.mxu1 %v4591_v53  ;;  %6742 = vst [vmem:[#allocation29_spill] sm:$0xff] %v4701_v25  ;;  %6743 = vst [vmem:[#allocation30_spill] sm:$0xff] %v4703_v26  ;;  %v4707_v27 = vld [vmem:[#allocation13 + $0x60] sm:$0xff]  ;;  %v4709_v28 = vld [vmem:[#allocation13 + $0x70] sm:$0xff] }
  0x5d   :  { %529 = vmatpush1.msra.mxu0 %v4595_v54  ;;  %600 = vmatpush1.msra.mxu1 %v4597_v55  ;;  %6744 = vst [vmem:[#allocation31_spill] sm:$0xff] %v4707_v27  ;;  %6745 = vst [vmem:[#allocation32_spill] sm:$0xff] %v4709_v28  ;;  %v4713_v29 = vld [vmem:[#allocation13 + $0x48] sm:$0xff]  ;;  %v4715_v30 = vld [vmem:[#allocation13 + $0x58] sm:$0xff] }
  0x5e   :  { %530 = vmatprep.subr.mxu0 %v4601_v56  ;;  %601 = vmatprep.subr.mxu1 %v4603_v57  ;;  %6746 = vst [vmem:[#allocation33_spill] sm:$0xff] %v4713_v29  ;;  %6747 = vst [vmem:[#allocation34_spill] sm:$0xff] %v4715_v30  ;;  %v4721_v31 = vld [vmem:[#allocation13 + $0x40] sm:$0xff]  ;;  %v4723_v32 = vld [vmem:[#allocation13 + $0x50] sm:$0xff] }
  0x5f   :  { %272 = vmatprep.mubr.f32.mxu0 %v6529_v0  ;;  %385 = vmatprep.mubr.f32.mxu1 %v6529_v0  ;;  %6748 = vst [vmem:[#allocation35_spill] sm:$0xff] %v4721_v31  ;;  %6749 = vst [vmem:[#allocation36_spill] sm:$0xff] %v4723_v32  ;;  %v110_v33 = vld [vmem:[#allocation8 + $0x38] sm:$0xff]  ;;  %v4729_v42 = vld [vmem:[#allocation13 + $0x28] sm:$0xff] }
  0x60   :  { %531 = vmatpush1.msra.mxu0 %v4609_v58  ;;  %602 = vmatpush1.msra.mxu1 %v4611_v59  ;;  %6750 = vst [vmem:[#allocation37_spill] sm:$0xff] %v4729_v42  ;;  %v4731_v51 = vld [vmem:[#allocation13 + $0x38] sm:$0xff] }
  0x61   :  { %3868 = vmatmul.mubr.msk.f32.gmra.mxu0 %vm165_vm0, %v106_v60  ;;  %3876 = vmatmul.mubr.msk.f32.gmra.mxu1 %vm165_vm0, %v106_v60  ;;  %6751 = vst [vmem:[#allocation38_spill] sm:$0xff] %v4731_v51  ;;  %v4735_v60 = vld [vmem:[#allocation13 + $0x20] sm:$0xff] }
  0x62   :  { %532 = vmatprep.subr.mxu0 %v4617_v61  ;;  %603 = vmatprep.subr.mxu1 %v4619_v62  ;;  %6752 = vst [vmem:[#allocation39_spill] sm:$0xff] %v4735_v60 }
  0x63   :  { %533 = vmatpush1.msra.mxu0 %v4623_v63  ;;  %604 = vmatpush1.msra.mxu1 %v4625_v1 }
  0x64   :  { %534 = vmatprep.subr.mxu0 %v4629_v2  ;;  %605 = vmatprep.subr.mxu1 %v4631_v3 }
  0x65   :  { %278 = vmatprep.mubr.f32.mxu0 %v6529_v0  ;;  %391 = vmatprep.mubr.f32.mxu1 %v6529_v0 }
  0x66   :  { %535 = vmatpush1.msra.mxu0 %v4637_v4  ;;  %606 = vmatpush1.msra.mxu1 %v4639_v5 }
  0x67   :  { %3869 = vmatmul.mubr.msk.f32.gmra.mxu0 %vm165_vm0, %v107_v6  ;;  %3877 = vmatmul.mubr.msk.f32.gmra.mxu1 %vm165_vm0, %v107_v6  ;;  %v4737_v6 = vld [vmem:[#allocation13 + $0x30] sm:$0xff] }
  0x68   :  { %536 = vmatprep.subr.mxu0 %v4645_v7  ;;  %607 = vmatprep.subr.mxu1 %v4647_v8  ;;  %6753 = vst [vmem:[#allocation40_spill] sm:$0xff] %v4737_v6 }
  0x69   :  { %537 = vmatpush1.msra.mxu0 %v4651_v9  ;;  %608 = vmatpush1.msra.mxu1 %v4653_v10 }
  0x6a   :  { %538 = vmatprep.subr.mxu0 %v4657_v11  ;;  %609 = vmatprep.subr.mxu1 %v4659_v12 }
  0x6b   :  { %284 = vmatprep.mubr.f32.mxu0 %v6529_v0  ;;  %397 = vmatprep.mubr.f32.mxu1 %v6529_v0 }
  0x6c   :  { %539 = vmatpush1.msra.mxu0 %v4665_v13  ;;  %610 = vmatpush1.msra.mxu1 %v4667_v14 }
  0x6d   :  { %3870 = vmatmul.mubr.msk.f32.gmra.mxu0 %vm165_vm0, %v108_v15  ;;  %3878 = vmatmul.mubr.msk.f32.gmra.mxu1 %vm165_vm0, %v108_v15  ;;  %v4741_v15 = vld [vmem:[#allocation13 + $0x8] sm:$0xff] }
  0x6e   :  { %540 = vmatprep.subr.mxu0 %v4673_v16  ;;  %611 = vmatprep.subr.mxu1 %v4675_v17  ;;  %6754 = vst [vmem:[#allocation41_spill] sm:$0xff] %v4741_v15 }
  0x6f   :  { %541 = vmatpush1.msra.mxu0 %v4679_v18  ;;  %612 = vmatpush1.msra.mxu1 %v4681_v19 }
  0x70   :  { %542 = vmatprep.subr.mxu0 %v4685_v20  ;;  %613 = vmatprep.subr.mxu1 %v4687_v21 }
  0x71   :  { %290 = vmatprep.mubr.f32.mxu0 %v6529_v0  ;;  %403 = vmatprep.mubr.f32.mxu1 %v6529_v0 }
  0x72   :  { %543 = vmatpush1.msra.mxu0 %v4693_v22  ;;  %614 = vmatpush1.msra.mxu1 %v4695_v23 }
  0x73   :  { %3871 = vmatmul.mubr.msk.f32.gmra.mxu0 %vm165_vm0, %v109_v24  ;;  %3879 = vmatmul.mubr.msk.f32.gmra.mxu1 %vm165_vm0, %v109_v24  ;;  %v4743_v24 = vld [vmem:[#allocation13 + $0x18] sm:$0xff] }
  0x74   :  { %544 = vmatprep.subr.mxu0 %v4701_v25  ;;  %615 = vmatprep.subr.mxu1 %v4703_v26  ;;  %6755 = vst [vmem:[#allocation42_spill] sm:$0xff] %v4743_v24 }
  0x75   :  { %545 = vmatpush1.msra.mxu0 %v4707_v27  ;;  %616 = vmatpush1.msra.mxu1 %v4709_v28 }
  0x76   :  { %546 = vmatprep.subr.mxu0 %v4713_v29  ;;  %617 = vmatprep.subr.mxu1 %v4715_v30 }
  0x77   :  { %296 = vmatprep.mubr.f32.mxu0 %v6529_v0  ;;  %409 = vmatprep.mubr.f32.mxu1 %v6529_v0  ;;  %v4747_v0 = vld [vmem:[#allocation13] sm:$0xff] }
  0x78   :  { %547 = vmatpush1.msra.mxu0 %v4721_v31  ;;  %618 = vmatpush1.msra.mxu1 %v4723_v32  ;;  %6756 = vst [vmem:[#allocation43_spill] sm:$0xff] %v4747_v0  ;;  %v4751_v32 = vld [vmem:[#allocation13 + $0x10] sm:$0xff] }
  0x79   :  { %3872 = vmatmul.mubr.msk.f32.gmra.mxu0 %vm165_vm0, %v110_v33  ;;  %3880 = vmatmul.mubr.msk.f32.gmra.mxu1 %vm165_vm0, %v110_v33  ;;  %6757 = vst [vmem:[#allocation44_spill] sm:$0xff] %v4751_v32  ;;  %v6758_v33 = vmov 0.0  }
  0x7a   :  { %548 = vmatprep.subr.mxu0 %v4729_v42  ;;  %619 = vmatprep.subr.mxu1 %v4731_v51 }
  0x7b   :  { %549 = vmatpush1.msra.mxu0 %v4735_v60  ;;  %620 = vmatpush1.msra.mxu1 %v4737_v6 }
  0x7c   :  { %550 = vmatprep.subr.mxu0 %v4741_v15  ;;  %621 = vmatprep.subr.mxu1 %v4743_v24 }
  0x7d   :  { %551 = vmatpush1.msra.mxu0 %v4747_v0  ;;  %584 = vmatprep.mubr.f32.mxu0 %v6758_v33 }
  0x7e   :  { %622 = vmatpush1.msra.mxu1 %v4751_v32  ;;  %655 = vmatprep.mubr.f32.mxu1 %v6758_v33 }
  0x7f   :  { %585 = vmatmul.mubr.f32.vlgmr.msra.gmra.mxu0 %v6758_v33  ;;  %656 = vmatmul.mubr.f32.vlgmr.msra.gmra.mxu1 %v6758_v33 }
  0x80   :  { %702 = vmatprep.subr.mxu0 %v4535_v34  ;;  %773 = vmatprep.subr.mxu1 %v4537_v35 }
  0x81   :  { %703 = vmatpush1.msra.mxu0 %v4539_v36  ;;  %774 = vmatpush1.msra.mxu1 %v4541_v37 }
  0x82   :  { %704 = vmatprep.subr.mxu0 %v4545_v38  ;;  %775 = vmatprep.subr.mxu1 %v4547_v39 }
  0x83   :  { %705 = vmatpush1.msra.mxu0 %v4553_v40  ;;  %776 = vmatpush1.msra.mxu1 %v4555_v41 }
  0x84   :  { %706 = vmatprep.subr.mxu0 %v4561_v43  ;;  %777 = vmatprep.subr.mxu1 %v4563_v44 }
  0x85   :  { %707 = vmatpush1.msra.mxu0 %v4567_v45  ;;  %778 = vmatpush1.msra.mxu1 %v4569_v46 }
  0x86   :  { %708 = vmatprep.subr.mxu0 %v4573_v47  ;;  %779 = vmatprep.subr.mxu1 %v4575_v48 }
  0x87   :  { %709 = vmatpush1.msra.mxu0 %v4581_v49  ;;  %780 = vmatpush1.msra.mxu1 %v4583_v50 }
  0x88   :  { %710 = vmatprep.subr.mxu0 %v4589_v52  ;;  %781 = vmatprep.subr.mxu1 %v4591_v53 }
  0x89   :  { %711 = vmatpush1.msra.mxu0 %v4595_v54  ;;  %782 = vmatpush1.msra.mxu1 %v4597_v55 }
  0x8a   :  { %712 = vmatprep.subr.mxu0 %v4601_v56  ;;  %783 = vmatprep.subr.mxu1 %v4603_v57 }
  0x8b   :  { %713 = vmatpush1.msra.mxu0 %v4609_v58  ;;  %784 = vmatpush1.msra.mxu1 %v4611_v59 }
  0x8c   :  { %714 = vmatprep.subr.mxu0 %v4617_v61  ;;  %785 = vmatprep.subr.mxu1 %v4619_v62 }
  0x8d   :  { %715 = vmatpush1.msra.mxu0 %v4623_v63  ;;  %786 = vmatpush1.msra.mxu1 %v4625_v1 }
  0x8e   :  { %716 = vmatprep.subr.mxu0 %v4629_v2  ;;  %787 = vmatprep.subr.mxu1 %v4631_v3 }
  0x8f   :  { %717 = vmatpush1.msra.mxu0 %v4637_v4  ;;  %788 = vmatpush1.msra.mxu1 %v4639_v5 }
  0x90   :  { %718 = vmatprep.subr.mxu0 %v4645_v7  ;;  %789 = vmatprep.subr.mxu1 %v4647_v8 }
  0x91   :  { %719 = vmatpush1.msra.mxu0 %v4651_v9  ;;  %790 = vmatpush1.msra.mxu1 %v4653_v10 }
  0x92   :  { %720 = vmatprep.subr.mxu0 %v4657_v11  ;;  %791 = vmatprep.subr.mxu1 %v4659_v12 }
  0x93   :  { %721 = vmatpush1.msra.mxu0 %v4665_v13  ;;  %792 = vmatpush1.msra.mxu1 %v4667_v14 }
  0x94   :  { %722 = vmatprep.subr.mxu0 %v4673_v16  ;;  %793 = vmatprep.subr.mxu1 %v4675_v17 }
  0x95   :  { %723 = vmatpush1.msra.mxu0 %v4679_v18  ;;  %794 = vmatpush1.msra.mxu1 %v4681_v19 }
  0x96   :  { %724 = vmatprep.subr.mxu0 %v4685_v20  ;;  %795 = vmatprep.subr.mxu1 %v4687_v21  ;;  %v6759_v20 = vld [vmem:[#allocation36_spill] sm:$0xff] }
  0x97   :  { %725 = vmatpush1.msra.mxu0 %v4693_v22  ;;  %796 = vmatpush1.msra.mxu1 %v4695_v23 }
  0x98   :  { %726 = vmatprep.subr.mxu0 %v4701_v25  ;;  %797 = vmatprep.subr.mxu1 %v4703_v26 }
  0x99   :  { %727 = vmatpush1.msra.mxu0 %v4707_v27  ;;  %798 = vmatpush1.msra.mxu1 %v4709_v28 }
  0x9a   :  { %728 = vmatprep.subr.mxu0 %v4713_v29  ;;  %799 = vmatprep.subr.mxu1 %v4715_v30 }
  0x9b   :  { %729 = vmatpush1.msra.mxu0 %v4721_v31  ;;  %800 = vmatpush1.msra.mxu1 %v6759_v20 }
  0x9c   :  { %730 = vmatprep.subr.mxu0 %v4729_v42  ;;  %801 = vmatprep.subr.mxu1 %v4731_v51  ;;  %v145_v51 = vlaneseq }
  0x9d   :  { %731 = vmatpush1.msra.mxu0 %v4735_v60  ;;  %802 = vmatpush1.msra.mxu1 %v4737_v6 }
  0x9e   :  { %732 = vmatprep.subr.mxu0 %v4741_v15  ;;  %803 = vmatprep.subr.mxu1 %v4743_v24  ;;  %v4829_v60 = vshrl.u32 %v145_v51, 7 }
  0x9f   :  { %733 = vmatpush1.msra.mxu0 %v4747_v0  ;;  %766 = vmatprep.mubr.f32.mxu0 %v6758_v33 }
  0xa0   :  { %804 = vmatpush1.msra.mxu1 %v4751_v32  ;;  %837 = vmatprep.mubr.f32.mxu1 %v6758_v33  ;;  %6760 = vst [vmem:[#allocation45_spill] sm:$0xff] %v4829_v60  ;;  %v6568_v24 = vsub.s32 0, %v4829_v60  ;;  %v6571_v0 = vsub.s32 2, %v4829_v60  ;;  %v143_v32 = vld [vmem:[%s6524_s3] sm:$0xf]  ;;  %v6579_v51 = vsub.s32 3, %v4829_v60 }
  0xa1   :  { %885 = vmatprep.subr.mxu0 %v4535_v34  ;;  %956 = vmatprep.subr.mxu1 %v4537_v35  ;;  %v6578_v35 = vsub.s32 1, %v4829_v60 }
  0xa2   :  { %v148_v42 = vrot.slane %v143_v32, %v6568_v24  ;;  %v4850_v20 = vrot.slane %v143_v32, %v6571_v0  ;;  %v4856_v28 = vrot.slane %v143_v32, %v6579_v51 }
  0xa3   :  { %v152_v29 = vrot.slane %v143_v32, %v6578_v35 }
 0x10f   :  { %v4831_v6 = vpop.f32.mrf.mxu0  ;;  %v4833_v15 = vpop.f32.mrf.mxu1 }
 0x111   :  { %v4840_v33 = vpop.f32.mrf.mxu0  ;;  %v4842_v34 = vpop.f32.mrf.mxu1 }
 0x115   :  { %v262_v31 = vpop.f32.mrf.mxu0  ;;  %v375_v30 = vpop.f32.mrf.mxu1 }
 0x116   :  { %v4858_v27 = vadd.f32 %v262_v31, %v148_v42  ;;  %v4861_v26 = vadd.f32 %v375_v30, %v4850_v20 }
 0x117   :  { %v264_v25 = vpop.f32.mrf.mxu0  ;;  %v377_v24 = vpop.f32.mrf.mxu1 }
 0x118   :  { %6761 = vst [vmem:[#allocation46_spill] sm:$0xff] %v4861_v26  ;;  %v4863_v23 = vadd.f32 %v264_v25, %v152_v29  ;;  %v4866_v0 = vadd.f32 %v377_v24, %v4856_v28 }
 0x11a   :  { %6762 = vst [vmem:[#allocation47_spill] sm:$0xff] %v4863_v23  ;;  %6763 = vst [vmem:[#allocation48_spill] sm:$0xff] %v4866_v0 }
 0x11b   :  { %v268_v22 = vpop.f32.mrf.mxu0  ;;  %v381_v21 = vpop.f32.mrf.mxu1 }
 0x11c   :  { %v4868_v19 = vadd.f32 %v268_v22, %v148_v42  ;;  %v4871_v35 = vadd.f32 %v381_v21, %v4850_v20 }
 0x11d   :  { %v270_v32 = vpop.f32.mrf.mxu0  ;;  %v383_v31 = vpop.f32.mrf.mxu1 }
 0x11e   :  { %6764 = vst [vmem:[#allocation49_spill] sm:$0xff] %v4868_v19  ;;  %6765 = vst [vmem:[#allocation50_spill] sm:$0xff] %v4871_v35  ;;  %v4873_v51 = vadd.f32 %v270_v32, %v152_v29  ;;  %v4876_v30 = vadd.f32 %v383_v31, %v4856_v28 }
 0x120   :  { %6766 = vst [vmem:[#allocation51_spill] sm:$0xff] %v4873_v51  ;;  %6767 = vst [vmem:[#allocation52_spill] sm:$0xff] %v4876_v30 }
 0x121   :  { %v274_v60 = vpop.f32.mrf.mxu0  ;;  %v387_v25 = vpop.f32.mrf.mxu1 }
 0x122   :  { %v4878_v26 = vadd.f32 %v274_v60, %v148_v42  ;;  %v4881_v24 = vadd.f32 %v387_v25, %v4850_v20 }
 0x123   :  { %v276_v0 = vpop.f32.mrf.mxu0  ;;  %v389_v22 = vpop.f32.mrf.mxu1 }
 0x124   :  { %6768 = vst [vmem:[#allocation53_spill] sm:$0xff] %v4878_v26  ;;  %6769 = vst [vmem:[#allocation54_spill] sm:$0xff] %v4881_v24  ;;  %v4883_v19 = vadd.f32 %v276_v0, %v152_v29  ;;  %v4886_v21 = vadd.f32 %v389_v22, %v4856_v28 }
 0x126   :  { %6770 = vst [vmem:[#allocation55_spill] sm:$0xff] %v4883_v19  ;;  %6771 = vst [vmem:[#allocation56_spill] sm:$0xff] %v4886_v21 }
 0x127   :  { %v280_v35 = vpop.f32.mrf.mxu0  ;;  %v393_v32 = vpop.f32.mrf.mxu1 }
 0x128   :  { %v4888_v51 = vadd.f32 %v280_v35, %v148_v42  ;;  %v4891_v31 = vadd.f32 %v393_v32, %v4850_v20 }
 0x129   :  { %v282_v30 = vpop.f32.mrf.mxu0  ;;  %v395_v60 = vpop.f32.mrf.mxu1 }
 0x12a   :  { %6772 = vst [vmem:[#allocation57_spill] sm:$0xff] %v4888_v51  ;;  %6773 = vst [vmem:[#allocation58_spill] sm:$0xff] %v4891_v31  ;;  %v4893_v26 = vadd.f32 %v282_v30, %v152_v29  ;;  %v4896_v25 = vadd.f32 %v395_v60, %v4856_v28 }
 0x12c   :  { %6774 = vst [vmem:[#allocation59_spill] sm:$0xff] %v4893_v26  ;;  %6775 = vst [vmem:[#allocation60_spill] sm:$0xff] %v4896_v25 }
 0x12d   :  { %v286_v24 = vpop.f32.mrf.mxu0  ;;  %v399_v0 = vpop.f32.mrf.mxu1 }
 0x12e   :  { %v4898_v19 = vadd.f32 %v286_v24, %v148_v42  ;;  %v4901_v22 = vadd.f32 %v399_v0, %v4850_v20 }
 0x12f   :  { %v288_v21 = vpop.f32.mrf.mxu0  ;;  %v401_v35 = vpop.f32.mrf.mxu1 }
 0x130   :  { %6776 = vst [vmem:[#allocation61_spill] sm:$0xff] %v4898_v19  ;;  %6777 = vst [vmem:[#allocation62_spill] sm:$0xff] %v4901_v22  ;;  %v4903_v51 = vadd.f32 %v288_v21, %v152_v29  ;;  %v4906_v32 = vadd.f32 %v401_v35, %v4856_v28 }
 0x132   :  { %6778 = vst [vmem:[#allocation63_spill] sm:$0xff] %v4903_v51  ;;  %6779 = vst [vmem:[#allocation64_spill] sm:$0xff] %v4906_v32 }
 0x133   :  { %v292_v31 = vpop.f32.mrf.mxu0  ;;  %v405_v30 = vpop.f32.mrf.mxu1 }
 0x134   :  { %v4908_v26 = vadd.f32 %v292_v31, %v148_v42  ;;  %v4911_v60 = vadd.f32 %v405_v30, %v4850_v20 }
 0x135   :  { %v294_v25 = vpop.f32.mrf.mxu0  ;;  %v407_v24 = vpop.f32.mrf.mxu1 }
 0x136   :  { %6780 = vst [vmem:[#allocation65_spill] sm:$0xff] %v4908_v26  ;;  %6781 = vst [vmem:[#allocation66_spill] sm:$0xff] %v4911_v60  ;;  %v4913_v19 = vadd.f32 %v294_v25, %v152_v29  ;;  %v4916_v0 = vadd.f32 %v407_v24, %v4856_v28  ;;  %v257_v25 = vadd.f32 %v4831_v6, %v148_v42 }
 0x137   :  { %v259_v24 = vadd.f32 %v4840_v33, %v152_v29 }
 0x138   :  { %6782 = vst [vmem:[#allocation67_spill] sm:$0xff] %v4913_v19  ;;  %6783 = vst [vmem:[#allocation68_spill] sm:$0xff] %v4916_v0 }
 0x139   :  { %v298_v22 = vpop.f32.mrf.mxu0  ;;  %v411_v21 = vpop.f32.mrf.mxu1 }
 0x13a   :  { %v4918_v51 = vadd.f32 %v298_v22, %v148_v42  ;;  %v4921_v35 = vadd.f32 %v411_v21, %v4850_v20 }
 0x13b   :  { %v300_v32 = vpop.f32.mrf.mxu0  ;;  %v413_v31 = vpop.f32.mrf.mxu1 }
 0x13c   :  { %6784 = vst [vmem:[#allocation69_spill] sm:$0xff] %v4918_v51  ;;  %6785 = vst [vmem:[#allocation70_spill] sm:$0xff] %v4921_v35  ;;  %v4923_v26 = vadd.f32 %v300_v32, %v152_v29  ;;  %v4926_v30 = vadd.f32 %v413_v31, %v4856_v28  ;;  %v372_v32 = vadd.f32 %v4842_v34, %v4856_v28 }
 0x13d   :  { %v370_v31 = vadd.f32 %v4833_v15, %v4850_v20 }
 0x13e   :  { %6786 = vst [vmem:[#allocation71_spill] sm:$0xff] %v4923_v26  ;;  %6787 = vst [vmem:[#allocation72_spill] sm:$0xff] %v4926_v30 }
 0x13f   :  { %v586_v60 = vpop.f32.mrf.mxu0  ;;  %v657_v51 = vpop.f32.mrf.mxu1 }
 0x140   :  { %v662_v0 = vadd.f32 %v586_v60, %v257_v25  ;;  %v664_v30 = vadd.f32 %v657_v51, %v370_v31  ;;  %v6789_v51 = vld [vmem:[#allocation24_spill] sm:$0xff]  ;;  %v6794_v31 = vld [vmem:[#allocation29_spill] sm:$0xff] }
 0x141   :  { %v588_v19 = vpop.f32.mrf.mxu0  ;;  %v659_v35 = vpop.f32.mrf.mxu1 }
 0x142   :  { %v3881_v23 = vmul.f32 -1.442695, %v662_v0  ;;  %v663_v22 = vadd.f32 %v588_v19, %v259_v24  ;;  %v665_v26 = vadd.f32 %v659_v35, %v372_v32  ;;  %v6793_v32 = vld [vmem:[#allocation28_spill] sm:$0xff] }
 0x144   :  { %3940 = vpow2.f32 %v3881_v23  ;;  %v3882_v21 = vmul.f32 -1.442695, %v663_v22  ;;  %v3883_v42 = vmul.f32 -1.442695, %v665_v26  ;;  %v6791_v22 = vld [vmem:[#allocation26_spill] sm:$0xff] }
 0x146   :  { %3942 = vpow2.f32 %v3882_v21  ;;  %v6792_v21 = vld [vmem:[#allocation27_spill] sm:$0xff] }
 0x147   :  { %3944 = vpow2.f32 %v3883_v42  ;;  %v6795_v42 = vld [vmem:[#allocation30_spill] sm:$0xff] }
 0x151   :  { %v3941_v6 = vpop.eup %3940 }
 0x152   :  { %v669_v29 = vadd.f32 1.0, %v3941_v6  ;;  %v6796_v6 = vld [vmem:[#allocation31_spill] sm:$0xff] }
 0x153   :  { %v3943_v33 = vpop.eup %3942 }
 0x154   :  { %3946 = vrcp.f32 %v669_v29  ;;  %v675_v19 = vadd.f32 1.0, %v3943_v33  ;;  %v3945_v23 = vpop.eup %3944  ;;  %v6797_v29 = vld [vmem:[#allocation32_spill] sm:$0xff]  ;;  %v6798_v33 = vld [vmem:[#allocation33_spill] sm:$0xff] }
 0x155   :  { %3948 = vtanh.f32 %v664_v30  ;;  %v682_v24 = vadd.f32 1.0, %v3945_v23  ;;  %v6790_v30 = vld [vmem:[#allocation25_spill] sm:$0xff]  ;;  %v6800_v23 = vld [vmem:[#allocation35_spill] sm:$0xff] }
 0x156   :  { %3950 = vrcp.f32 %v675_v19  ;;  %v6799_v19 = vld [vmem:[#allocation34_spill] sm:$0xff] }
 0x157   :  { %3952 = vrcp.f32 %v682_v24  ;;  %v6804_v24 = vld [vmem:[#allocation39_spill] sm:$0xff] }
 0x161   :  { %v3947_v60 = vpop.eup %3946 }
 0x162   :  { %v3949_v0 = vpop.eup %3948 }
 0x163   :  { %v3951_v25 = vpop.eup %3950  ;;  %v687_v28 = vmul.f32 %v3949_v0, %v3947_v60  ;;  %v6801_v60 = vld [vmem:[#allocation36_spill] sm:$0xff]  ;;  %v6802_v0 = vld [vmem:[#allocation37_spill] sm:$0xff] }
 0x164   :  { %v686_v34 = vmul.f32 0.0, %v3951_v25  ;;  %v3953_v20 = vpop.eup %3952  ;;  %v6803_v25 = vld [vmem:[#allocation38_spill] sm:$0xff] }
 0x166   :  { %v4934_v35 = vadd.f32 %v687_v28, %v686_v34  ;;  %v6805_v34 = vld [vmem:[#allocation40_spill] sm:$0xff]  ;;  %v6806_v28 = vld [vmem:[#allocation41_spill] sm:$0xff] }
 0x168   :  { %3954 = vtanh.f32 %v4934_v35 }
 0x175   :  { %v3955_v26 = vpop.eup %3954 }
 0x176   :  { %v4937_v15 = vmul.f32 %v3955_v26, %v3953_v20  ;;  %v6807_v20 = vld [vmem:[#allocation42_spill] sm:$0xff]  ;;  %v6808_v26 = vld [vmem:[#allocation43_spill] sm:$0xff] }
 0x178   :  { %6788 = vst [vmem:[#allocation73_spill] sm:$0xff] %v4937_v15  ;;  %767 = vmatmul.mubr.f32.vlgmr.msra.gmra.mxu0 %v4937_v15  ;;  %838 = vmatmul.mubr.f32.vlgmr.msra.gmra.mxu1 %v4937_v15  ;;  %v6809_v15 = vmov 0.0  }
 0x179   :  { %886 = vmatpush1.msra.mxu0 %v4539_v36  ;;  %957 = vmatpush1.msra.mxu1 %v4541_v37 }
 0x17a   :  { %887 = vmatprep.subr.mxu0 %v4545_v38  ;;  %958 = vmatprep.subr.mxu1 %v4547_v39 }
 0x17b   :  { %888 = vmatpush1.msra.mxu0 %v4553_v40  ;;  %959 = vmatpush1.msra.mxu1 %v4555_v41 }
 0x17c   :  { %889 = vmatprep.subr.mxu0 %v4561_v43  ;;  %960 = vmatprep.subr.mxu1 %v4563_v44 }
 0x17d   :  { %890 = vmatpush1.msra.mxu0 %v4567_v45  ;;  %961 = vmatpush1.msra.mxu1 %v4569_v46 }
 0x17e   :  { %891 = vmatprep.subr.mxu0 %v4573_v47  ;;  %962 = vmatprep.subr.mxu1 %v4575_v48 }
 0x17f   :  { %892 = vmatpush1.msra.mxu0 %v4581_v49  ;;  %963 = vmatpush1.msra.mxu1 %v4583_v50 }
 0x180   :  { %893 = vmatprep.subr.mxu0 %v4589_v52  ;;  %964 = vmatprep.subr.mxu1 %v4591_v53 }
 0x181   :  { %894 = vmatpush1.msra.mxu0 %v4595_v54  ;;  %965 = vmatpush1.msra.mxu1 %v4597_v55 }
 0x182   :  { %895 = vmatprep.subr.mxu0 %v4601_v56  ;;  %966 = vmatprep.subr.mxu1 %v4603_v57 }
 0x183   :  { %896 = vmatpush1.msra.mxu0 %v4609_v58  ;;  %967 = vmatpush1.msra.mxu1 %v4611_v59 }
 0x184   :  { %897 = vmatprep.subr.mxu0 %v4617_v61  ;;  %968 = vmatprep.subr.mxu1 %v4619_v62 }
 0x185   :  { %898 = vmatpush1.msra.mxu0 %v4623_v63  ;;  %969 = vmatpush1.msra.mxu1 %v4625_v1 }
 0x186   :  { %899 = vmatprep.subr.mxu0 %v4629_v2  ;;  %970 = vmatprep.subr.mxu1 %v4631_v3 }
 0x187   :  { %900 = vmatpush1.msra.mxu0 %v4637_v4  ;;  %971 = vmatpush1.msra.mxu1 %v4639_v5 }
 0x188   :  { %901 = vmatprep.subr.mxu0 %v4645_v7  ;;  %972 = vmatprep.subr.mxu1 %v4647_v8 }
 0x189   :  { %902 = vmatpush1.msra.mxu0 %v4651_v9  ;;  %973 = vmatpush1.msra.mxu1 %v4653_v10 }
 0x18a   :  { %903 = vmatprep.subr.mxu0 %v4657_v11  ;;  %974 = vmatprep.subr.mxu1 %v4659_v12 }
 0x18b   :  { %904 = vmatpush1.msra.mxu0 %v4665_v13  ;;  %975 = vmatpush1.msra.mxu1 %v4667_v14 }
 0x18c   :  { %905 = vmatprep.subr.mxu0 %v4673_v16  ;;  %976 = vmatprep.subr.mxu1 %v4675_v17 }
 0x18d   :  { %906 = vmatpush1.msra.mxu0 %v4679_v18  ;;  %977 = vmatpush1.msra.mxu1 %v6789_v51 }
 0x18e   :  { %907 = vmatprep.subr.mxu0 %v6790_v30  ;;  %978 = vmatprep.subr.mxu1 %v6791_v22 }
 0x18f   :  { %908 = vmatpush1.msra.mxu0 %v6792_v21  ;;  %979 = vmatpush1.msra.mxu1 %v6793_v32 }
 0x190   :  { %909 = vmatprep.subr.mxu0 %v6794_v31  ;;  %980 = vmatprep.subr.mxu1 %v6795_v42  ;;  %v6815_v42 = vld [vmem:[#allocation46_spill] sm:$0xff] }
 0x191   :  { %910 = vmatpush1.msra.mxu0 %v6796_v6  ;;  %981 = vmatpush1.msra.mxu1 %v6797_v29  ;;  %v6814_v6 = vld [vmem:[#allocation48_spill] sm:$0xff] }
 0x192   :  { %911 = vmatprep.subr.mxu0 %v6798_v33  ;;  %982 = vmatprep.subr.mxu1 %v6799_v19  ;;  %v6810_v19 = vld [vmem:[#allocation44_spill] sm:$0xff] }
 0x193   :  { %912 = vmatpush1.msra.mxu0 %v6800_v23  ;;  %983 = vmatpush1.msra.mxu1 %v6801_v60  ;;  %v6811_v60 = vld [vmem:[#allocation22_spill] sm:$0xff] }
 0x194   :  { %913 = vmatprep.subr.mxu0 %v6802_v0  ;;  %984 = vmatprep.subr.mxu1 %v6803_v25  ;;  %v6812_v0 = vld [vmem:[#allocation23_spill] sm:$0xff] }
 0x195   :  { %914 = vmatpush1.msra.mxu0 %v6804_v24  ;;  %985 = vmatpush1.msra.mxu1 %v6805_v34 }
 0x196   :  { %915 = vmatprep.subr.mxu0 %v6806_v28  ;;  %986 = vmatprep.subr.mxu1 %v6807_v20  ;;  %v6813_v28 = vld [vmem:[#allocation47_spill] sm:$0xff] }
 0x197   :  { %916 = vmatpush1.msra.mxu0 %v6808_v26  ;;  %949 = vmatprep.mubr.f32.mxu0 %v6809_v15 }
 0x198   :  { %987 = vmatpush1.msra.mxu1 %v6810_v19  ;;  %1020 = vmatprep.mubr.f32.mxu1 %v6809_v15 }
 0x199   :  { %1068 = vmatprep.subr.mxu0 %v6811_v60  ;;  %1139 = vmatprep.subr.mxu1 %v6812_v0 }
 0x238   :  { %v768_v25 = vpop.f32.mrf.mxu0  ;;  %v839_v20 = vpop.f32.mrf.mxu1 }
 0x239   :  { %v844_v24 = vadd.f32 %v768_v25, %v4858_v27  ;;  %v846_v15 = vadd.f32 %v839_v20, %v6815_v42 }
 0x23a   :  { %v770_v34 = vpop.f32.mrf.mxu0  ;;  %v841_v29 = vpop.f32.mrf.mxu1 }
 0x23b   :  { %v3884_v23 = vmul.f32 -1.442695, %v844_v24  ;;  %v845_v33 = vadd.f32 %v770_v34, %v6813_v28  ;;  %v847_v19 = vadd.f32 %v841_v29, %v6814_v6 }
 0x23d   :  { %3956 = vpow2.f32 %v3884_v23  ;;  %v3885_v26 = vmul.f32 -1.442695, %v845_v33  ;;  %v3886_v31 = vmul.f32 -1.442695, %v847_v19 }
 0x23f   :  { %3958 = vpow2.f32 %v3885_v26 }
 0x240   :  { %3960 = vtanh.f32 %v846_v15 }
 0x241   :  { %3962 = vpow2.f32 %v3886_v31 }
 0x24a   :  { %v3957_v60 = vpop.eup %3956 }
 0x24b   :  { %v851_v32 = vadd.f32 1.0, %v3957_v60 }
 0x24c   :  { %v3959_v0 = vpop.eup %3958 }
 0x24d   :  { %3964 = vrcp.f32 %v851_v32  ;;  %v857_v27 = vadd.f32 1.0, %v3959_v0  ;;  %v3961_v25 = vpop.eup %3960  ;;  %v6838_v32 = vld [vmem:[#allocation51_spill] sm:$0xff]  ;;  %v6839_v0 = vld [vmem:[#allocation52_spill] sm:$0xff] }
 0x24e   :  { %v3963_v24 = vpop.eup %3962 }
 0x24f   :  { %3966 = vrcp.f32 %v857_v27  ;;  %v864_v28 = vadd.f32 1.0, %v3963_v24 }
 0x251   :  { %3968 = vrcp.f32 %v864_v28 }
 0x25a   :  { %v3965_v23 = vpop.eup %3964 }
 0x25b   :  { %v869_v34 = vmul.f32 %v3965_v23, %v3961_v25  ;;  %v6840_v25 = vld [vmem:[#allocation50_spill] sm:$0xff] }
 0x25c   :  { %v3967_v33 = vpop.eup %3966 }
 0x25d   :  { %v868_v26 = vmul.f32 %v3967_v33, %v4934_v35 }
 0x25e   :  { %v3969_v42 = vpop.eup %3968 }
 0x25f   :  { %v5012_v6 = vadd.f32 %v869_v34, %v868_v26 }
 0x261   :  { %3970 = vtanh.f32 %v5012_v6 }
 0x26e   :  { %v3971_v15 = vpop.eup %3970 }
 0x26f   :  { %v5015_v29 = vmul.f32 %v3971_v15, %v3969_v42 }
 0x271   :  { %6816 = vst [vmem:[#allocation24_spill] sm:$0xff] %v5015_v29  ;;  %950 = vmatmul.mubr.f32.vlgmr.msra.gmra.mxu0 %v5015_v29  ;;  %1021 = vmatmul.mubr.f32.vlgmr.msra.gmra.mxu1 %v5015_v29  ;;  %v5164_v29 = vld [vmem:[#allocation13 + $0x150] sm:$0xff] }
 0x272   :  { %1069 = vmatpush1.msra.mxu0 %v4539_v36  ;;  %1140 = vmatpush1.msra.mxu1 %v4541_v37  ;;  %v6817_v36 = vld [vmem:[#allocation28_spill] sm:$0xff]  ;;  %v6818_v37 = vld [vmem:[#allocation29_spill] sm:$0xff] }
 0x273   :  { %1070 = vmatprep.subr.mxu0 %v4545_v38  ;;  %1141 = vmatprep.subr.mxu1 %v4547_v39  ;;  %v6819_v38 = vld [vmem:[#allocation30_spill] sm:$0xff]  ;;  %v6820_v39 = vld [vmem:[#allocation31_spill] sm:$0xff] }
 0x274   :  { %1071 = vmatpush1.msra.mxu0 %v4553_v40  ;;  %1142 = vmatpush1.msra.mxu1 %v4555_v41  ;;  %v6821_v40 = vld [vmem:[#allocation32_spill] sm:$0xff]  ;;  %v6822_v41 = vld [vmem:[#allocation33_spill] sm:$0xff] }
 0x275   :  { %1072 = vmatprep.subr.mxu0 %v4561_v43  ;;  %1143 = vmatprep.subr.mxu1 %v4563_v44  ;;  %v6823_v43 = vld [vmem:[#allocation34_spill] sm:$0xff]  ;;  %v6824_v44 = vld [vmem:[#allocation35_spill] sm:$0xff] }
 0x276   :  { %1073 = vmatpush1.msra.mxu0 %v4567_v45  ;;  %1144 = vmatpush1.msra.mxu1 %v4569_v46  ;;  %v6825_v45 = vld [vmem:[#allocation36_spill] sm:$0xff]  ;;  %v6826_v46 = vld [vmem:[#allocation37_spill] sm:$0xff] }
 0x277   :  { %1074 = vmatprep.subr.mxu0 %v4573_v47  ;;  %1145 = vmatprep.subr.mxu1 %v4575_v48  ;;  %v6827_v47 = vld [vmem:[#allocation38_spill] sm:$0xff]  ;;  %v6828_v48 = vld [vmem:[#allocation39_spill] sm:$0xff] }
 0x278   :  { %1075 = vmatpush1.msra.mxu0 %v4581_v49  ;;  %1146 = vmatpush1.msra.mxu1 %v4583_v50  ;;  %v6829_v49 = vld [vmem:[#allocation40_spill] sm:$0xff]  ;;  %v6830_v50 = vld [vmem:[#allocation41_spill] sm:$0xff] }
 0x279   :  { %1076 = vmatprep.subr.mxu0 %v4589_v52  ;;  %1147 = vmatprep.subr.mxu1 %v4591_v53  ;;  %v6831_v52 = vld [vmem:[#allocation42_spill] sm:$0xff]  ;;  %v6832_v53 = vld [vmem:[#allocation43_spill] sm:$0xff] }
 0x27a   :  { %1077 = vmatpush1.msra.mxu0 %v4595_v54  ;;  %1148 = vmatpush1.msra.mxu1 %v4597_v55  ;;  %v6833_v54 = vmov 0.0   ;;  %v6834_v55 = vld [vmem:[#allocation44_spill] sm:$0xff] }
 0x27b   :  { %1078 = vmatprep.subr.mxu0 %v4601_v56  ;;  %1149 = vmatprep.subr.mxu1 %v4603_v57  ;;  %v5083_v56 = vld [vmem:[#allocation13 + $0x1e8] sm:$0xff]  ;;  %v5086_v57 = vld [vmem:[#allocation13 + $0x1f8] sm:$0xff] }
 0x27c   :  { %1079 = vmatpush1.msra.mxu0 %v4609_v58  ;;  %1150 = vmatpush1.msra.mxu1 %v4611_v59  ;;  %6835 = vst [vmem:[#allocation25_spill] sm:$0xff] %v5083_v56  ;;  %6836 = vst [vmem:[#allocation26_spill] sm:$0xff] %v5086_v57  ;;  %v6837_v59 = vld [vmem:[#allocation49_spill] sm:$0xff] }
 0x27d   :  { %1080 = vmatprep.subr.mxu0 %v4617_v61  ;;  %1151 = vmatprep.subr.mxu1 %v4619_v62 }
 0x27e   :  { %1081 = vmatpush1.msra.mxu0 %v4623_v63  ;;  %1152 = vmatpush1.msra.mxu1 %v4625_v1 }
 0x27f   :  { %1082 = vmatprep.subr.mxu0 %v4629_v2  ;;  %1153 = vmatprep.subr.mxu1 %v4631_v3 }
 0x280   :  { %1083 = vmatpush1.msra.mxu0 %v4637_v4  ;;  %1154 = vmatpush1.msra.mxu1 %v4639_v5 }
 0x281   :  { %1084 = vmatprep.subr.mxu0 %v4645_v7  ;;  %1155 = vmatprep.subr.mxu1 %v4647_v8 }
 0x282   :  { %1085 = vmatpush1.msra.mxu0 %v4651_v9  ;;  %1156 = vmatpush1.msra.mxu1 %v4653_v10 }
 0x283   :  { %1086 = vmatprep.subr.mxu0 %v4657_v11  ;;  %1157 = vmatprep.subr.mxu1 %v4659_v12 }
 0x284   :  { %1087 = vmatpush1.msra.mxu0 %v4665_v13  ;;  %1158 = vmatpush1.msra.mxu1 %v4667_v14 }
 0x285   :  { %1088 = vmatprep.subr.mxu0 %v4673_v16  ;;  %1159 = vmatprep.subr.mxu1 %v4675_v17 }
 0x286   :  { %1089 = vmatpush1.msra.mxu0 %v4679_v18  ;;  %1160 = vmatpush1.msra.mxu1 %v6789_v51 }
 0x287   :  { %1090 = vmatprep.subr.mxu0 %v6790_v30  ;;  %1161 = vmatprep.subr.mxu1 %v6791_v22 }
 0x288   :  { %1091 = vmatpush1.msra.mxu0 %v6792_v21  ;;  %1162 = vmatpush1.msra.mxu1 %v6817_v36 }
 0x289   :  { %1092 = vmatprep.subr.mxu0 %v6818_v37  ;;  %1163 = vmatprep.subr.mxu1 %v6819_v38 }
 0x28a   :  { %1093 = vmatpush1.msra.mxu0 %v6820_v39  ;;  %1164 = vmatpush1.msra.mxu1 %v6821_v40 }
 0x28b   :  { %1094 = vmatprep.subr.mxu0 %v6822_v41  ;;  %1165 = vmatprep.subr.mxu1 %v6823_v43 }
 0x28c   :  { %1095 = vmatpush1.msra.mxu0 %v6824_v44  ;;  %1166 = vmatpush1.msra.mxu1 %v6825_v45 }
 0x28d   :  { %1096 = vmatprep.subr.mxu0 %v6826_v46  ;;  %1167 = vmatprep.subr.mxu1 %v6827_v47 }
 0x28e   :  { %1097 = vmatpush1.msra.mxu0 %v6828_v48  ;;  %1168 = vmatpush1.msra.mxu1 %v6829_v49 }
 0x28f   :  { %1098 = vmatprep.subr.mxu0 %v6830_v50  ;;  %1169 = vmatprep.subr.mxu1 %v6831_v52 }
 0x290   :  { %1099 = vmatpush1.msra.mxu0 %v6832_v53  ;;  %1132 = vmatprep.mubr.f32.mxu0 %v6833_v54 }
 0x291   :  { %1170 = vmatpush1.msra.mxu1 %v6834_v55  ;;  %1203 = vmatprep.mubr.f32.mxu1 %v6833_v54 }
 0x292   :  { %1251 = vmatprep.subr.mxu0 %v5083_v56  ;;  %1322 = vmatprep.subr.mxu1 %v5086_v57 }
 0x331   :  { %v951_v58 = vpop.f32.mrf.mxu0  ;;  %v1022_v19 = vpop.f32.mrf.mxu1 }
 0x332   :  { %v1027_v61 = vadd.f32 %v951_v58, %v6837_v59  ;;  %v1029_v24 = vadd.f32 %v1022_v19, %v6840_v25  ;;  %v5113_v25 = vld [vmem:[#allocation13 + $0x1c0] sm:$0xff] }
 0x333   :  { %v953_v62 = vpop.f32.mrf.mxu0  ;;  %v1024_v60 = vpop.f32.mrf.mxu1 }
 0x334   :  { %v3887_v35 = vmul.f32 -1.442695, %v1027_v61  ;;  %v1028_v31 = vadd.f32 %v953_v62, %v6838_v32  ;;  %v1030_v27 = vadd.f32 %v1024_v60, %v6839_v0  ;;  %v5101_v60 = vld [vmem:[#allocation13 + $0x1e0] sm:$0xff]  ;;  %v5104_v0 = vld [vmem:[#allocation13 + $0x1f0] sm:$0xff] }
 0x336   :  { %3972 = vpow2.f32 %v3887_v35  ;;  %v3888_v20 = vmul.f32 -1.442695, %v1028_v31  ;;  %v3889_v23 = vmul.f32 -1.442695, %v1030_v27  ;;  %v5110_v27 = vld [vmem:[#allocation13 + $0x1d8] sm:$0xff] }
 0x338   :  { %3974 = vpow2.f32 %v3888_v20 }
 0x339   :  { %3976 = vtanh.f32 %v1029_v24  ;;  %v5116_v24 = vld [vmem:[#allocation13 + $0x1d0] sm:$0xff] }
 0x33a   :  { %3978 = vpow2.f32 %v3889_v23  ;;  %v5119_v23 = vld [vmem:[#allocation13 + $0x1a8] sm:$0xff] }
 0x343   :  { %v3973_v34 = vpop.eup %3972 }
 0x344   :  { %v1034_v33 = vadd.f32 1.0, %v3973_v34  ;;  %v5122_v34 = vld [vmem:[#allocation13 + $0x1b8] sm:$0xff] }
 0x345   :  { %v3975_v28 = vpop.eup %3974 }
 0x346   :  { %3980 = vrcp.f32 %v1034_v33  ;;  %v1040_v26 = vadd.f32 1.0, %v3975_v28  ;;  %v3977_v42 = vpop.eup %3976  ;;  %v5125_v33 = vld [vmem:[#allocation13 + $0x1a0] sm:$0xff]  ;;  %v5128_v28 = vld [vmem:[#allocation13 + $0x1b0] sm:$0xff] }
 0x347   :  { %v3979_v15 = vpop.eup %3978 }
 0x348   :  { %3982 = vrcp.f32 %v1040_v26  ;;  %v1047_v62 = vadd.f32 1.0, %v3979_v15  ;;  %v5131_v26 = vld [vmem:[#allocation13 + $0x188] sm:$0xff]  ;;  %v5137_v15 = vld [vmem:[#allocation13 + $0x180] sm:$0xff] }
 0x34a   :  { %3984 = vrcp.f32 %v1047_v62  ;;  %v5149_v62 = vld [vmem:[#allocation13 + $0x160] sm:$0xff] }
 0x34b   :  { %6842 = vst [vmem:[#allocation22_spill] sm:$0xff] %v5149_v62 }
 0x353   :  { %v3981_v58 = vpop.eup %3980 }
 0x354   :  { %v1052_v59 = vmul.f32 %v3981_v58, %v3977_v42  ;;  %v5134_v42 = vld [vmem:[#allocation13 + $0x198] sm:$0xff]  ;;  %v5140_v58 = vld [vmem:[#allocation13 + $0x190] sm:$0xff] }
 0x355   :  { %v3983_v61 = vpop.eup %3982 }
 0x356   :  { %v1051_v35 = vmul.f32 %v3983_v61, %v5012_v6  ;;  %v5107_v6 = vld [vmem:[#allocation13 + $0x1c8] sm:$0xff]  ;;  %v5146_v61 = vld [vmem:[#allocation13 + $0x178] sm:$0xff] }
 0x357   :  { %v3985_v31 = vpop.eup %3984 }
 0x358   :  { %v5094_v32 = vadd.f32 %v1052_v59, %v1051_v35  ;;  %v5143_v59 = vld [vmem:[#allocation13 + $0x168] sm:$0xff]  ;;  %v5152_v35 = vld [vmem:[#allocation13 + $0x170] sm:$0xff] }
 0x359   :  { %6843 = vst [vmem:[#allocation23_spill] sm:$0xff] %v5152_v35 }
 0x35a   :  { %3986 = vtanh.f32 %v5094_v32 }
 0x367   :  { %v3987_v19 = vpop.eup %3986 }
 0x368   :  { %v5097_v20 = vmul.f32 %v3987_v19, %v3985_v31  ;;  %v5155_v31 = vld [vmem:[#allocation13 + $0x148] sm:$0xff]  ;;  %v5158_v19 = vld [vmem:[#allocation13 + $0x158] sm:$0xff] }
 0x36a   :  { %6841 = vst [vmem:[#allocation27_spill] sm:$0xff] %v5097_v20  ;;  %1133 = vmatmul.mubr.f32.vlgmr.msra.gmra.mxu0 %v5097_v20  ;;  %1204 = vmatmul.mubr.f32.vlgmr.msra.gmra.mxu1 %v5097_v20  ;;  %v5161_v20 = vld [vmem:[#allocation13 + $0x140] sm:$0xff] }
 0x36b   :  { %1252 = vmatpush1.msra.mxu0 %v5101_v60  ;;  %1323 = vmatpush1.msra.mxu1 %v5104_v0 }
 0x36c   :  { %1253 = vmatprep.subr.mxu0 %v5107_v6  ;;  %1324 = vmatprep.subr.mxu1 %v5110_v27 }
 0x36d   :  { %1254 = vmatpush1.msra.mxu0 %v5113_v25  ;;  %1325 = vmatpush1.msra.mxu1 %v5116_v24 }
 0x36e   :  { %1255 = vmatprep.subr.mxu0 %v5119_v23  ;;  %1326 = vmatprep.subr.mxu1 %v5122_v34 }
 0x36f   :  { %1256 = vmatpush1.msra.mxu0 %v5125_v33  ;;  %1327 = vmatpush1.msra.mxu1 %v5128_v28 }
 0x370   :  { %1257 = vmatprep.subr.mxu0 %v5131_v26  ;;  %1328 = vmatprep.subr.mxu1 %v5134_v42 }
 0x371   :  { %1258 = vmatpush1.msra.mxu0 %v5137_v15  ;;  %1329 = vmatpush1.msra.mxu1 %v5140_v58 }
 0x372   :  { %1259 = vmatprep.subr.mxu0 %v5143_v59  ;;  %1330 = vmatprep.subr.mxu1 %v5146_v61 }
 0x373   :  { %1260 = vmatpush1.msra.mxu0 %v5149_v62  ;;  %1331 = vmatpush1.msra.mxu1 %v5152_v35  ;;  %v5167_v62 = vld [vmem:[#allocation13 + $0x128] sm:$0xff]  ;;  %v5170_v35 = vld [vmem:[#allocation13 + $0x138] sm:$0xff] }
 0x374   :  { %1261 = vmatprep.subr.mxu0 %v5155_v31  ;;  %1332 = vmatprep.subr.mxu1 %v5158_v19 }
 0x375   :  { %1262 = vmatpush1.msra.mxu0 %v5161_v20  ;;  %1333 = vmatpush1.msra.mxu1 %v5164_v29 }
 0x376   :  { %1263 = vmatprep.subr.mxu0 %v5167_v62  ;;  %1334 = vmatprep.subr.mxu1 %v5170_v35 }
 0x377   :  { %1264 = vmatpush1.msra.mxu0 %v4623_v63  ;;  %1335 = vmatpush1.msra.mxu1 %v4625_v1  ;;  %v6844_v1 = vld [vmem:[#allocation53_spill] sm:$0xff] }
 0x378   :  { %1265 = vmatprep.subr.mxu0 %v4629_v2  ;;  %1336 = vmatprep.subr.mxu1 %v4631_v3 }
 0x379   :  { %1266 = vmatpush1.msra.mxu0 %v4637_v4  ;;  %1337 = vmatpush1.msra.mxu1 %v4639_v5  ;;  %v6845_v5 = vld [vmem:[#allocation55_spill] sm:$0xff] }
 0x37a   :  { %1267 = vmatprep.subr.mxu0 %v4645_v7  ;;  %1338 = vmatprep.subr.mxu1 %v4647_v8 }
 0x37b   :  { %1268 = vmatpush1.msra.mxu0 %v4651_v9  ;;  %1339 = vmatpush1.msra.mxu1 %v4653_v10 }
 0x37c   :  { %1269 = vmatprep.subr.mxu0 %v4657_v11  ;;  %1340 = vmatprep.subr.mxu1 %v4659_v12  ;;  %v6846_v11 = vld [vmem:[#allocation56_spill] sm:$0xff] }
 0x37d   :  { %1270 = vmatpush1.msra.mxu0 %v4665_v13  ;;  %1341 = vmatpush1.msra.mxu1 %v4667_v14  ;;  %v6847_v13 = vld [vmem:[#allocation54_spill] sm:$0xff] }
 0x37e   :  { %1271 = vmatprep.subr.mxu0 %v4673_v16  ;;  %1342 = vmatprep.subr.mxu1 %v4675_v17 }
 0x37f   :  { %1272 = vmatpush1.msra.mxu0 %v4679_v18  ;;  %1343 = vmatpush1.msra.mxu1 %v6789_v51 }
 0x380   :  { %1273 = vmatprep.subr.mxu0 %v6790_v30  ;;  %1344 = vmatprep.subr.mxu1 %v6791_v22 }
 0x381   :  { %1274 = vmatpush1.msra.mxu0 %v6792_v21  ;;  %1345 = vmatpush1.msra.mxu1 %v6817_v36 }
 0x382   :  { %1275 = vmatprep.subr.mxu0 %v6818_v37  ;;  %1346 = vmatprep.subr.mxu1 %v6819_v38 }
 0x383   :  { %1276 = vmatpush1.msra.mxu0 %v6820_v39  ;;  %1347 = vmatpush1.msra.mxu1 %v6821_v40 }
 0x384   :  { %1277 = vmatprep.subr.mxu0 %v6822_v41  ;;  %1348 = vmatprep.subr.mxu1 %v6823_v43 }
 0x385   :  { %1278 = vmatpush1.msra.mxu0 %v6824_v44  ;;  %1349 = vmatpush1.msra.mxu1 %v6825_v45 }
 0x386   :  { %1279 = vmatprep.subr.mxu0 %v6826_v46  ;;  %1350 = vmatprep.subr.mxu1 %v6827_v47  ;;  %v6849_v46 = vld [vmem:[#allocation22_spill] sm:$0xff]  ;;  %v6850_v47 = vld [vmem:[#allocation23_spill] sm:$0xff] }
 0x387   :  { %1280 = vmatpush1.msra.mxu0 %v6828_v48  ;;  %1351 = vmatpush1.msra.mxu1 %v6829_v49  ;;  %v5251_v48 = vld [vmem:[#allocation13 + $0x120] sm:$0xff]  ;;  %v5254_v49 = vld [vmem:[#allocation13 + $0x130] sm:$0xff] }
 0x388   :  { %1281 = vmatprep.subr.mxu0 %v6830_v50  ;;  %1352 = vmatprep.subr.mxu1 %v6831_v52  ;;  %v5257_v50 = vld [vmem:[#allocation13 + $0x108] sm:$0xff]  ;;  %v5260_v52 = vld [vmem:[#allocation13 + $0x118] sm:$0xff] }
 0x389   :  { %1282 = vmatpush1.msra.mxu0 %v6832_v53  ;;  %1315 = vmatprep.mubr.f32.mxu0 %v6833_v54  ;;  %v5263_v53 = vld [vmem:[#allocation13 + $0x100] sm:$0xff] }
 0x38a   :  { %1353 = vmatpush1.msra.mxu1 %v6834_v55  ;;  %1386 = vmatprep.mubr.f32.mxu1 %v6833_v54  ;;  %v5266_v55 = vld [vmem:[#allocation13 + $0x110] sm:$0xff] }
 0x38b   :  { %1434 = vmatprep.subr.mxu0 %v5083_v56  ;;  %1505 = vmatprep.subr.mxu1 %v5086_v57 }
 0x42a   :  { %v1134_v63 = vpop.f32.mrf.mxu0  ;;  %v1205_v8 = vpop.f32.mrf.mxu1 }
 0x42b   :  { %v1210_v2 = vadd.f32 %v1134_v63, %v6844_v1  ;;  %v1212_v14 = vadd.f32 %v1205_v8, %v6847_v13  ;;  %v5272_v63 = vld [vmem:[#allocation13 + $0xf8] sm:$0xff]  ;;  %v5275_v1 = vld [vmem:[#allocation13 + $0xe0] sm:$0xff]  ;;  %v5293_v8 = vld [vmem:[#allocation13 + $0xa8] sm:$0xff] }
 0x42c   :  { %v1136_v3 = vpop.f32.mrf.mxu0  ;;  %v1207_v10 = vpop.f32.mrf.mxu1  ;;  %v5308_v13 = vld [vmem:[#allocation13 + $0x98] sm:$0xff] }
 0x42d   :  { %v3890_v4 = vmul.f32 -1.442695, %v1210_v2  ;;  %v1211_v7 = vadd.f32 %v1136_v3, %v6845_v5  ;;  %v1213_v12 = vadd.f32 %v1207_v10, %v6846_v11  ;;  %v5278_v2 = vld [vmem:[#allocation13 + $0xf0] sm:$0xff]  ;;  %v5281_v3 = vld [vmem:[#allocation13 + $0xc8] sm:$0xff]  ;;  %v5287_v5 = vld [vmem:[#allocation13 + $0xc0] sm:$0xff] }
 0x42e   :  { %v5299_v10 = vld [vmem:[#allocation13 + $0xa0] sm:$0xff]  ;;  %v5302_v11 = vld [vmem:[#allocation13 + $0xb0] sm:$0xff] }
 0x42f   :  { %3988 = vpow2.f32 %v3890_v4  ;;  %v3891_v9 = vmul.f32 -1.442695, %v1211_v7  ;;  %v3892_v16 = vmul.f32 -1.442695, %v1213_v12  ;;  %v5284_v4 = vld [vmem:[#allocation13 + $0xd8] sm:$0xff]  ;;  %v5290_v7 = vld [vmem:[#allocation13 + $0xd0] sm:$0xff] }
 0x430   :  { %v5305_v12 = vld [vmem:[#allocation13 + $0x88] sm:$0xff] }
 0x431   :  { %3990 = vpow2.f32 %v3891_v9  ;;  %v5296_v9 = vld [vmem:[#allocation13 + $0xb8] sm:$0xff] }
 0x432   :  { %3992 = vtanh.f32 %v1212_v14  ;;  %v5311_v14 = vld [vmem:[#allocation13 + $0x80] sm:$0xff] }
 0x433   :  { %3994 = vpow2.f32 %v3892_v16  ;;  %v5314_v16 = vld [vmem:[#allocation13 + $0x90] sm:$0xff] }
 0x434   :  { %6851 = vst [vmem:[#allocation48_spill] sm:$0xff] %v5314_v16 }
 0x43c   :  { %v3989_v17 = vpop.eup %3988 }
 0x43d   :  { %v1217_v18 = vadd.f32 1.0, %v3989_v17  ;;  %v5317_v17 = vld [vmem:[#allocation13 + $0x68] sm:$0xff] }
 0x43e   :  { %v3991_v51 = vpop.eup %3990  ;;  %6852 = vst [vmem:[#allocation46_spill] sm:$0xff] %v5317_v17 }
 0x43f   :  { %3996 = vrcp.f32 %v1217_v18  ;;  %v1223_v30 = vadd.f32 1.0, %v3991_v51  ;;  %v3993_v22 = vpop.eup %3992  ;;  %v5320_v18 = vld [vmem:[#allocation13 + $0x78] sm:$0xff]  ;;  %v5323_v51 = vld [vmem:[#allocation13 + $0x60] sm:$0xff] }
 0x440   :  { %v3995_v21 = vpop.eup %3994  ;;  %6853 = vst [vmem:[#allocation28_spill] sm:$0xff] %v5320_v18  ;;  %6854 = vst [vmem:[#allocation29_spill] sm:$0xff] %v5323_v51 }
 0x441   :  { %3998 = vrcp.f32 %v1223_v30  ;;  %v1230_v39 = vadd.f32 1.0, %v3995_v21  ;;  %v5326_v30 = vld [vmem:[#allocation13 + $0x70] sm:$0xff]  ;;  %v5332_v21 = vld [vmem:[#allocation13 + $0x58] sm:$0xff] }
 0x442   :  { %6855 = vst [vmem:[#allocation30_spill] sm:$0xff] %v5326_v30  ;;  %6857 = vst [vmem:[#allocation32_spill] sm:$0xff] %v5332_v21 }
 0x443   :  { %4000 = vrcp.f32 %v1230_v39  ;;  %v5344_v39 = vld [vmem:[#allocation13 + $0x38] sm:$0xff] }
 0x444   :  { %6861 = vst [vmem:[#allocation36_spill] sm:$0xff] %v5344_v39 }
 0x44c   :  { %v3997_v36 = vpop.eup %3996 }
 0x44d   :  { %v1235_v37 = vmul.f32 %v3997_v36, %v3993_v22  ;;  %v5329_v22 = vld [vmem:[#allocation13 + $0x48] sm:$0xff]  ;;  %v5335_v36 = vld [vmem:[#allocation13 + $0x40] sm:$0xff] }
 0x44e   :  { %v3999_v38 = vpop.eup %3998  ;;  %6856 = vst [vmem:[#allocation31_spill] sm:$0xff] %v5329_v22  ;;  %6858 = vst [vmem:[#allocation33_spill] sm:$0xff] %v5335_v36 }
 0x44f   :  { %v1234_v40 = vmul.f32 %v3999_v38, %v5094_v32  ;;  %v5269_v32 = vld [vmem:[#allocation13 + $0xe8] sm:$0xff] }
 0x450   :  { %v4001_v43 = vpop.eup %4000  ;;  %v5341_v38 = vld [vmem:[#allocation13 + $0x28] sm:$0xff] }
 0x451   :  { %v5220_v41 = vadd.f32 %v1235_v37, %v1234_v40  ;;  %v5338_v37 = vld [vmem:[#allocation13 + $0x50] sm:$0xff]  ;;  %6860 = vst [vmem:[#allocation35_spill] sm:$0xff] %v5341_v38  ;;  %v5347_v40 = vld [vmem:[#allocation13 + $0x20] sm:$0xff] }
 0x452   :  { %6859 = vst [vmem:[#allocation34_spill] sm:$0xff] %v5338_v37  ;;  %6862 = vst [vmem:[#allocation37_spill] sm:$0xff] %v5347_v40 }
 0x453   :  { %4002 = vtanh.f32 %v5220_v41 }
 0x460   :  { %v4003_v44 = vpop.eup %4002 }
 0x461   :  { %v5223_v45 = vmul.f32 %v4003_v44, %v4001_v43  ;;  %v5350_v43 = vld [vmem:[#allocation13 + $0x30] sm:$0xff]  ;;  %v5353_v44 = vld [vmem:[#allocation13 + $0x8] sm:$0xff] }
 0x462   :  { %6863 = vst [vmem:[#allocation38_spill] sm:$0xff] %v5350_v43  ;;  %6864 = vst [vmem:[#allocation39_spill] sm:$0xff] %v5353_v44 }
 0x463   :  { %6848 = vst [vmem:[#allocation47_spill] sm:$0xff] %v5223_v45  ;;  %1316 = vmatmul.mubr.f32.vlgmr.msra.gmra.mxu0 %v5223_v45  ;;  %1387 = vmatmul.mubr.f32.vlgmr.msra.gmra.mxu1 %v5223_v45  ;;  %v5356_v45 = vld [vmem:[#allocation13 + $0x18] sm:$0xff] }
 0x464   :  { %1435 = vmatpush1.msra.mxu0 %v5101_v60  ;;  %1506 = vmatpush1.msra.mxu1 %v5104_v0  ;;  %6865 = vst [vmem:[#allocation40_spill] sm:$0xff] %v5356_v45 }
 0x465   :  { %1436 = vmatprep.subr.mxu0 %v5107_v6  ;;  %1507 = vmatprep.subr.mxu1 %v5110_v27 }
 0x466   :  { %1437 = vmatpush1.msra.mxu0 %v5113_v25  ;;  %1508 = vmatpush1.msra.mxu1 %v5116_v24 }
 0x467   :  { %1438 = vmatprep.subr.mxu0 %v5119_v23  ;;  %1509 = vmatprep.subr.mxu1 %v5122_v34 }
 0x468   :  { %1439 = vmatpush1.msra.mxu0 %v5125_v33  ;;  %1510 = vmatpush1.msra.mxu1 %v5128_v28 }
 0x469   :  { %1440 = vmatprep.subr.mxu0 %v5131_v26  ;;  %1511 = vmatprep.subr.mxu1 %v5134_v42 }
 0x46a   :  { %1441 = vmatpush1.msra.mxu0 %v5137_v15  ;;  %1512 = vmatpush1.msra.mxu1 %v5140_v58 }
 0x46b   :  { %1442 = vmatprep.subr.mxu0 %v5143_v59  ;;  %1513 = vmatprep.subr.mxu1 %v5146_v61 }
 0x46c   :  { %1443 = vmatpush1.msra.mxu0 %v6849_v46  ;;  %1514 = vmatpush1.msra.mxu1 %v6850_v47 }
 0x46d   :  { %1444 = vmatprep.subr.mxu0 %v5155_v31  ;;  %1515 = vmatprep.subr.mxu1 %v5158_v19 }
 0x46e   :  { %1445 = vmatpush1.msra.mxu0 %v5161_v20  ;;  %1516 = vmatpush1.msra.mxu1 %v5164_v29 }
 0x46f   :  { %1446 = vmatprep.subr.mxu0 %v5167_v62  ;;  %1517 = vmatprep.subr.mxu1 %v5170_v35 }
 0x470   :  { %1447 = vmatpush1.msra.mxu0 %v5251_v48  ;;  %1518 = vmatpush1.msra.mxu1 %v5254_v49 }
 0x471   :  { %1448 = vmatprep.subr.mxu0 %v5257_v50  ;;  %1519 = vmatprep.subr.mxu1 %v5260_v52 }
 0x472   :  { %1449 = vmatpush1.msra.mxu0 %v5263_v53  ;;  %1520 = vmatpush1.msra.mxu1 %v5266_v55 }
 0x473   :  { %1450 = vmatprep.subr.mxu0 %v5269_v32  ;;  %1521 = vmatprep.subr.mxu1 %v5272_v63 }
 0x474   :  { %1451 = vmatpush1.msra.mxu0 %v5275_v1  ;;  %1522 = vmatpush1.msra.mxu1 %v5278_v2 }
 0x475   :  { %1452 = vmatprep.subr.mxu0 %v5281_v3  ;;  %1523 = vmatprep.subr.mxu1 %v5284_v4 }
 0x476   :  { %1453 = vmatpush1.msra.mxu0 %v5287_v5  ;;  %1524 = vmatpush1.msra.mxu1 %v5290_v7 }
 0x477   :  { %1454 = vmatprep.subr.mxu0 %v5293_v8  ;;  %1525 = vmatprep.subr.mxu1 %v5296_v9 }
 0x478   :  { %1455 = vmatpush1.msra.mxu0 %v5299_v10  ;;  %1526 = vmatpush1.msra.mxu1 %v5302_v11 }
 0x479   :  { %1456 = vmatprep.subr.mxu0 %v5305_v12  ;;  %1527 = vmatprep.subr.mxu1 %v5308_v13 }
 0x47a   :  { %1457 = vmatpush1.msra.mxu0 %v5311_v14  ;;  %1528 = vmatpush1.msra.mxu1 %v5314_v16 }
 0x47b   :  { %1458 = vmatprep.subr.mxu0 %v5317_v17  ;;  %1529 = vmatprep.subr.mxu1 %v5320_v18  ;;  %v6871_v18 = vld [vmem:[#allocation58_spill] sm:$0xff] }
 0x47c   :  { %1459 = vmatpush1.msra.mxu0 %v5323_v51  ;;  %1530 = vmatpush1.msra.mxu1 %v5326_v30  ;;  %v6870_v51 = vld [vmem:[#allocation60_spill] sm:$0xff] }
 0x47d   :  { %1460 = vmatprep.subr.mxu0 %v5329_v22  ;;  %1531 = vmatprep.subr.mxu1 %v5332_v21 }
 0x47e   :  { %1461 = vmatpush1.msra.mxu0 %v5335_v36  ;;  %1532 = vmatpush1.msra.mxu1 %v5338_v37  ;;  %v6869_v36 = vld [vmem:[#allocation59_spill] sm:$0xff] }
 0x47f   :  { %1462 = vmatprep.subr.mxu0 %v5341_v38  ;;  %1533 = vmatprep.subr.mxu1 %v5344_v39  ;;  %v5359_v38 = vld [vmem:[#allocation13] sm:$0xff]  ;;  %v5363_v39 = vld [vmem:[#allocation13 + $0x10] sm:$0xff] }
 0x480   :  { %1463 = vmatpush1.msra.mxu0 %v5347_v40  ;;  %1534 = vmatpush1.msra.mxu1 %v5350_v43  ;;  %6866 = vst [vmem:[#allocation41_spill] sm:$0xff] %v5359_v38  ;;  %6867 = vst [vmem:[#allocation42_spill] sm:$0xff] %v5363_v39  ;;  %v6868_v43 = vld [vmem:[#allocation57_spill] sm:$0xff] }
 0x481   :  { %1464 = vmatprep.subr.mxu0 %v5353_v44  ;;  %1535 = vmatprep.subr.mxu1 %v5356_v45 }
 0x482   :  { %1465 = vmatpush1.msra.mxu0 %v5359_v38  ;;  %1498 = vmatprep.mubr.f32.mxu0 %v6833_v54 }
 0x483   :  { %1536 = vmatpush1.msra.mxu1 %v5363_v39  ;;  %1569 = vmatprep.mubr.f32.mxu1 %v6833_v54 }
 0x484   :  { %1617 = vmatprep.subr.mxu0 %v5083_v56  ;;  %1688 = vmatprep.subr.mxu1 %v5086_v57 }
 0x523   :  { %v1317_v44 = vpop.f32.mrf.mxu0  ;;  %v1388_v38 = vpop.f32.mrf.mxu1 }
 0x524   :  { %v1393_v40 = vadd.f32 %v1317_v44, %v6868_v43  ;;  %v1395_v54 = vadd.f32 %v1388_v38, %v6871_v18  ;;  %v6878_v38 = vld [vmem:[#allocation31_spill] sm:$0xff] }
 0x525   :  { %v1319_v45 = vpop.f32.mrf.mxu0  ;;  %v1390_v30 = vpop.f32.mrf.mxu1 }
 0x526   :  { %v3893_v37 = vmul.f32 -1.442695, %v1393_v40  ;;  %v1394_v21 = vadd.f32 %v1319_v45, %v6869_v36  ;;  %v1396_v39 = vadd.f32 %v1390_v30, %v6870_v51  ;;  %v6877_v30 = vld [vmem:[#allocation30_spill] sm:$0xff] }
 0x528   :  { %4004 = vpow2.f32 %v3893_v37  ;;  %v3894_v22 = vmul.f32 -1.442695, %v1394_v21  ;;  %v3895_v17 = vmul.f32 -1.442695, %v1396_v39  ;;  %v6879_v39 = vld [vmem:[#allocation32_spill] sm:$0xff] }
 0x52a   :  { %4006 = vpow2.f32 %v3894_v22 }
 0x52b   :  { %4008 = vtanh.f32 %v1395_v54 }
 0x52c   :  { %4010 = vpow2.f32 %v3895_v17  ;;  %v6876_v17 = vld [vmem:[#allocation29_spill] sm:$0xff] }
 0x535   :  { %v4005_v56 = vpop.eup %4004 }
 0x536   :  { %v1400_v16 = vadd.f32 1.0, %v4005_v56 }
 0x537   :  { %v4007_v57 = vpop.eup %4006 }
 0x538   :  { %4012 = vrcp.f32 %v1400_v16  ;;  %v1406_v43 = vadd.f32 1.0, %v4007_v57  ;;  %v4009_v40 = vpop.eup %4008  ;;  %v6873_v57 = vld [vmem:[#allocation48_spill] sm:$0xff] }
 0x539   :  { %v4011_v45 = vpop.eup %4010  ;;  %v6875_v16 = vld [vmem:[#allocation28_spill] sm:$0xff] }
 0x53a   :  { %4014 = vrcp.f32 %v1406_v43  ;;  %v1413_v22 = vadd.f32 1.0, %v4011_v45  ;;  %v6880_v43 = vld [vmem:[#allocation33_spill] sm:$0xff]  ;;  %v6882_v45 = vld [vmem:[#allocation35_spill] sm:$0xff] }
 0x53c   :  { %4016 = vrcp.f32 %v1413_v22  ;;  %v6886_v22 = vld [vmem:[#allocation39_spill] sm:$0xff] }
 0x545   :  { %v4013_v36 = vpop.eup %4012 }
 0x546   :  { %v1418_v37 = vmul.f32 %v4013_v36, %v4009_v40  ;;  %v6881_v40 = vld [vmem:[#allocation34_spill] sm:$0xff]  ;;  %v6883_v36 = vld [vmem:[#allocation36_spill] sm:$0xff] }
 0x547   :  { %v4015_v21 = vpop.eup %4014 }
 0x548   :  { %v1417_v44 = vmul.f32 %v4015_v21, %v5220_v41  ;;  %v6874_v41 = vld [vmem:[#allocation46_spill] sm:$0xff] }
 0x549   :  { %v4017_v56 = vpop.eup %4016  ;;  %v6885_v21 = vld [vmem:[#allocation38_spill] sm:$0xff] }
 0x54a   :  { %v5374_v51 = vadd.f32 %v1418_v37, %v1417_v44  ;;  %v6884_v37 = vld [vmem:[#allocation37_spill] sm:$0xff]  ;;  %v6887_v44 = vld [vmem:[#allocation40_spill] sm:$0xff] }
 0x54c   :  { %4018 = vtanh.f32 %v5374_v51 }
 0x559   :  { %v4019_v54 = vpop.eup %4018 }
 0x55a   :  { %v5377_v18 = vmul.f32 %v4019_v54, %v4017_v56  ;;  %v6888_v56 = vld [vmem:[#allocation41_spill] sm:$0xff]  ;;  %v6889_v54 = vmov 0.0  }
 0x55c   :  { %6872 = vst [vmem:[#allocation43_spill] sm:$0xff] %v5377_v18  ;;  %1499 = vmatmul.mubr.f32.vlgmr.msra.gmra.mxu0 %v5377_v18  ;;  %1570 = vmatmul.mubr.f32.vlgmr.msra.gmra.mxu1 %v5377_v18  ;;  %v6890_v18 = vld [vmem:[#allocation42_spill] sm:$0xff] }
 0x55d   :  { %1618 = vmatpush1.msra.mxu0 %v5101_v60  ;;  %1689 = vmatpush1.msra.mxu1 %v5104_v0 }
 0x55e   :  { %1619 = vmatprep.subr.mxu0 %v5107_v6  ;;  %1690 = vmatprep.subr.mxu1 %v5110_v27 }
 0x55f   :  { %1620 = vmatpush1.msra.mxu0 %v5113_v25  ;;  %1691 = vmatpush1.msra.mxu1 %v5116_v24 }
 0x560   :  { %1621 = vmatprep.subr.mxu0 %v5119_v23  ;;  %1692 = vmatprep.subr.mxu1 %v5122_v34 }
 0x561   :  { %1622 = vmatpush1.msra.mxu0 %v5125_v33  ;;  %1693 = vmatpush1.msra.mxu1 %v5128_v28 }
 0x562   :  { %1623 = vmatprep.subr.mxu0 %v5131_v26  ;;  %1694 = vmatprep.subr.mxu1 %v5134_v42 }
 0x563   :  { %1624 = vmatpush1.msra.mxu0 %v5137_v15  ;;  %1695 = vmatpush1.msra.mxu1 %v5140_v58 }
 0x564   :  { %1625 = vmatprep.subr.mxu0 %v5143_v59  ;;  %1696 = vmatprep.subr.mxu1 %v5146_v61 }
 0x565   :  { %1626 = vmatpush1.msra.mxu0 %v6849_v46  ;;  %1697 = vmatpush1.msra.mxu1 %v6850_v47 }
 0x566   :  { %1627 = vmatprep.subr.mxu0 %v5155_v31  ;;  %1698 = vmatprep.subr.mxu1 %v5158_v19 }
 0x567   :  { %1628 = vmatpush1.msra.mxu0 %v5161_v20  ;;  %1699 = vmatpush1.msra.mxu1 %v5164_v29 }
 0x568   :  { %1629 = vmatprep.subr.mxu0 %v5167_v62  ;;  %1700 = vmatprep.subr.mxu1 %v5170_v35 }
 0x569   :  { %1630 = vmatpush1.msra.mxu0 %v5251_v48  ;;  %1701 = vmatpush1.msra.mxu1 %v5254_v49 }
 0x56a   :  { %1631 = vmatprep.subr.mxu0 %v5257_v50  ;;  %1702 = vmatprep.subr.mxu1 %v5260_v52 }
 0x56b   :  { %1632 = vmatpush1.msra.mxu0 %v5263_v53  ;;  %1703 = vmatpush1.msra.mxu1 %v5266_v55 }
 0x56c   :  { %1633 = vmatprep.subr.mxu0 %v5269_v32  ;;  %1704 = vmatprep.subr.mxu1 %v5272_v63 }
 0x56d   :  { %1634 = vmatpush1.msra.mxu0 %v5275_v1  ;;  %1705 = vmatpush1.msra.mxu1 %v5278_v2 }
 0x56e   :  { %1635 = vmatprep.subr.mxu0 %v5281_v3  ;;  %1706 = vmatprep.subr.mxu1 %v5284_v4 }
 0x56f   :  { %1636 = vmatpush1.msra.mxu0 %v5287_v5  ;;  %1707 = vmatpush1.msra.mxu1 %v5290_v7 }
 0x570   :  { %1637 = vmatprep.subr.mxu0 %v5293_v8  ;;  %1708 = vmatprep.subr.mxu1 %v5296_v9 }
 0x571   :  { %1638 = vmatpush1.msra.mxu0 %v5299_v10  ;;  %1709 = vmatpush1.msra.mxu1 %v5302_v11 }
 0x572   :  { %1639 = vmatprep.subr.mxu0 %v5305_v12  ;;  %1710 = vmatprep.subr.mxu1 %v5308_v13 }
 0x573   :  { %1640 = vmatpush1.msra.mxu0 %v5311_v14  ;;  %1711 = vmatpush1.msra.mxu1 %v6873_v57 }
 0x574   :  { %1641 = vmatprep.subr.mxu0 %v6874_v41  ;;  %1712 = vmatprep.subr.mxu1 %v6875_v16  ;;  %v6896_v16 = vld [vmem:[#allocation62_spill] sm:$0xff] }
 0x575   :  { %1642 = vmatpush1.msra.mxu0 %v6876_v17  ;;  %1713 = vmatpush1.msra.mxu1 %v6877_v30  ;;  %v6895_v17 = vld [vmem:[#allocation64_spill] sm:$0xff] }
 0x576   :  { %1643 = vmatprep.subr.mxu0 %v6878_v38  ;;  %1714 = vmatprep.subr.mxu1 %v6879_v39 }
 0x577   :  { %1644 = vmatpush1.msra.mxu0 %v6880_v43  ;;  %1715 = vmatpush1.msra.mxu1 %v6881_v40  ;;  %v6891_v40 = vld [vmem:[#allocation25_spill] sm:$0xff] }
 0x578   :  { %1645 = vmatprep.subr.mxu0 %v6882_v45  ;;  %1716 = vmatprep.subr.mxu1 %v6883_v36  ;;  %v6892_v45 = vld [vmem:[#allocation26_spill] sm:$0xff] }
 0x579   :  { %1646 = vmatpush1.msra.mxu0 %v6884_v37  ;;  %1717 = vmatpush1.msra.mxu1 %v6885_v21  ;;  %v6893_v37 = vld [vmem:[#allocation61_spill] sm:$0xff] }
 0x57a   :  { %1647 = vmatprep.subr.mxu0 %v6886_v22  ;;  %1718 = vmatprep.subr.mxu1 %v6887_v44  ;;  %v6894_v22 = vld [vmem:[#allocation63_spill] sm:$0xff] }
 0x57b   :  { %1648 = vmatpush1.msra.mxu0 %v6888_v56  ;;  %1681 = vmatprep.mubr.f32.mxu0 %v6889_v54 }
 0x57c   :  { %1719 = vmatpush1.msra.mxu1 %v6890_v18  ;;  %1752 = vmatprep.mubr.f32.mxu1 %v6889_v54 }
 0x57d   :  { %1800 = vmatprep.subr.mxu0 %v6891_v40  ;;  %1871 = vmatprep.subr.mxu1 %v6892_v45 }
 0x61c   :  { %v1500_v36 = vpop.f32.mrf.mxu0  ;;  %v1571_v44 = vpop.f32.mrf.mxu1 }
 0x61d   :  { %v1576_v43 = vadd.f32 %v1500_v36, %v6893_v37  ;;  %v1578_v54 = vadd.f32 %v1571_v44, %v6896_v16 }
 0x61e   :  { %v1502_v21 = vpop.f32.mrf.mxu0  ;;  %v1573_v30 = vpop.f32.mrf.mxu1 }
 0x61f   :  { %v3896_v39 = vmul.f32 -1.442695, %v1576_v43  ;;  %v1577_v38 = vadd.f32 %v1502_v21, %v6894_v22  ;;  %v1579_v18 = vadd.f32 %v1573_v30, %v6895_v17 }
 0x621   :  { %4020 = vpow2.f32 %v3896_v39  ;;  %v3897_v56 = vmul.f32 -1.442695, %v1577_v38  ;;  %v3898_v41 = vmul.f32 -1.442695, %v1579_v18 }
 0x623   :  { %4022 = vpow2.f32 %v3897_v56 }
 0x624   :  { %4024 = vtanh.f32 %v1578_v54 }
 0x625   :  { %4026 = vpow2.f32 %v3898_v41 }
 0x62e   :  { %v4021_v40 = vpop.eup %4020 }
 0x62f   :  { %v1583_v57 = vadd.f32 1.0, %v4021_v40  ;;  %v2043_v40 = vld [vmem:[#allocation14 + $0x1e0] sm:$0xff] }
 0x630   :  { %v4023_v45 = vpop.eup %4022 }
 0x631   :  { %4028 = vrcp.f32 %v1583_v57  ;;  %v1589_v36 = vadd.f32 1.0, %v4023_v45  ;;  %v4025_v43 = vpop.eup %4024  ;;  %v2045_v45 = vld [vmem:[#allocation14 + $0x1f0] sm:$0xff] }
 0x632   :  { %v4027_v37 = vpop.eup %4026 }
 0x633   :  { %4030 = vrcp.f32 %v1589_v36  ;;  %v1596_v22 = vadd.f32 1.0, %v4027_v37  ;;  %v2040_v36 = vld [vmem:[#allocation14 + $0x1c8] sm:$0xff]  ;;  %v2039_v37 = vld [vmem:[#allocation14 + $0x1c0] sm:$0xff] }
 0x635   :  { %4032 = vrcp.f32 %v1596_v22  ;;  %v2035_v22 = vld [vmem:[#allocation14 + $0x1a0] sm:$0xff] }
 0x63e   :  { %v4029_v39 = vpop.eup %4028 }
 0x63f   :  { %v1601_v21 = vmul.f32 %v4029_v39, %v4025_v43  ;;  %v2042_v43 = vld [vmem:[#allocation14 + $0x1d8] sm:$0xff]  ;;  %v2041_v39 = vld [vmem:[#allocation14 + $0x1d0] sm:$0xff] }
 0x640   :  { %v4031_v38 = vpop.eup %4030 }
 0x641   :  { %v1600_v56 = vmul.f32 %v4031_v38, %v5374_v51  ;;  %v2038_v38 = vld [vmem:[#allocation14 + $0x1b8] sm:$0xff] }
 0x642   :  { %v4033_v18 = vpop.eup %4032 }
 0x643   :  { %v5452_v17 = vadd.f32 %v1601_v21, %v1600_v56  ;;  %v2036_v21 = vld [vmem:[#allocation14 + $0x1a8] sm:$0xff]  ;;  %v2037_v56 = vld [vmem:[#allocation14 + $0x1b0] sm:$0xff] }
 0x645   :  { %4034 = vtanh.f32 %v5452_v17 }
 0x652   :  { %v4035_v16 = vpop.eup %4034 }
 0x653   :  { %v5455_v30 = vmul.f32 %v4035_v16, %v4033_v18  ;;  %v2034_v18 = vld [vmem:[#allocation14 + $0x198] sm:$0xff]  ;;  %v2031_v16 = vld [vmem:[#allocation14 + $0x180] sm:$0xff] }
 0x655   :  { %1682 = vmatmul.mubr.f32.vlgmr.msra.gmra.mxu0 %v5455_v30  ;;  %1753 = vmatmul.mubr.f32.vlgmr.msra.gmra.mxu1 %v5455_v30 }
 0x656   :  { %1801 = vmatpush1.msra.mxu0 %v5101_v60  ;;  %1872 = vmatpush1.msra.mxu1 %v5104_v0  ;;  %v6899_v60 = vld [vmem:[#allocation28_spill] sm:$0xff]  ;;  %v6900_v0 = vld [vmem:[#allocation29_spill] sm:$0xff] }
 0x657   :  { %1802 = vmatprep.subr.mxu0 %v5107_v6  ;;  %1873 = vmatprep.subr.mxu1 %v5110_v27  ;;  %v6901_v6 = vld [vmem:[#allocation30_spill] sm:$0xff]  ;;  %v6902_v27 = vld [vmem:[#allocation31_spill] sm:$0xff] }
 0x658   :  { %1803 = vmatpush1.msra.mxu0 %v5113_v25  ;;  %1874 = vmatpush1.msra.mxu1 %v5116_v24  ;;  %v6903_v25 = vld [vmem:[#allocation32_spill] sm:$0xff]  ;;  %v6904_v24 = vld [vmem:[#allocation33_spill] sm:$0xff] }
 0x659   :  { %1804 = vmatprep.subr.mxu0 %v5119_v23  ;;  %1875 = vmatprep.subr.mxu1 %v5122_v34  ;;  %v6905_v23 = vld [vmem:[#allocation34_spill] sm:$0xff]  ;;  %v6906_v34 = vld [vmem:[#allocation35_spill] sm:$0xff] }
 0x65a   :  { %1805 = vmatpush1.msra.mxu0 %v5125_v33  ;;  %1876 = vmatpush1.msra.mxu1 %v5128_v28  ;;  %v6907_v33 = vld [vmem:[#allocation36_spill] sm:$0xff]  ;;  %v6908_v28 = vld [vmem:[#allocation37_spill] sm:$0xff] }
 0x65b   :  { %1806 = vmatprep.subr.mxu0 %v5131_v26  ;;  %1877 = vmatprep.subr.mxu1 %v5134_v42  ;;  %v6909_v26 = vld [vmem:[#allocation38_spill] sm:$0xff]  ;;  %v6910_v42 = vld [vmem:[#allocation39_spill] sm:$0xff] }
 0x65c   :  { %1807 = vmatpush1.msra.mxu0 %v5137_v15  ;;  %1878 = vmatpush1.msra.mxu1 %v5140_v58  ;;  %v6911_v15 = vld [vmem:[#allocation40_spill] sm:$0xff]  ;;  %v6912_v58 = vld [vmem:[#allocation41_spill] sm:$0xff] }
 0x65d   :  { %1808 = vmatprep.subr.mxu0 %v5143_v59  ;;  %1879 = vmatprep.subr.mxu1 %v5146_v61  ;;  %v6913_v59 = vld [vmem:[#allocation42_spill] sm:$0xff]  ;;  %v6914_v61 = vmov 0.0  }
 0x65e   :  { %1809 = vmatpush1.msra.mxu0 %v6849_v46  ;;  %1880 = vmatpush1.msra.mxu1 %v6850_v47 }
 0x65f   :  { %1810 = vmatprep.subr.mxu0 %v5155_v31  ;;  %1881 = vmatprep.subr.mxu1 %v5158_v19  ;;  %v6915_v19 = vld [vmem:[#allocation65_spill] sm:$0xff] }
 0x660   :  { %1811 = vmatpush1.msra.mxu0 %v5161_v20  ;;  %1882 = vmatpush1.msra.mxu1 %v5164_v29  ;;  %v6897_v29 = vld [vmem:[#allocation48_spill] sm:$0xff]  ;;  %v6898_v20 = vld [vmem:[#allocation46_spill] sm:$0xff] }
 0x661   :  { %1812 = vmatprep.subr.mxu0 %v5167_v62  ;;  %1883 = vmatprep.subr.mxu1 %v5170_v35  ;;  %v2044_v62 = vld [vmem:[#allocation14 + $0x1e8] sm:$0xff]  ;;  %v2046_v35 = vld [vmem:[#allocation14 + $0x1f8] sm:$0xff] }
 0x662   :  { %1813 = vmatpush1.msra.mxu0 %v5251_v48  ;;  %1884 = vmatpush1.msra.mxu1 %v5254_v49  ;;  %v6916_v49 = vld [vmem:[#allocation67_spill] sm:$0xff] }
 0x663   :  { %1814 = vmatprep.subr.mxu0 %v5257_v50  ;;  %1885 = vmatprep.subr.mxu1 %v5260_v52 }
 0x664   :  { %1815 = vmatpush1.msra.mxu0 %v5263_v53  ;;  %1886 = vmatpush1.msra.mxu1 %v5266_v55 }
 0x665   :  { %1816 = vmatprep.subr.mxu0 %v5269_v32  ;;  %1887 = vmatprep.subr.mxu1 %v5272_v63  ;;  %v6917_v32 = vld [vmem:[#allocation68_spill] sm:$0xff] }
 0x666   :  { %1817 = vmatpush1.msra.mxu0 %v5275_v1  ;;  %1888 = vmatpush1.msra.mxu1 %v5278_v2  ;;  %v6918_v1 = vld [vmem:[#allocation66_spill] sm:$0xff] }
 0x667   :  { %1818 = vmatprep.subr.mxu0 %v5281_v3  ;;  %1889 = vmatprep.subr.mxu1 %v5284_v4 }
 0x668   :  { %1819 = vmatpush1.msra.mxu0 %v5287_v5  ;;  %1890 = vmatpush1.msra.mxu1 %v5290_v7 }
 0x669   :  { %1820 = vmatprep.subr.mxu0 %v5293_v8  ;;  %1891 = vmatprep.subr.mxu1 %v5296_v9 }
 0x66a   :  { %1821 = vmatpush1.msra.mxu0 %v5299_v10  ;;  %1892 = vmatpush1.msra.mxu1 %v5302_v11 }
 0x66b   :  { %1822 = vmatprep.subr.mxu0 %v5305_v12  ;;  %1893 = vmatprep.subr.mxu1 %v5308_v13 }
 0x66c   :  { %1823 = vmatpush1.msra.mxu0 %v5311_v14  ;;  %1894 = vmatpush1.msra.mxu1 %v6897_v29  ;;  %v2033_v29 = vld [vmem:[#allocation14 + $0x190] sm:$0xff] }
 0x66d   :  { %1824 = vmatprep.subr.mxu0 %v6898_v20  ;;  %1895 = vmatprep.subr.mxu1 %v6899_v60  ;;  %v2028_v20 = vld [vmem:[#allocation14 + $0x168] sm:$0xff]  ;;  %v2030_v60 = vld [vmem:[#allocation14 + $0x178] sm:$0xff] }
 0x66e   :  { %1825 = vmatpush1.msra.mxu0 %v6900_v0  ;;  %1896 = vmatpush1.msra.mxu1 %v6901_v6  ;;  %v2027_v0 = vld [vmem:[#allocation14 + $0x160] sm:$0xff]  ;;  %v2029_v6 = vld [vmem:[#allocation14 + $0x170] sm:$0xff] }
 0x66f   :  { %1826 = vmatprep.subr.mxu0 %v6902_v27  ;;  %1897 = vmatprep.subr.mxu1 %v6903_v25  ;;  %v2024_v27 = vld [vmem:[#allocation14 + $0x148] sm:$0xff]  ;;  %v2026_v25 = vld [vmem:[#allocation14 + $0x158] sm:$0xff] }
 0x670   :  { %1827 = vmatpush1.msra.mxu0 %v6904_v24  ;;  %1898 = vmatpush1.msra.mxu1 %v6905_v23  ;;  %v2023_v24 = vld [vmem:[#allocation14 + $0x140] sm:$0xff]  ;;  %v2025_v23 = vld [vmem:[#allocation14 + $0x150] sm:$0xff] }
 0x671   :  { %1828 = vmatprep.subr.mxu0 %v6906_v34  ;;  %1899 = vmatprep.subr.mxu1 %v6907_v33  ;;  %v2020_v34 = vld [vmem:[#allocation14 + $0x128] sm:$0xff]  ;;  %v2022_v33 = vld [vmem:[#allocation14 + $0x138] sm:$0xff] }
 0x672   :  { %1829 = vmatpush1.msra.mxu0 %v6908_v28  ;;  %1900 = vmatpush1.msra.mxu1 %v6909_v26  ;;  %v2019_v28 = vld [vmem:[#allocation14 + $0x120] sm:$0xff]  ;;  %v2021_v26 = vld [vmem:[#allocation14 + $0x130] sm:$0xff] }
 0x673   :  { %1830 = vmatprep.subr.mxu0 %v6910_v42  ;;  %1901 = vmatprep.subr.mxu1 %v6911_v15  ;;  %v2016_v42 = vld [vmem:[#allocation14 + $0x108] sm:$0xff]  ;;  %v2018_v15 = vld [vmem:[#allocation14 + $0x118] sm:$0xff] }
 0x674   :  { %1831 = vmatpush1.msra.mxu0 %v6912_v58  ;;  %1902 = vmatpush1.msra.mxu1 %v6913_v59  ;;  %v2015_v58 = vld [vmem:[#allocation14 + $0x100] sm:$0xff]  ;;  %v2017_v59 = vld [vmem:[#allocation14 + $0x110] sm:$0xff] }
 0x675   :  { %1864 = vmatprep.mubr.f32.mxu0 %v6914_v61  ;;  %1935 = vmatprep.mubr.f32.mxu1 %v6914_v61 }
 0x676   :  { %2069 = vmatprep.subr.mxu0 %v2044_v62  ;;  %2182 = vmatprep.subr.mxu1 %v2046_v35  ;;  %v2012_v62 = vld [vmem:[#allocation14 + $0xe8] sm:$0xff]  ;;  %v2014_v35 = vld [vmem:[#allocation14 + $0xf8] sm:$0xff] }
 0x715   :  { %v1683_v31 = vpop.f32.mrf.mxu0  ;;  %v1754_v52 = vpop.f32.mrf.mxu1 }
 0x716   :  { %v1759_v46 = vadd.f32 %v1683_v31, %v6915_v19  ;;  %v1761_v2 = vadd.f32 %v1754_v52, %v6918_v1  ;;  %v2011_v31 = vld [vmem:[#allocation14 + $0xe0] sm:$0xff]  ;;  %v2013_v19 = vld [vmem:[#allocation14 + $0xf0] sm:$0xff]  ;;  %v2006_v52 = vld [vmem:[#allocation14 + $0xb8] sm:$0xff] }
 0x717   :  { %v1685_v47 = vpop.f32.mrf.mxu0  ;;  %v1756_v55 = vpop.f32.mrf.mxu1  ;;  %v1999_v1 = vld [vmem:[#allocation14 + $0x80] sm:$0xff] }
 0x718   :  { %v3899_v48 = vmul.f32 -1.442695, %v1759_v46  ;;  %v1760_v50 = vadd.f32 %v1685_v47, %v6916_v49  ;;  %v1762_v63 = vadd.f32 %v1756_v55, %v6917_v32  ;;  %v2008_v46 = vld [vmem:[#allocation14 + $0xc8] sm:$0xff]  ;;  %v2010_v47 = vld [vmem:[#allocation14 + $0xd8] sm:$0xff]  ;;  %v2009_v49 = vld [vmem:[#allocation14 + $0xd0] sm:$0xff] }
 0x719   :  { %v2005_v55 = vld [vmem:[#allocation14 + $0xb0] sm:$0xff]  ;;  %v2000_v32 = vld [vmem:[#allocation14 + $0x88] sm:$0xff] }
 0x71a   :  { %4036 = vpow2.f32 %v3899_v48  ;;  %v3900_v53 = vmul.f32 -1.442695, %v1760_v50  ;;  %v3901_v3 = vmul.f32 -1.442695, %v1762_v63  ;;  %v2007_v48 = vld [vmem:[#allocation14 + $0xc0] sm:$0xff]  ;;  %v2004_v50 = vld [vmem:[#allocation14 + $0xa8] sm:$0xff] }
 0x71b   :  { %v2002_v63 = vld [vmem:[#allocation14 + $0x98] sm:$0xff] }
 0x71c   :  { %4038 = vpow2.f32 %v3900_v53  ;;  %v2003_v53 = vld [vmem:[#allocation14 + $0xa0] sm:$0xff] }
 0x71d   :  { %4040 = vtanh.f32 %v1761_v2  ;;  %v2001_v2 = vld [vmem:[#allocation14 + $0x90] sm:$0xff] }
 0x71e   :  { %4042 = vpow2.f32 %v3901_v3  ;;  %v1996_v3 = vld [vmem:[#allocation14 + $0x68] sm:$0xff] }
 0x727   :  { %v4037_v4 = vpop.eup %4036 }
 0x728   :  { %v1766_v5 = vadd.f32 1.0, %v4037_v4  ;;  %v1998_v4 = vld [vmem:[#allocation14 + $0x78] sm:$0xff] }
 0x729   :  { %v4039_v7 = vpop.eup %4038 }
 0x72a   :  { %4044 = vrcp.f32 %v1766_v5  ;;  %v1772_v8 = vadd.f32 1.0, %v4039_v7  ;;  %v4041_v9 = vpop.eup %4040  ;;  %v1995_v5 = vld [vmem:[#allocation14 + $0x60] sm:$0xff]  ;;  %v1997_v7 = vld [vmem:[#allocation14 + $0x70] sm:$0xff] }
 0x72b   :  { %v4043_v10 = vpop.eup %4042 }
 0x72c   :  { %4046 = vrcp.f32 %v1772_v8  ;;  %v1779_v14 = vadd.f32 1.0, %v4043_v10  ;;  %v1992_v8 = vld [vmem:[#allocation14 + $0x48] sm:$0xff]  ;;  %v1991_v10 = vld [vmem:[#allocation14 + $0x40] sm:$0xff] }
 0x72e   :  { %4048 = vrcp.f32 %v1779_v14  ;;  %v1987_v14 = vld [vmem:[#allocation14 + $0x20] sm:$0xff] }
 0x737   :  { %v4045_v11 = vpop.eup %4044 }
 0x738   :  { %v1784_v12 = vmul.f32 %v4045_v11, %v4041_v9  ;;  %v1994_v9 = vld [vmem:[#allocation14 + $0x58] sm:$0xff]  ;;  %v1993_v11 = vld [vmem:[#allocation14 + $0x50] sm:$0xff] }
 0x739   :  { %v4047_v13 = vpop.eup %4046 }
 0x73a   :  { %v1783_v51 = vmul.f32 %v4047_v13, %v5452_v17  ;;  %v2032_v17 = vld [vmem:[#allocation14 + $0x188] sm:$0xff]  ;;  %v1990_v13 = vld [vmem:[#allocation14 + $0x38] sm:$0xff] }
 0x73b   :  { %v4049_v41 = vpop.eup %4048 }
 0x73c   :  { %v5528_v57 = vadd.f32 %v1784_v12, %v1783_v51  ;;  %v1988_v12 = vld [vmem:[#allocation14 + $0x28] sm:$0xff]  ;;  %v1989_v51 = vld [vmem:[#allocation14 + $0x30] sm:$0xff] }
 0x73e   :  { %4050 = vtanh.f32 %v5528_v57 }
 0x74b   :  { %v4051_v44 = vpop.eup %4050 }
 0x74c   :  { %v5531_v54 = vmul.f32 %v4051_v44, %v4049_v41  ;;  %v1984_v41 = vld [vmem:[#allocation14 + $0x8] sm:$0xff]  ;;  %v1986_v44 = vld [vmem:[#allocation14 + $0x18] sm:$0xff] }
 0x74e   :  { %1865 = vmatmul.mubr.f32.vlgmr.msra.gmra.mxu0 %v5531_v54  ;;  %1936 = vmatmul.mubr.f32.vlgmr.msra.gmra.mxu1 %v5531_v54 }
 0x74f   :  { %2070 = vmatpush1.msra.mxu0 %v2043_v40  ;;  %2183 = vmatpush1.msra.mxu1 %v2045_v45  ;;  %v1983_v40 = vld [vmem:[#allocation14] sm:$0xff]  ;;  %v1985_v45 = vld [vmem:[#allocation14 + $0x10] sm:$0xff] }
 0x750   :  { %2071 = vmatprep.subr.mxu0 %v2040_v36  ;;  %2184 = vmatprep.subr.mxu1 %v2042_v43  ;;  %v6919_v36 = vld [vmem:[#allocation73_spill] sm:$0xff]  ;;  %v6920_v43 = vld [vmem:[#allocation24_spill] sm:$0xff] }
 0x751   :  { %2072 = vmatpush1.msra.mxu0 %v2039_v37  ;;  %2185 = vmatpush1.msra.mxu1 %v2041_v39  ;;  %v6921_v37 = vld [vmem:[#allocation27_spill] sm:$0xff] }
 0x752   :  { %2073 = vmatprep.subr.mxu0 %v2036_v21  ;;  %2186 = vmatprep.subr.mxu1 %v2038_v38  ;;  %v6922_v39 = vld [vmem:[#allocation47_spill] sm:$0xff] }
 0x753   :  { %2074 = vmatpush1.msra.mxu0 %v2035_v22  ;;  %2187 = vmatpush1.msra.mxu1 %v2037_v56  ;;  %v6923_v21 = vld [vmem:[#allocation43_spill] sm:$0xff]  ;;  %v5567_v22 = vld [vmem:[#allocation16 + $0x1f8] sm:$0xff]  ;;  %v5573_v56 = vld [vmem:[#allocation16 + $0x1f0] sm:$0xff] }
 0x754   :  { %2075 = vmatprep.subr.mxu0 %v2032_v17  ;;  %2188 = vmatprep.subr.mxu1 %v2034_v18  ;;  %v5565_v38 = vld [vmem:[#allocation16 + $0x1e8] sm:$0xff]  ;;  %6925 = vst [vmem:[#allocation49_spill] sm:$0xff] %v5567_v22  ;;  %v5579_v17 = vld [vmem:[#allocation16 + $0x1d8] sm:$0xff]  ;;  %v5583_v18 = vld [vmem:[#allocation16 + $0x1c0] sm:$0xff] }
 0x755   :  { %2076 = vmatpush1.msra.mxu0 %v2031_v16  ;;  %2189 = vmatpush1.msra.mxu1 %v2033_v29  ;;  %6924 = vst [vmem:[#allocation44_spill] sm:$0xff] %v5565_v38  ;;  %v5585_v16 = vld [vmem:[#allocation16 + $0x1d0] sm:$0xff]  ;;  %v5589_v29 = vld [vmem:[#allocation16 + $0x1a8] sm:$0xff] }
 0x756   :  { %2077 = vmatprep.subr.mxu0 %v2028_v20  ;;  %2190 = vmatprep.subr.mxu1 %v2030_v60  ;;  %v5591_v20 = vld [vmem:[#allocation16 + $0x1b8] sm:$0xff]  ;;  %v5595_v60 = vld [vmem:[#allocation16 + $0x1a0] sm:$0xff] }
 0x757   :  { %2078 = vmatpush1.msra.mxu0 %v2027_v0  ;;  %2191 = vmatpush1.msra.mxu1 %v2029_v6  ;;  %v5597_v0 = vld [vmem:[#allocation16 + $0x1b0] sm:$0xff]  ;;  %v5601_v6 = vld [vmem:[#allocation16 + $0x188] sm:$0xff] }
 0x758   :  { %2079 = vmatprep.subr.mxu0 %v2024_v27  ;;  %2192 = vmatprep.subr.mxu1 %v2026_v25  ;;  %v5603_v27 = vld [vmem:[#allocation16 + $0x198] sm:$0xff]  ;;  %v5607_v25 = vld [vmem:[#allocation16 + $0x180] sm:$0xff] }
 0x759   :  { %2080 = vmatpush1.msra.mxu0 %v2023_v24  ;;  %2193 = vmatpush1.msra.mxu1 %v2025_v23  ;;  %v5609_v24 = vld [vmem:[#allocation16 + $0x190] sm:$0xff]  ;;  %v5613_v23 = vld [vmem:[#allocation16 + $0x168] sm:$0xff] }
 0x75a   :  { %2081 = vmatprep.subr.mxu0 %v2020_v34  ;;  %2194 = vmatprep.subr.mxu1 %v2022_v33  ;;  %v5615_v34 = vld [vmem:[#allocation16 + $0x178] sm:$0xff]  ;;  %v5619_v33 = vld [vmem:[#allocation16 + $0x160] sm:$0xff] }
 0x75b   :  { %2082 = vmatpush1.msra.mxu0 %v2019_v28  ;;  %2195 = vmatpush1.msra.mxu1 %v2021_v26  ;;  %v5621_v28 = vld [vmem:[#allocation16 + $0x170] sm:$0xff]  ;;  %v5625_v26 = vld [vmem:[#allocation16 + $0x148] sm:$0xff] }
 0x75c   :  { %2083 = vmatprep.subr.mxu0 %v2016_v42  ;;  %2196 = vmatprep.subr.mxu1 %v2018_v15  ;;  %v5627_v42 = vld [vmem:[#allocation16 + $0x158] sm:$0xff]  ;;  %v5631_v15 = vld [vmem:[#allocation16 + $0x140] sm:$0xff] }
 0x75d   :  { %2084 = vmatpush1.msra.mxu0 %v2015_v58  ;;  %2197 = vmatpush1.msra.mxu1 %v2017_v59  ;;  %v5633_v58 = vld [vmem:[#allocation16 + $0x150] sm:$0xff]  ;;  %v5637_v59 = vld [vmem:[#allocation16 + $0x128] sm:$0xff] }
 0x75e   :  { %2085 = vmatprep.subr.mxu0 %v2012_v62  ;;  %2198 = vmatprep.subr.mxu1 %v2014_v35  ;;  %v5639_v62 = vld [vmem:[#allocation16 + $0x138] sm:$0xff]  ;;  %v5643_v35 = vld [vmem:[#allocation16 + $0x120] sm:$0xff] }
 0x75f   :  { %2086 = vmatpush1.msra.mxu0 %v2011_v31  ;;  %2199 = vmatpush1.msra.mxu1 %v2013_v19  ;;  %v5645_v31 = vld [vmem:[#allocation16 + $0x130] sm:$0xff]  ;;  %v5649_v19 = vld [vmem:[#allocation16 + $0x108] sm:$0xff] }
 0x760   :  { %2087 = vmatprep.subr.mxu0 %v2008_v46  ;;  %2200 = vmatprep.subr.mxu1 %v2010_v47  ;;  %v5651_v46 = vld [vmem:[#allocation16 + $0x118] sm:$0xff]  ;;  %v5655_v47 = vld [vmem:[#allocation16 + $0x100] sm:$0xff] }
 0x761   :  { %2088 = vmatpush1.msra.mxu0 %v2007_v48  ;;  %2201 = vmatpush1.msra.mxu1 %v2009_v49  ;;  %v5657_v48 = vld [vmem:[#allocation16 + $0x110] sm:$0xff]  ;;  %v5661_v49 = vld [vmem:[#allocation16 + $0xe8] sm:$0xff] }
 0x762   :  { %2089 = vmatprep.subr.mxu0 %v2004_v50  ;;  %2202 = vmatprep.subr.mxu1 %v2006_v52  ;;  %v5663_v50 = vld [vmem:[#allocation16 + $0xf8] sm:$0xff]  ;;  %v5667_v52 = vld [vmem:[#allocation16 + $0xe0] sm:$0xff] }
 0x763   :  { %2090 = vmatpush1.msra.mxu0 %v2003_v53  ;;  %2203 = vmatpush1.msra.mxu1 %v2005_v55  ;;  %v5669_v53 = vld [vmem:[#allocation16 + $0xf0] sm:$0xff]  ;;  %v5673_v55 = vld [vmem:[#allocation16 + $0xc8] sm:$0xff] }
 0x764   :  { %2091 = vmatprep.subr.mxu0 %v2000_v32  ;;  %2204 = vmatprep.subr.mxu1 %v2002_v63  ;;  %v5675_v32 = vld [vmem:[#allocation16 + $0xd8] sm:$0xff]  ;;  %v5679_v63 = vld [vmem:[#allocation16 + $0xc0] sm:$0xff] }
 0x765   :  { %2092 = vmatpush1.msra.mxu0 %v1999_v1  ;;  %2205 = vmatpush1.msra.mxu1 %v2001_v2  ;;  %v5681_v1 = vld [vmem:[#allocation16 + $0xd0] sm:$0xff]  ;;  %v5685_v2 = vld [vmem:[#allocation16 + $0xa8] sm:$0xff] }
 0x766   :  { %2093 = vmatprep.subr.mxu0 %v1996_v3  ;;  %2206 = vmatprep.subr.mxu1 %v1998_v4  ;;  %v5687_v3 = vld [vmem:[#allocation16 + $0xb8] sm:$0xff]  ;;  %v5691_v4 = vld [vmem:[#allocation16 + $0xa0] sm:$0xff] }
 0x767   :  { %2094 = vmatpush1.msra.mxu0 %v1995_v5  ;;  %2207 = vmatpush1.msra.mxu1 %v1997_v7  ;;  %v5693_v5 = vld [vmem:[#allocation16 + $0xb0] sm:$0xff]  ;;  %v5697_v7 = vld [vmem:[#allocation16 + $0x88] sm:$0xff] }
 0x768   :  { %2095 = vmatprep.subr.mxu0 %v1992_v8  ;;  %2208 = vmatprep.subr.mxu1 %v1994_v9  ;;  %6926 = vst [vmem:[#allocation51_spill] sm:$0xff] %v5693_v5  ;;  %6927 = vst [vmem:[#allocation52_spill] sm:$0xff] %v5697_v7  ;;  %v5699_v8 = vld [vmem:[#allocation16 + $0x98] sm:$0xff]  ;;  %v5703_v9 = vld [vmem:[#allocation16 + $0x80] sm:$0xff] }
 0x769   :  { %2096 = vmatpush1.msra.mxu0 %v1991_v10  ;;  %2209 = vmatpush1.msra.mxu1 %v1993_v11  ;;  %6928 = vst [vmem:[#allocation50_spill] sm:$0xff] %v5699_v8  ;;  %6929 = vst [vmem:[#allocation53_spill] sm:$0xff] %v5703_v9  ;;  %v5705_v10 = vld [vmem:[#allocation16 + $0x90] sm:$0xff]  ;;  %v5709_v11 = vld [vmem:[#allocation16 + $0x68] sm:$0xff] }
 0x76a   :  { %2097 = vmatprep.subr.mxu0 %v1988_v12  ;;  %2210 = vmatprep.subr.mxu1 %v1990_v13  ;;  %6930 = vst [vmem:[#allocation55_spill] sm:$0xff] %v5705_v10  ;;  %6931 = vst [vmem:[#allocation56_spill] sm:$0xff] %v5709_v11  ;;  %v5711_v12 = vld [vmem:[#allocation16 + $0x78] sm:$0xff]  ;;  %v5715_v13 = vld [vmem:[#allocation16 + $0x60] sm:$0xff] }
 0x76b   :  { %2098 = vmatpush1.msra.mxu0 %v1987_v14  ;;  %2211 = vmatpush1.msra.mxu1 %v1989_v51  ;;  %6932 = vst [vmem:[#allocation54_spill] sm:$0xff] %v5711_v12  ;;  %6933 = vst [vmem:[#allocation22_spill] sm:$0xff] %v5715_v13  ;;  %v5717_v14 = vld [vmem:[#allocation16 + $0x70] sm:$0xff]  ;;  %v5721_v51 = vld [vmem:[#allocation16 + $0x48] sm:$0xff] }
 0x76c   :  { %2099 = vmatprep.subr.mxu0 %v1984_v41  ;;  %2212 = vmatprep.subr.mxu1 %v1986_v44  ;;  %6934 = vst [vmem:[#allocation23_spill] sm:$0xff] %v5717_v14  ;;  %6935 = vst [vmem:[#allocation57_spill] sm:$0xff] %v5721_v51  ;;  %v5723_v41 = vld [vmem:[#allocation16 + $0x58] sm:$0xff]  ;;  %v5727_v44 = vld [vmem:[#allocation16 + $0x40] sm:$0xff] }
 0x76d   :  { %2100 = vmatpush1.msra.mxu0 %v1983_v40  ;;  %2133 = vmatprep.mubr.f32.mxu0 %v6914_v61  ;;  %6936 = vst [vmem:[#allocation59_spill] sm:$0xff] %v5723_v41  ;;  %6937 = vst [vmem:[#allocation60_spill] sm:$0xff] %v5727_v44  ;;  %v5729_v40 = vld [vmem:[#allocation16 + $0x50] sm:$0xff] }
 0x76e   :  { %2213 = vmatpush1.msra.mxu1 %v1985_v45  ;;  %2246 = vmatprep.mubr.f32.mxu1 %v6914_v61  ;;  %6938 = vst [vmem:[#allocation58_spill] sm:$0xff] %v5729_v40  ;;  %v5733_v45 = vld [vmem:[#allocation16 + $0x28] sm:$0xff] }
 0x76f   :  { %2134 = vmatmul.mubr.f32.vlgmr.msra.gmra.mxu0 %v6919_v36  ;;  %2247 = vmatmul.mubr.f32.vlgmr.msra.gmra.mxu1 %v6919_v36  ;;  %6939 = vst [vmem:[#allocation25_spill] sm:$0xff] %v5733_v45  ;;  %v5735_v36 = vld [vmem:[#allocation16 + $0x38] sm:$0xff] }
 0x770   :  { %2139 = vmatprep.mubr.f32.mxu0 %v6914_v61  ;;  %2252 = vmatprep.mubr.f32.mxu1 %v6914_v61  ;;  %6940 = vst [vmem:[#allocation26_spill] sm:$0xff] %v5735_v36 }
 0x771   :  { %2396 = vmatprep.subr.mxu0 %v5565_v38  ;;  %2467 = vmatprep.subr.mxu1 %v5567_v22 }
 0x772   :  { %2468 = vmatpush1.msra.mxu1 %v5573_v56 }
 0x773   :  { %2140 = vmatmul.mubr.f32.gmra.mxu0 %v6920_v43  ;;  %2253 = vmatmul.mubr.f32.gmra.mxu1 %v6920_v43  ;;  %v5739_v43 = vld [vmem:[#allocation16 + $0x20] sm:$0xff] }
 0x774   :  { %2145 = vmatprep.mubr.f32.mxu0 %v6914_v61  ;;  %2258 = vmatprep.mubr.f32.mxu1 %v6914_v61  ;;  %6941 = vst [vmem:[#allocation61_spill] sm:$0xff] %v5739_v43 }
 0x775   :  { %2469 = vmatprep.subr.mxu1 %v5579_v17 }
 0x776   :  { %2470 = vmatpush1.msra.mxu1 %v5585_v16 }
 0x777   :  { %2146 = vmatmul.mubr.f32.gmra.mxu0 %v6921_v37  ;;  %2259 = vmatmul.mubr.f32.gmra.mxu1 %v6921_v37  ;;  %v5741_v37 = vld [vmem:[#allocation16 + $0x30] sm:$0xff] }
 0x778   :  { %2151 = vmatprep.mubr.f32.mxu0 %v6914_v61  ;;  %2264 = vmatprep.mubr.f32.mxu1 %v6914_v61  ;;  %6942 = vst [vmem:[#allocation63_spill] sm:$0xff] %v5741_v37 }
 0x779   :  { %2471 = vmatprep.subr.mxu1 %v5591_v20 }
 0x77a   :  { %2472 = vmatpush1.msra.mxu1 %v5597_v0 }
 0x77b   :  { %2152 = vmatmul.mubr.f32.gmra.mxu0 %v6922_v39  ;;  %2265 = vmatmul.mubr.f32.gmra.mxu1 %v6922_v39  ;;  %v5745_v39 = vld [vmem:[#allocation16 + $0x8] sm:$0xff] }
 0x77c   :  { %2157 = vmatprep.mubr.f32.mxu0 %v6914_v61  ;;  %2270 = vmatprep.mubr.f32.mxu1 %v6914_v61  ;;  %6943 = vst [vmem:[#allocation64_spill] sm:$0xff] %v5745_v39 }
 0x77d   :  { %2473 = vmatprep.subr.mxu1 %v5603_v27 }
 0x77e   :  { %2474 = vmatpush1.msra.mxu1 %v5609_v24 }
 0x77f   :  { %2158 = vmatmul.mubr.f32.gmra.mxu0 %v6923_v21  ;;  %2271 = vmatmul.mubr.f32.gmra.mxu1 %v6923_v21  ;;  %v5747_v21 = vld [vmem:[#allocation16 + $0x18] sm:$0xff] }
 0x780   :  { %2163 = vmatprep.mubr.f32.mxu0 %v6914_v61  ;;  %2276 = vmatprep.mubr.f32.mxu1 %v6914_v61  ;;  %6944 = vst [vmem:[#allocation62_spill] sm:$0xff] %v5747_v21 }
 0x781   :  { %2475 = vmatprep.subr.mxu1 %v5615_v34 }
 0x782   :  { %2476 = vmatpush1.msra.mxu1 %v5621_v28 }
 0x783   :  { %2164 = vmatmul.mubr.f32.gmra.mxu0 %v5455_v30  ;;  %2277 = vmatmul.mubr.f32.gmra.mxu1 %v5455_v30  ;;  %v5571_v30 = vld [vmem:[#allocation16 + $0x1e0] sm:$0xff] }
 0x784   :  { %2169 = vmatprep.mubr.f32.mxu0 %v6914_v61  ;;  %2282 = vmatprep.mubr.f32.mxu1 %v6914_v61 }
 0x785   :  { %2397 = vmatpush1.msra.mxu0 %v5571_v30  ;;  %2477 = vmatprep.subr.mxu1 %v5627_v42 }
 0x786   :  { %2478 = vmatpush1.msra.mxu1 %v5633_v58 }
 0x787   :  { %2170 = vmatmul.mubr.f32.gmra.mxu0 %v5531_v54  ;;  %2283 = vmatmul.mubr.f32.gmra.mxu1 %v5531_v54  ;;  %v5577_v54 = vld [vmem:[#allocation16 + $0x1c8] sm:$0xff] }
 0x788   :  { %2175 = vmatprep.mubr.f32.mxu0 %v6914_v61  ;;  %2288 = vmatprep.mubr.f32.mxu1 %v6914_v61 }
 0x789   :  { %2398 = vmatprep.subr.mxu0 %v5577_v54  ;;  %2479 = vmatprep.subr.mxu1 %v5639_v62 }
 0x78a   :  { %2399 = vmatpush1.msra.mxu0 %v5583_v18  ;;  %2480 = vmatpush1.msra.mxu1 %v5645_v31 }
 0x78b   :  { %2400 = vmatprep.subr.mxu0 %v5589_v29  ;;  %2481 = vmatprep.subr.mxu1 %v5651_v46 }
 0x78c   :  { %2401 = vmatpush1.msra.mxu0 %v5595_v60  ;;  %2482 = vmatpush1.msra.mxu1 %v5657_v48 }
 0x78d   :  { %2402 = vmatprep.subr.mxu0 %v5601_v6  ;;  %2483 = vmatprep.subr.mxu1 %v5663_v50 }
 0x78e   :  { %2403 = vmatpush1.msra.mxu0 %v5607_v25  ;;  %2484 = vmatpush1.msra.mxu1 %v5669_v53 }
 0x78f   :  { %2404 = vmatprep.subr.mxu0 %v5613_v23  ;;  %2485 = vmatprep.subr.mxu1 %v5675_v32 }
 0x790   :  { %2405 = vmatpush1.msra.mxu0 %v5619_v33  ;;  %2486 = vmatpush1.msra.mxu1 %v5681_v1 }
 0x791   :  { %2406 = vmatprep.subr.mxu0 %v5625_v26  ;;  %2487 = vmatprep.subr.mxu1 %v5687_v3 }
 0x792   :  { %2407 = vmatpush1.msra.mxu0 %v5631_v15  ;;  %2488 = vmatpush1.msra.mxu1 %v5693_v5 }
 0x793   :  { %2408 = vmatprep.subr.mxu0 %v5637_v59  ;;  %2489 = vmatprep.subr.mxu1 %v5699_v8 }
 0x794   :  { %2409 = vmatpush1.msra.mxu0 %v5643_v35  ;;  %2490 = vmatpush1.msra.mxu1 %v5705_v10 }
 0x795   :  { %2410 = vmatprep.subr.mxu0 %v5649_v19  ;;  %2491 = vmatprep.subr.mxu1 %v5711_v12  ;;  %v6949_v12 = vld [vmem:[#allocation72_spill] sm:$0xff] }
 0x796   :  { %2411 = vmatpush1.msra.mxu0 %v5655_v47  ;;  %2492 = vmatpush1.msra.mxu1 %v5717_v14 }
 0x797   :  { %2412 = vmatprep.subr.mxu0 %v5661_v49  ;;  %2493 = vmatprep.subr.mxu1 %v5723_v41 }
 0x798   :  { %2413 = vmatpush1.msra.mxu0 %v5667_v52  ;;  %2494 = vmatpush1.msra.mxu1 %v5729_v40  ;;  %v5749_v40 = vld [vmem:[#allocation16] sm:$0xff] }
 0x799   :  { %2414 = vmatprep.subr.mxu0 %v5673_v55  ;;  %2495 = vmatprep.subr.mxu1 %v5735_v36  ;;  %6945 = vst [vmem:[#allocation48_spill] sm:$0xff] %v5749_v40 }
 0x79a   :  { %2415 = vmatpush1.msra.mxu0 %v5679_v63  ;;  %2496 = vmatpush1.msra.mxu1 %v5741_v37 }
 0x79b   :  { %2416 = vmatprep.subr.mxu0 %v5685_v2  ;;  %2497 = vmatprep.subr.mxu1 %v5747_v21 }
 0x79c   :  { %2417 = vmatpush1.msra.mxu0 %v5691_v4 }
 0x79d   :  { %2418 = vmatprep.subr.mxu0 %v5697_v7 }
 0x79e   :  { %2419 = vmatpush1.msra.mxu0 %v5703_v9 }
 0x79f   :  { %2420 = vmatprep.subr.mxu0 %v5709_v11  ;;  %v6950_v11 = vld [vmem:[#allocation70_spill] sm:$0xff] }
 0x7a0   :  { %2421 = vmatpush1.msra.mxu0 %v5715_v13 }
 0x7a1   :  { %2422 = vmatprep.subr.mxu0 %v5721_v51  ;;  %v6948_v51 = vld [vmem:[#allocation71_spill] sm:$0xff] }
 0x7a2   :  { %2423 = vmatpush1.msra.mxu0 %v5727_v44 }
 0x7a3   :  { %2424 = vmatprep.subr.mxu0 %v5733_v45  ;;  %v5753_v45 = vld [vmem:[#allocation16 + $0x10] sm:$0xff] }
 0x7a4   :  { %2425 = vmatpush1.msra.mxu0 %v5739_v43  ;;  %6946 = vst [vmem:[#allocation46_spill] sm:$0xff] %v5753_v45  ;;  %2498 = vmatpush1.msra.mxu1 %v5753_v45  ;;  %v6947_v43 = vld [vmem:[#allocation69_spill] sm:$0xff] }
 0x7a5   :  { %2426 = vmatprep.subr.mxu0 %v5745_v39  ;;  %2646 = vmatprep.subr.mxu1 %v5567_v22 }
 0x7a6   :  { %2427 = vmatpush1.msra.mxu0 %v5749_v40 }
 0x7a7   :  { %2575 = vmatprep.subr.mxu0 %v5565_v38 }
 0x80e   :  { %v1866_v37 = vpop.f32.mrf.mxu0  ;;  %v1937_v39 = vpop.f32.mrf.mxu1 }
 0x80f   :  { %v1942_v36 = vadd.f32 %v1866_v37, %v6947_v43  ;;  %v1944_v45 = vadd.f32 %v1937_v39, %v6950_v11  ;;  %v6957_v39 = vld [vmem:[#allocation57_spill] sm:$0xff] }
 0x810   :  { %v1868_v44 = vpop.f32.mrf.mxu0  ;;  %v1939_v13 = vpop.f32.mrf.mxu1 }
 0x811   :  { %v3902_v41 = vmul.f32 -1.442695, %v1942_v36  ;;  %v1943_v14 = vadd.f32 %v1868_v44, %v6948_v51  ;;  %v1945_v40 = vadd.f32 %v1939_v13, %v6949_v12 }
 0x813   :  { %4052 = vpow2.f32 %v3902_v41  ;;  %v3903_v21 = vmul.f32 -1.442695, %v1943_v14  ;;  %v3904_v10 = vmul.f32 -1.442695, %v1945_v40  ;;  %v6955_v40 = vld [vmem:[#allocation22_spill] sm:$0xff] }
 0x815   :  { %4054 = vpow2.f32 %v3903_v21 }
 0x816   :  { %4056 = vtanh.f32 %v1944_v45  ;;  %v6956_v45 = vld [vmem:[#allocation23_spill] sm:$0xff] }
 0x817   :  { %4058 = vpow2.f32 %v3904_v10  ;;  %v6954_v10 = vld [vmem:[#allocation54_spill] sm:$0xff] }
 0x820   :  { %v4053_v38 = vpop.eup %4052 }
 0x821   :  { %v1949_v9 = vadd.f32 1.0, %v4053_v38 }
 0x822   :  { %v4055_v22 = vpop.eup %4054 }
 0x823   :  { %4060 = vrcp.f32 %v1949_v9  ;;  %v1955_v43 = vadd.f32 1.0, %v4055_v22  ;;  %v4057_v36 = vpop.eup %4056  ;;  %v6952_v22 = vld [vmem:[#allocation55_spill] sm:$0xff]  ;;  %v6953_v9 = vld [vmem:[#allocation56_spill] sm:$0xff] }
 0x824   :  { %v4059_v51 = vpop.eup %4058 }
 0x825   :  { %4062 = vrcp.f32 %v1955_v43  ;;  %v1962_v37 = vadd.f32 1.0, %v4059_v51  ;;  %v6958_v43 = vld [vmem:[#allocation59_spill] sm:$0xff]  ;;  %v6960_v51 = vld [vmem:[#allocation58_spill] sm:$0xff] }
 0x827   :  { %4064 = vrcp.f32 %v1962_v37  ;;  %v6964_v37 = vld [vmem:[#allocation63_spill] sm:$0xff] }
 0x830   :  { %v4061_v41 = vpop.eup %4060 }
 0x831   :  { %v1967_v44 = vmul.f32 %v4061_v41, %v4057_v36  ;;  %v6959_v36 = vld [vmem:[#allocation60_spill] sm:$0xff]  ;;  %v6961_v41 = vld [vmem:[#allocation25_spill] sm:$0xff] }
 0x832   :  { %v4063_v14 = vpop.eup %4062 }
 0x833   :  { %v1966_v21 = vmul.f32 %v4063_v14, %v5528_v57  ;;  %v6951_v57 = vld [vmem:[#allocation53_spill] sm:$0xff] }
 0x834   :  { %v4065_v11 = vpop.eup %4064  ;;  %v6963_v14 = vld [vmem:[#allocation61_spill] sm:$0xff] }
 0x835   :  { %v1968_v12 = vadd.f32 %v1967_v44, %v1966_v21  ;;  %v6962_v44 = vld [vmem:[#allocation26_spill] sm:$0xff]  ;;  %v6965_v21 = vld [vmem:[#allocation64_spill] sm:$0xff] }
 0x837   :  { %4066 = vtanh.f32 %v1968_v12  ;;  %v6966_v12 = vld [vmem:[#allocation62_spill] sm:$0xff] }
 0x844   :  { %v4067_v13 = vpop.eup %4066 }
 0x845   :  { %v1970_v38 = vmul.f32 %v4067_v13, %v4065_v11  ;;  %v6967_v11 = vld [vmem:[#allocation48_spill] sm:$0xff]  ;;  %v6968_v13 = vld [vmem:[#allocation46_spill] sm:$0xff] }
 0x847   :  { %2176 = vmatmul.mubr.f32.gmra.mxu0 %v1970_v38  ;;  %2289 = vmatmul.mubr.f32.gmra.mxu1 %v1970_v38  ;;  %v6969_v38 = vld [vmem:[#allocation44_spill] sm:$0xff] }
 0x848   :  { %2460 = vmatprep.mubr.f32.mxu0 %v6914_v61  ;;  %2531 = vmatprep.mubr.f32.mxu1 %v6914_v61 }
 0x84b   :  { %2461 = vmatmul.mubr.f32.vlgmr.msra.gmra.mxu0 %v6914_v61  ;;  %2532 = vmatmul.mubr.f32.vlgmr.msra.gmra.mxu1 %v6914_v61 }
 0x84c   :  { %2576 = vmatpush1.msra.mxu0 %v5571_v30  ;;  %2647 = vmatpush1.msra.mxu1 %v5573_v56 }
 0x84d   :  { %2577 = vmatprep.subr.mxu0 %v5577_v54  ;;  %2648 = vmatprep.subr.mxu1 %v5579_v17 }
 0x84e   :  { %2578 = vmatpush1.msra.mxu0 %v5583_v18  ;;  %2649 = vmatpush1.msra.mxu1 %v5585_v16 }
 0x84f   :  { %2579 = vmatprep.subr.mxu0 %v5589_v29  ;;  %2650 = vmatprep.subr.mxu1 %v5591_v20 }
 0x850   :  { %2580 = vmatpush1.msra.mxu0 %v5595_v60  ;;  %2651 = vmatpush1.msra.mxu1 %v5597_v0 }
 0x851   :  { %2581 = vmatprep.subr.mxu0 %v5601_v6  ;;  %2652 = vmatprep.subr.mxu1 %v5603_v27 }
 0x852   :  { %2582 = vmatpush1.msra.mxu0 %v5607_v25  ;;  %2653 = vmatpush1.msra.mxu1 %v5609_v24 }
 0x853   :  { %2583 = vmatprep.subr.mxu0 %v5613_v23  ;;  %2654 = vmatprep.subr.mxu1 %v5615_v34 }
 0x854   :  { %2584 = vmatpush1.msra.mxu0 %v5619_v33  ;;  %2655 = vmatpush1.msra.mxu1 %v5621_v28 }
 0x855   :  { %2585 = vmatprep.subr.mxu0 %v5625_v26  ;;  %2656 = vmatprep.subr.mxu1 %v5627_v42 }
 0x856   :  { %2586 = vmatpush1.msra.mxu0 %v5631_v15  ;;  %2657 = vmatpush1.msra.mxu1 %v5633_v58 }
 0x857   :  { %2587 = vmatprep.subr.mxu0 %v5637_v59  ;;  %2658 = vmatprep.subr.mxu1 %v5639_v62 }
 0x858   :  { %2588 = vmatpush1.msra.mxu0 %v5643_v35  ;;  %2659 = vmatpush1.msra.mxu1 %v5645_v31 }
 0x859   :  { %2589 = vmatprep.subr.mxu0 %v5649_v19  ;;  %2660 = vmatprep.subr.mxu1 %v5651_v46 }
 0x85a   :  { %2590 = vmatpush1.msra.mxu0 %v5655_v47  ;;  %2661 = vmatpush1.msra.mxu1 %v5657_v48 }
 0x85b   :  { %2591 = vmatprep.subr.mxu0 %v5661_v49  ;;  %2662 = vmatprep.subr.mxu1 %v5663_v50 }
 0x85c   :  { %2592 = vmatpush1.msra.mxu0 %v5667_v52  ;;  %2663 = vmatpush1.msra.mxu1 %v5669_v53 }
 0x85d   :  { %2593 = vmatprep.subr.mxu0 %v5673_v55  ;;  %2664 = vmatprep.subr.mxu1 %v5675_v32 }
 0x85e   :  { %2594 = vmatpush1.msra.mxu0 %v5679_v63  ;;  %2665 = vmatpush1.msra.mxu1 %v5681_v1 }
 0x85f   :  { %2595 = vmatprep.subr.mxu0 %v5685_v2  ;;  %2666 = vmatprep.subr.mxu1 %v5687_v3 }
 0x860   :  { %2596 = vmatpush1.msra.mxu0 %v5691_v4  ;;  %2667 = vmatpush1.msra.mxu1 %v5693_v5 }
 0x861   :  { %2597 = vmatprep.subr.mxu0 %v5697_v7  ;;  %2668 = vmatprep.subr.mxu1 %v5699_v8 }
 0x862   :  { %2598 = vmatpush1.msra.mxu0 %v6951_v57  ;;  %2669 = vmatpush1.msra.mxu1 %v6952_v22 }
 0x863   :  { %2599 = vmatprep.subr.mxu0 %v6953_v9  ;;  %2670 = vmatprep.subr.mxu1 %v6954_v10 }
 0x864   :  { %2600 = vmatpush1.msra.mxu0 %v6955_v40  ;;  %2671 = vmatpush1.msra.mxu1 %v6956_v45 }
 0x865   :  { %2601 = vmatprep.subr.mxu0 %v6957_v39  ;;  %2672 = vmatprep.subr.mxu1 %v6958_v43 }
 0x866   :  { %2602 = vmatpush1.msra.mxu0 %v6959_v36  ;;  %2673 = vmatpush1.msra.mxu1 %v6960_v51 }
 0x867   :  { %2603 = vmatprep.subr.mxu0 %v6961_v41  ;;  %2674 = vmatprep.subr.mxu1 %v6962_v44  ;;  %v6970_v41 = vld [vmem:[#allocation49_spill] sm:$0xff]  ;;  %v2135_v44 = vpop.f32.mrf.mxu0 }
 0x868   :  { %2604 = vmatpush1.msra.mxu0 %v6963_v14  ;;  %2675 = vmatpush1.msra.mxu1 %v6964_v37  ;;  %v2248_v14 = vpop.f32.mrf.mxu1 }
 0x869   :  { %2605 = vmatprep.subr.mxu0 %v6965_v21  ;;  %2676 = vmatprep.subr.mxu1 %v6966_v12  ;;  %v2137_v51 = vpop.f32.mrf.mxu0 }
 0x86a   :  { %2606 = vmatpush1.msra.mxu0 %v6967_v11  ;;  %2639 = vmatprep.mubr.f32.mxu0 %v6914_v61  ;;  %v2250_v37 = vpop.f32.mrf.mxu1 }
 0x86b   :  { %2677 = vmatpush1.msra.mxu1 %v6968_v13  ;;  %2710 = vmatprep.mubr.f32.mxu1 %v6914_v61  ;;  %v5834_v36 = vpop.f32.mrf.mxu0 }
 0x86c   :  { %2754 = vmatprep.subr.mxu0 %v6969_v38  ;;  %2825 = vmatprep.subr.mxu1 %v6970_v41  ;;  %6971 = vst [vmem:[#allocation28_spill] sm:$0xff] %v5834_v36  ;;  %v5836_v21 = vpop.f32.mrf.mxu1 }
 0x86d   :  { %6972 = vst [vmem:[#allocation29_spill] sm:$0xff] %v5836_v21  ;;  %v5838_v12 = vpop.f32.mrf.mxu0 }
 0x86e   :  { %6973 = vst [vmem:[#allocation30_spill] sm:$0xff] %v5838_v12  ;;  %v5840_v11 = vpop.f32.mrf.mxu1 }
 0x86f   :  { %6974 = vst [vmem:[#allocation31_spill] sm:$0xff] %v5840_v11  ;;  %v5842_v43 = vpop.f32.mrf.mxu0 }
 0x870   :  { %6975 = vst [vmem:[#allocation32_spill] sm:$0xff] %v5842_v43  ;;  %v5844_v13 = vpop.f32.mrf.mxu1 }
 0x871   :  { %6976 = vst [vmem:[#allocation33_spill] sm:$0xff] %v5844_v13  ;;  %v5846_v61 = vpop.f32.mrf.mxu0 }
 0x872   :  { %6977 = vst [vmem:[#allocation34_spill] sm:$0xff] %v5846_v61  ;;  %v5848_v38 = vpop.f32.mrf.mxu1 }
 0x873   :  { %6978 = vst [vmem:[#allocation35_spill] sm:$0xff] %v5848_v38  ;;  %v5850_v41 = vpop.f32.mrf.mxu0 }
 0x874   :  { %6979 = vst [vmem:[#allocation36_spill] sm:$0xff] %v5850_v41  ;;  %v5852_v39 = vpop.f32.mrf.mxu1 }
 0x875   :  { %6980 = vst [vmem:[#allocation37_spill] sm:$0xff] %v5852_v39  ;;  %v5854_v45 = vpop.f32.mrf.mxu0 }
 0x876   :  { %6981 = vst [vmem:[#allocation38_spill] sm:$0xff] %v5854_v45  ;;  %v5856_v36 = vpop.f32.mrf.mxu1 }
 0x877   :  { %6982 = vst [vmem:[#allocation39_spill] sm:$0xff] %v5856_v36  ;;  %v5858_v21 = vpop.f32.mrf.mxu0 }
 0x878   :  { %6983 = vst [vmem:[#allocation40_spill] sm:$0xff] %v5858_v21  ;;  %v5860_v12 = vpop.f32.mrf.mxu1 }
 0x879   :  { %6984 = vst [vmem:[#allocation41_spill] sm:$0xff] %v5860_v12  ;;  %v5862_v11 = vpop.f32.mrf.mxu0  ;;  %v2047_v12 = vld [vmem:[%s6527_s6] sm:$0xf]  ;;  %s4462_s6 = smov [#allocation17]  }
 0x87a   :  { %6985 = vst [vmem:[#allocation42_spill] sm:$0xff] %v5862_v11  ;;  %v5864_v43 = vpop.f32.mrf.mxu1  ;;  %v6994_v11 = vld [vmem:[#allocation45_spill] sm:$0xff]  ;;  %s3844_s28 = sshll.u32 %s4462_s6, 4  ;;  %s3845_s28 = int_to_ptr.vmem [resolvable:$true] %s3844_s28 }
 0x87b   :  { %6986 = vst [vmem:[#allocation65_spill] sm:$0xff] %v5864_v43  ;;  %v5866_v13 = vpop.f32.mrf.mxu0  ;;  %v6995_v43 = vsub.s32 0, %v6994_v11  ;;  %s4424_s29 = scalar_lea.vmem %s3845_s28, 1024  ;;  %p4429_p12 = scmp.lt.s32.totalorder %s3845_s28, %s3845_s28 }
 0x87c   :  { %6987 = vst [vmem:[#allocation67_spill] sm:$0xff] %v5866_v13  ;;  %v5868_v61 = vpop.f32.mrf.mxu1  ;;  %p4425_p11 = scmp.ne.s32.totalorder %s3845_s28, %s4424_s29  ;;  %p4430_p13 = scmp.lt.s32.totalorder %s4424_s29, %s4424_s29 }
 0x87d   :  { %6988 = vst [vmem:[#allocation68_spill] sm:$0xff] %v5868_v61  ;;  %v5870_v38 = vpop.f32.mrf.mxu0  ;;  %v5885_v36 = vrot.slane %v2047_v12, %v6995_v43 }
 0x87e   :  { %6989 = vst [vmem:[#allocation66_spill] sm:$0xff] %v5870_v38  ;;  %v5872_v41 = vpop.f32.mrf.mxu1  ;;  %p4431_p0 = por %p4430_p13, %p4429_p12 }
 0x87f   :  { %6990 = vst [vmem:[#allocation73_spill] sm:$0xff] %v5872_v41  ;;  %v5874_v39 = vpop.f32.mrf.mxu0  ;;  %6996 = vst [vmem:[#allocation43_spill] sm:$0xff] %v5885_v36  ;;  %v6999_v41 = vsub.s32 1, %v6994_v11  ;;  %v2136_v40 = vadd.f32 %v2135_v44, %v5885_v36 }
 0x880   :  { %6991 = vst [vmem:[#allocation24_spill] sm:$0xff] %v5874_v39  ;;  %v5876_v45 = vpop.f32.mrf.mxu1  ;;  %p4432_p1 = pnand %p4431_p0, %p4425_p11 }
 0x881   :  { %6992 = vst [vmem:[#allocation27_spill] sm:$0xff] %v5876_v45  ;;  %v5881_v21 = vpop.f32.mrf.mxu0  ;;  %v5893_v38 = vrot.slane %v2047_v12, %v6999_v41  ;;  %v7003_v41 = vsub.s32 3, %v6994_v11 }
 0x882   :  { %6993 = vst [vmem:[#allocation47_spill] sm:$0xff] %v5881_v21  ;;  %v5887_v13 = vpop.f32.mrf.mxu1 }
 0x883   :  { %6997 = vst [vmem:[#allocation69_spill] sm:$0xff] %v5887_v13  ;;  %v2138_v21 = vadd.f32 %v2137_v51, %v5893_v38  ;;  %v5905_v7 = vrot.slane %v2047_v12, %v7003_v41 }
 0x885   :  { %7004 = vst [vmem:[#allocation74_spill] sm:$0xff] %v5905_v7  ;;  %v2251_v44 = vadd.f32 %v2250_v37, %v5905_v7 }
 0x907   :  { %v5889_v61 = vpop.f32.mrf.mxu0  ;;  %v5895_v39 = vpop.f32.mrf.mxu1 }
 0x908   :  { %6998 = vst [vmem:[#allocation71_spill] sm:$0xff] %v5889_v61  ;;  %7000 = vst [vmem:[#allocation72_spill] sm:$0xff] %v5895_v39 }
 0x909   :  { %v5897_v45 = vpop.f32.mrf.mxu0  ;;  %v5901_v9 = vpop.f32.mrf.mxu1 }
 0x90a   :  { %7001 = vst [vmem:[#allocation70_spill] sm:$0xff] %v5897_v45  ;;  %7002 = vst [vmem:[#allocation45_spill] sm:$0xff] %v5901_v9  ;;  %v7005_v45 = vsub.s32 2, %v6994_v11 }
 0x90b   :  { %v2462_v10 = vpop.f32.mrf.mxu0  ;;  %v2533_v61 = vpop.f32.mrf.mxu1 }
 0x90c   :  { %v2538_v43 = vadd.f32 %v2462_v10, %v2136_v40  ;;  %v5910_v51 = vrot.slane %v2047_v12, %v7005_v45 }
 0x90d   :  { %v2464_v22 = vpop.f32.mrf.mxu0  ;;  %v2535_v39 = vpop.f32.mrf.mxu1 }
 0x90e   :  { %v3905_v13 = vmul.f32 -1.442695, %v2538_v43  ;;  %v2539_v57 = vadd.f32 %v2464_v22, %v2138_v21  ;;  %v2541_v9 = vadd.f32 %v2535_v39, %v2251_v44  ;;  %v2249_v10 = vadd.f32 %v2248_v14, %v5910_v51  ;;  %v7007_v44 = vld [vmem:[#allocation50_spill] sm:$0xff] }
 0x910   :  { %4068 = vpow2.f32 %v3905_v13  ;;  %v3906_v8 = vmul.f32 -1.442695, %v2539_v57  ;;  %v3907_v40 = vmul.f32 -1.442695, %v2541_v9  ;;  %v2540_v21 = vadd.f32 %v2533_v61, %v2249_v10  ;;  %v7008_v10 = vld [vmem:[#allocation53_spill] sm:$0xff] }
 0x912   :  { %4070 = vpow2.f32 %v3906_v8 }
 0x913   :  { %4072 = vpow2.f32 %v3907_v40  ;;  %v7009_v40 = vld [vmem:[#allocation55_spill] sm:$0xff] }
 0x91d   :  { %v4069_v22 = vpop.eup %4068 }
 0x91e   :  { %v2545_v13 = vadd.f32 1.0, %v4069_v22  ;;  %v7010_v22 = vld [vmem:[#allocation56_spill] sm:$0xff] }
 0x91f   :  { %v4071_v57 = vpop.eup %4070 }
 0x920   :  { %4074 = vrcp.f32 %v2545_v13  ;;  %v2551_v43 = vadd.f32 1.0, %v4071_v57  ;;  %v4073_v8 = vpop.eup %4072  ;;  %v7012_v13 = vld [vmem:[#allocation22_spill] sm:$0xff]  ;;  %v7013_v57 = vld [vmem:[#allocation23_spill] sm:$0xff] }
 0x921   :  { %4076 = vtanh.f32 %v2540_v21  ;;  %v2558_v11 = vadd.f32 1.0, %v4073_v8  ;;  %v7011_v21 = vld [vmem:[#allocation54_spill] sm:$0xff]  ;;  %v7015_v8 = vld [vmem:[#allocation59_spill] sm:$0xff] }
 0x922   :  { %4078 = vrcp.f32 %v2551_v43  ;;  %v7014_v43 = vld [vmem:[#allocation57_spill] sm:$0xff] }
 0x923   :  { %4080 = vrcp.f32 %v2558_v11  ;;  %v7018_v11 = vld [vmem:[#allocation25_spill] sm:$0xff] }
 0x92d   :  { %v4075_v41 = vpop.eup %4074 }
 0x92e   :  { %v4077_v37 = vpop.eup %4076 }
 0x92f   :  { %v4079_v7 = vpop.eup %4078  ;;  %v2563_v12 = vmul.f32 %v4077_v37, %v4075_v41  ;;  %v7016_v41 = vld [vmem:[#allocation60_spill] sm:$0xff]  ;;  %v7017_v37 = vld [vmem:[#allocation58_spill] sm:$0xff] }
 0x930   :  { %v2562_v45 = vmul.f32 0.0, %v4079_v7  ;;  %v4081_v61 = vpop.eup %4080  ;;  %v7006_v7 = vld [vmem:[#allocation52_spill] sm:$0xff] }
 0x932   :  { %v5913_v39 = vadd.f32 %v2563_v12, %v2562_v45  ;;  %v7019_v45 = vld [vmem:[#allocation26_spill] sm:$0xff]  ;;  %v7020_v12 = vld [vmem:[#allocation61_spill] sm:$0xff] }
 0x934   :  { %4082 = vtanh.f32 %v5913_v39 }
 0x941   :  { %v4083_v9 = vpop.eup %4082 }
 0x942   :  { %v2566_v14 = vmul.f32 %v4083_v9, %v4081_v61  ;;  %v7021_v61 = vld [vmem:[#allocation63_spill] sm:$0xff]  ;;  %v7022_v9 = vld [vmem:[#allocation64_spill] sm:$0xff] }
 0x944   :  { %2640 = vmatmul.mubr.f32.vlgmr.msra.gmra.mxu0 %v2566_v14  ;;  %3831 = vst [vmem:[#allocation17] sm:$0xff] %v2566_v14  ;;  %2711 = vmatmul.mubr.f32.vlgmr.msra.gmra.mxu1 %v2566_v14  ;;  %v7023_v14 = vld [vmem:[#allocation62_spill] sm:$0xff] }
 0x945   :  { %2755 = vmatpush1.msra.mxu0 %v5571_v30  ;;  %2826 = vmatpush1.msra.mxu1 %v5573_v56 }
 0x946   :  { %2756 = vmatprep.subr.mxu0 %v5577_v54  ;;  %2827 = vmatprep.subr.mxu1 %v5579_v17 }
 0x947   :  { %2757 = vmatpush1.msra.mxu0 %v5583_v18  ;;  %2828 = vmatpush1.msra.mxu1 %v5585_v16 }
 0x948   :  { %2758 = vmatprep.subr.mxu0 %v5589_v29  ;;  %2829 = vmatprep.subr.mxu1 %v5591_v20 }
 0x949   :  { %2759 = vmatpush1.msra.mxu0 %v5595_v60  ;;  %2830 = vmatpush1.msra.mxu1 %v5597_v0 }
 0x94a   :  { %2760 = vmatprep.subr.mxu0 %v5601_v6  ;;  %2831 = vmatprep.subr.mxu1 %v5603_v27 }
 0x94b   :  { %2761 = vmatpush1.msra.mxu0 %v5607_v25  ;;  %2832 = vmatpush1.msra.mxu1 %v5609_v24 }
 0x94c   :  { %2762 = vmatprep.subr.mxu0 %v5613_v23  ;;  %2833 = vmatprep.subr.mxu1 %v5615_v34 }
 0x94d   :  { %2763 = vmatpush1.msra.mxu0 %v5619_v33  ;;  %2834 = vmatpush1.msra.mxu1 %v5621_v28 }
 0x94e   :  { %2764 = vmatprep.subr.mxu0 %v5625_v26  ;;  %2835 = vmatprep.subr.mxu1 %v5627_v42 }
 0x94f   :  { %2765 = vmatpush1.msra.mxu0 %v5631_v15  ;;  %2836 = vmatpush1.msra.mxu1 %v5633_v58 }
 0x950   :  { %2766 = vmatprep.subr.mxu0 %v5637_v59  ;;  %2837 = vmatprep.subr.mxu1 %v5639_v62 }
 0x951   :  { %2767 = vmatpush1.msra.mxu0 %v5643_v35  ;;  %2838 = vmatpush1.msra.mxu1 %v5645_v31 }
 0x952   :  { %2768 = vmatprep.subr.mxu0 %v5649_v19  ;;  %2839 = vmatprep.subr.mxu1 %v5651_v46 }
 0x953   :  { %2769 = vmatpush1.msra.mxu0 %v5655_v47  ;;  %2840 = vmatpush1.msra.mxu1 %v5657_v48 }
 0x954   :  { %2770 = vmatprep.subr.mxu0 %v5661_v49  ;;  %2841 = vmatprep.subr.mxu1 %v5663_v50 }
 0x955   :  { %2771 = vmatpush1.msra.mxu0 %v5667_v52  ;;  %2842 = vmatpush1.msra.mxu1 %v5669_v53 }
 0x956   :  { %2772 = vmatprep.subr.mxu0 %v5673_v55  ;;  %2843 = vmatprep.subr.mxu1 %v5675_v32 }
 0x957   :  { %2773 = vmatpush1.msra.mxu0 %v5679_v63  ;;  %2844 = vmatpush1.msra.mxu1 %v5681_v1 }
 0x958   :  { %2774 = vmatprep.subr.mxu0 %v5685_v2  ;;  %2845 = vmatprep.subr.mxu1 %v5687_v3 }
 0x959   :  { %2775 = vmatpush1.msra.mxu0 %v5691_v4  ;;  %2846 = vmatpush1.msra.mxu1 %v5693_v5 }
 0x95a   :  { %2776 = vmatprep.subr.mxu0 %v7006_v7  ;;  %2847 = vmatprep.subr.mxu1 %v7007_v44  ;;  %v7033_v44 = vld [vmem:[#allocation29_spill] sm:$0xff] }
 0x95b   :  { %2777 = vmatpush1.msra.mxu0 %v7008_v10  ;;  %2848 = vmatpush1.msra.mxu1 %v7009_v40  ;;  %v7031_v40 = vld [vmem:[#allocation74_spill] sm:$0xff] }
 0x95c   :  { %2778 = vmatprep.subr.mxu0 %v7010_v22  ;;  %2849 = vmatprep.subr.mxu1 %v7011_v21 }
 0x95d   :  { %2779 = vmatpush1.msra.mxu0 %v7012_v13  ;;  %2850 = vmatpush1.msra.mxu1 %v7013_v57  ;;  %v7024_v57 = vld [vmem:[#allocation48_spill] sm:$0xff] }
 0x95e   :  { %2780 = vmatprep.subr.mxu0 %v7014_v43  ;;  %2851 = vmatprep.subr.mxu1 %v7015_v8  ;;  %v7025_v43 = vmov 0.0   ;;  %v7026_v8 = vld [vmem:[#allocation46_spill] sm:$0xff] }
 0x95f   :  { %2781 = vmatpush1.msra.mxu0 %v7016_v41  ;;  %2852 = vmatpush1.msra.mxu1 %v7017_v37  ;;  %v7027_v37 = vld [vmem:[#allocation44_spill] sm:$0xff] }
 0x960   :  { %2782 = vmatprep.subr.mxu0 %v7018_v11  ;;  %2853 = vmatprep.subr.mxu1 %v7019_v45  ;;  %v7028_v11 = vld [vmem:[#allocation49_spill] sm:$0xff] }
 0x961   :  { %2783 = vmatpush1.msra.mxu0 %v7020_v12  ;;  %2854 = vmatpush1.msra.mxu1 %v7021_v61  ;;  %v7029_v12 = vld [vmem:[#allocation28_spill] sm:$0xff] }
 0x962   :  { %2784 = vmatprep.subr.mxu0 %v7022_v9  ;;  %2855 = vmatprep.subr.mxu1 %v7023_v14  ;;  %v2142_v45 = vadd.f32 %v7029_v12, %v5885_v36  ;;  %v7030_v9 = vld [vmem:[#allocation30_spill] sm:$0xff]  ;;  %v2255_v12 = vadd.f32 %v7033_v44, %v5910_v51 }
 0x963   :  { %2785 = vmatpush1.msra.mxu0 %v7024_v57  ;;  %2818 = vmatprep.mubr.f32.mxu0 %v7025_v43  ;;  %v2144_v41 = vadd.f32 %v7030_v9, %v5893_v38 }
 0x964   :  { %2856 = vmatpush1.msra.mxu1 %v7026_v8  ;;  %2889 = vmatprep.mubr.f32.mxu1 %v7025_v43 }
 0x965   :  { %2933 = vmatprep.subr.mxu0 %v7027_v37  ;;  %3004 = vmatprep.subr.mxu1 %v7028_v11  ;;  %v7032_v37 = vld [vmem:[#allocation31_spill] sm:$0xff] }
 0x966   :  { %v2257_v10 = vadd.f32 %v7032_v37, %v7031_v40 }
 0xa04   :  { %v2641_v61 = vpop.f32.mrf.mxu0  ;;  %v2712_v22 = vpop.f32.mrf.mxu1 }
 0xa05   :  { %v2717_v14 = vadd.f32 %v2641_v61, %v2142_v45  ;;  %v2719_v36 = vadd.f32 %v2712_v22, %v2255_v12  ;;  %v7050_v22 = vld [vmem:[#allocation63_spill] sm:$0xff]  ;;  %v7053_v12 = vld [vmem:[#allocation48_spill] sm:$0xff] }
 0xa06   :  { %v2643_v13 = vpop.f32.mrf.mxu0  ;;  %v2714_v43 = vpop.f32.mrf.mxu1 }
 0xa07   :  { %v3908_v57 = vmul.f32 -1.442695, %v2717_v14  ;;  %v2718_v21 = vadd.f32 %v2643_v13, %v2144_v41  ;;  %v2720_v11 = vadd.f32 %v2714_v43, %v2257_v10  ;;  %v7052_v14 = vld [vmem:[#allocation62_spill] sm:$0xff] }
 0xa09   :  { %4084 = vpow2.f32 %v3908_v57  ;;  %v3909_v8 = vmul.f32 -1.442695, %v2718_v21  ;;  %v3910_v7 = vmul.f32 -1.442695, %v2720_v11  ;;  %v7051_v11 = vld [vmem:[#allocation64_spill] sm:$0xff] }
 0xa0b   :  { %4086 = vpow2.f32 %v3909_v8 }
 0xa0c   :  { %4088 = vtanh.f32 %v2719_v36 }
 0xa0d   :  { %4090 = vpow2.f32 %v3910_v7  ;;  %v7049_v7 = vld [vmem:[#allocation61_spill] sm:$0xff] }
 0xa16   :  { %v4085_v5 = vpop.eup %4084 }
 0xa17   :  { %v2724_v9 = vadd.f32 1.0, %v4085_v5 }
 0xa18   :  { %v4087_v45 = vpop.eup %4086 }
 0xa19   :  { %4092 = vrcp.f32 %v2724_v9  ;;  %v2730_v13 = vadd.f32 1.0, %v4087_v45  ;;  %v4089_v21 = vpop.eup %4088  ;;  %v7054_v9 = vmov 0.0   ;;  %v7055_v45 = vld [vmem:[#allocation46_spill] sm:$0xff] }
 0xa1a   :  { %v4091_v57 = vpop.eup %4090 }
 0xa1b   :  { %4094 = vrcp.f32 %v2730_v13  ;;  %v2737_v37 = vadd.f32 1.0, %v4091_v57  ;;  %v7056_v13 = vld [vmem:[#allocation44_spill] sm:$0xff]  ;;  %v7058_v57 = vld [vmem:[#allocation43_spill] sm:$0xff] }
 0xa1d   :  { %4096 = vrcp.f32 %v2737_v37  ;;  %v7060_v37 = vld [vmem:[#allocation34_spill] sm:$0xff] }
 0xa26   :  { %v4093_v8 = vpop.eup %4092 }
 0xa27   :  { %v2742_v41 = vmul.f32 %v4093_v8, %v4089_v21  ;;  %v7057_v21 = vld [vmem:[#allocation49_spill] sm:$0xff]  ;;  %v7059_v8 = vld [vmem:[#allocation32_spill] sm:$0xff] }
 0xa28   :  { %v4095_v61 = vpop.eup %4094 }
 0xa29   :  { %v2741_v10 = vmul.f32 %v4095_v61, %v5913_v39  ;;  %v7048_v39 = vld [vmem:[#allocation26_spill] sm:$0xff] }
 0xa2a   :  { %v4097_v5 = vpop.eup %4096 }
 0xa2b   :  { %v5991_v43 = vadd.f32 %v2742_v41, %v2741_v10  ;;  %v2148_v41 = vadd.f32 %v7059_v8, %v7058_v57  ;;  %v2150_v10 = vadd.f32 %v7060_v37, %v5893_v38 }
 0xa2d   :  { %4098 = vtanh.f32 %v5991_v43 }
 0xa3a   :  { %v4099_v36 = vpop.eup %4098 }
 0xa3b   :  { %v2745_v44 = vmul.f32 %v4099_v36, %v4097_v5 }
 0xa3d   :  { %2819 = vmatmul.mubr.f32.vlgmr.msra.gmra.mxu0 %v2745_v44  ;;  %3832 = vst [vmem:[#allocation17 + $0x8] sm:$0xff] %v2745_v44  ;;  %2890 = vmatmul.mubr.f32.vlgmr.msra.gmra.mxu1 %v2745_v44 }
 0xa3e   :  { %2934 = vmatpush1.msra.mxu0 %v5571_v30  ;;  %3005 = vmatpush1.msra.mxu1 %v5573_v56  ;;  %v7034_v30 = vld [vmem:[#allocation51_spill] sm:$0xff]  ;;  %v7035_v56 = vld [vmem:[#allocation52_spill] sm:$0xff] }
 0xa3f   :  { %2935 = vmatprep.subr.mxu0 %v5577_v54  ;;  %3006 = vmatprep.subr.mxu1 %v5579_v17  ;;  %v7036_v54 = vld [vmem:[#allocation50_spill] sm:$0xff]  ;;  %v7037_v17 = vld [vmem:[#allocation53_spill] sm:$0xff] }
 0xa40   :  { %2936 = vmatpush1.msra.mxu0 %v5583_v18  ;;  %3007 = vmatpush1.msra.mxu1 %v5585_v16  ;;  %v7038_v18 = vld [vmem:[#allocation55_spill] sm:$0xff]  ;;  %v7039_v16 = vld [vmem:[#allocation56_spill] sm:$0xff] }
 0xa41   :  { %2937 = vmatprep.subr.mxu0 %v5589_v29  ;;  %3008 = vmatprep.subr.mxu1 %v5591_v20  ;;  %v7040_v29 = vld [vmem:[#allocation54_spill] sm:$0xff] }
 0xa42   :  { %2938 = vmatpush1.msra.mxu0 %v5595_v60  ;;  %3009 = vmatpush1.msra.mxu1 %v5597_v0  ;;  %v7041_v20 = vld [vmem:[#allocation22_spill] sm:$0xff]  ;;  %v7042_v60 = vld [vmem:[#allocation23_spill] sm:$0xff]  ;;  %v7043_v0 = vld [vmem:[#allocation57_spill] sm:$0xff] }
 0xa43   :  { %2939 = vmatprep.subr.mxu0 %v5601_v6  ;;  %3010 = vmatprep.subr.mxu1 %v5603_v27  ;;  %v7044_v6 = vld [vmem:[#allocation59_spill] sm:$0xff]  ;;  %v7045_v27 = vld [vmem:[#allocation60_spill] sm:$0xff] }
 0xa44   :  { %2940 = vmatpush1.msra.mxu0 %v5607_v25  ;;  %3011 = vmatpush1.msra.mxu1 %v5609_v24  ;;  %v7046_v25 = vld [vmem:[#allocation58_spill] sm:$0xff]  ;;  %v7047_v24 = vld [vmem:[#allocation25_spill] sm:$0xff] }
 0xa45   :  { %2941 = vmatprep.subr.mxu0 %v5613_v23  ;;  %3012 = vmatprep.subr.mxu1 %v5615_v34 }
 0xa46   :  { %2942 = vmatpush1.msra.mxu0 %v5619_v33  ;;  %3013 = vmatpush1.msra.mxu1 %v5621_v28 }
 0xa47   :  { %2943 = vmatprep.subr.mxu0 %v5625_v26  ;;  %3014 = vmatprep.subr.mxu1 %v5627_v42 }
 0xa48   :  { %2944 = vmatpush1.msra.mxu0 %v5631_v15  ;;  %3015 = vmatpush1.msra.mxu1 %v5633_v58 }
 0xa49   :  { %2945 = vmatprep.subr.mxu0 %v5637_v59  ;;  %3016 = vmatprep.subr.mxu1 %v5639_v62 }
 0xa4a   :  { %2946 = vmatpush1.msra.mxu0 %v5643_v35  ;;  %3017 = vmatpush1.msra.mxu1 %v5645_v31 }
 0xa4b   :  { %2947 = vmatprep.subr.mxu0 %v5649_v19  ;;  %3018 = vmatprep.subr.mxu1 %v5651_v46 }
 0xa4c   :  { %2948 = vmatpush1.msra.mxu0 %v5655_v47  ;;  %3019 = vmatpush1.msra.mxu1 %v5657_v48 }
 0xa4d   :  { %2949 = vmatprep.subr.mxu0 %v5661_v49  ;;  %3020 = vmatprep.subr.mxu1 %v5663_v50 }
 0xa4e   :  { %2950 = vmatpush1.msra.mxu0 %v5667_v52  ;;  %3021 = vmatpush1.msra.mxu1 %v5669_v53 }
 0xa4f   :  { %2951 = vmatprep.subr.mxu0 %v5673_v55  ;;  %3022 = vmatprep.subr.mxu1 %v5675_v32 }
 0xa50   :  { %2952 = vmatpush1.msra.mxu0 %v5679_v63  ;;  %3023 = vmatpush1.msra.mxu1 %v5681_v1 }
 0xa51   :  { %2953 = vmatprep.subr.mxu0 %v5685_v2  ;;  %3024 = vmatprep.subr.mxu1 %v5687_v3 }
 0xa52   :  { %2954 = vmatpush1.msra.mxu0 %v5691_v4  ;;  %3025 = vmatpush1.msra.mxu1 %v7034_v30 }
 0xa53   :  { %2955 = vmatprep.subr.mxu0 %v7035_v56  ;;  %3026 = vmatprep.subr.mxu1 %v7036_v54 }
 0xa54   :  { %2956 = vmatpush1.msra.mxu0 %v7037_v17  ;;  %3027 = vmatpush1.msra.mxu1 %v7038_v18 }
 0xa55   :  { %2957 = vmatprep.subr.mxu0 %v7039_v16  ;;  %3028 = vmatprep.subr.mxu1 %v7040_v29 }
 0xa56   :  { %2958 = vmatpush1.msra.mxu0 %v7041_v20  ;;  %3029 = vmatpush1.msra.mxu1 %v7042_v60 }
 0xa57   :  { %2959 = vmatprep.subr.mxu0 %v7043_v0  ;;  %3030 = vmatprep.subr.mxu1 %v7044_v6 }
 0xa58   :  { %2960 = vmatpush1.msra.mxu0 %v7045_v27  ;;  %3031 = vmatpush1.msra.mxu1 %v7046_v25 }
 0xa59   :  { %2961 = vmatprep.subr.mxu0 %v7047_v24  ;;  %3032 = vmatprep.subr.mxu1 %v7048_v39 }
 0xa5a   :  { %2962 = vmatpush1.msra.mxu0 %v7049_v7  ;;  %3033 = vmatpush1.msra.mxu1 %v7050_v22  ;;  %v7062_v22 = vld [vmem:[#allocation33_spill] sm:$0xff] }
 0xa5b   :  { %2963 = vmatprep.subr.mxu0 %v7051_v11  ;;  %3034 = vmatprep.subr.mxu1 %v7052_v14  ;;  %v2261_v8 = vadd.f32 %v7062_v22, %v5910_v51 }
 0xa5c   :  { %2964 = vmatpush1.msra.mxu0 %v7053_v12  ;;  %2997 = vmatprep.mubr.f32.mxu0 %v7054_v9 }
 0xa5d   :  { %3035 = vmatpush1.msra.mxu1 %v7055_v45  ;;  %3068 = vmatprep.mubr.f32.mxu1 %v7054_v9 }
 0xa5e   :  { %3112 = vmatprep.subr.mxu0 %v7056_v13  ;;  %3183 = vmatprep.subr.mxu1 %v7057_v21  ;;  %v7061_v13 = vld [vmem:[#allocation35_spill] sm:$0xff] }
 0xa5f   :  { %v2263_v11 = vadd.f32 %v7061_v13, %v7031_v40  ;;  %v6081_v13 = vld [vmem:[#allocation16 + $0x1d8] sm:$0xff] }
 0xafd   :  { %v2820_v61 = vpop.f32.mrf.mxu0  ;;  %v2891_v14 = vpop.f32.mrf.mxu1 }
 0xafe   :  { %v2896_v5 = vadd.f32 %v2820_v61, %v2148_v41  ;;  %v2898_v57 = vadd.f32 %v2891_v14, %v2261_v8  ;;  %v6087_v8 = vld [vmem:[#allocation16 + $0x1d0] sm:$0xff] }
 0xaff   :  { %v2822_v36 = vpop.f32.mrf.mxu0  ;;  %v2893_v9 = vpop.f32.mrf.mxu1 }
 0xb00   :  { %v3911_v44 = vmul.f32 -1.442695, %v2896_v5  ;;  %v2897_v12 = vadd.f32 %v2822_v36, %v2150_v10  ;;  %v2899_v21 = vadd.f32 %v2893_v9, %v2263_v11 }
 0xb02   :  { %4100 = vpow2.f32 %v3911_v44  ;;  %v3912_v45 = vmul.f32 -1.442695, %v2897_v12  ;;  %v3913_v7 = vmul.f32 -1.442695, %v2899_v21  ;;  %v6084_v21 = vld [vmem:[#allocation16 + $0x1c0] sm:$0xff] }
 0xb04   :  { %4102 = vpow2.f32 %v3912_v45 }
 0xb05   :  { %4104 = vtanh.f32 %v2898_v57  ;;  %v6075_v57 = vld [vmem:[#allocation16 + $0x1f0] sm:$0xff] }
 0xb06   :  { %4106 = vpow2.f32 %v3913_v7  ;;  %v6072_v7 = vld [vmem:[#allocation16 + $0x1e0] sm:$0xff] }
 0xb0f   :  { %v4101_v39 = vpop.eup %4100 }
 0xb10   :  { %v2903_v37 = vadd.f32 1.0, %v4101_v39 }
 0xb11   :  { %v4103_v41 = vpop.eup %4102 }
 0xb12   :  { %4108 = vrcp.f32 %v2903_v37  ;;  %v2909_v61 = vadd.f32 1.0, %v4103_v41  ;;  %v4105_v12 = vpop.eup %4104  ;;  %v6090_v37 = vld [vmem:[#allocation16 + $0x1a8] sm:$0xff]  ;;  %v6093_v41 = vld [vmem:[#allocation16 + $0x1b8] sm:$0xff] }
 0xb13   :  { %v4107_v45 = vpop.eup %4106 }
 0xb14   :  { %4110 = vrcp.f32 %v2909_v61  ;;  %v2916_v44 = vadd.f32 1.0, %v4107_v45  ;;  %v6096_v61 = vld [vmem:[#allocation16 + $0x1a0] sm:$0xff]  ;;  %v6102_v45 = vld [vmem:[#allocation16 + $0x188] sm:$0xff] }
 0xb16   :  { %4112 = vrcp.f32 %v2916_v44 }
 0xb1f   :  { %v4109_v10 = vpop.eup %4108 }
 0xb20   :  { %v2921_v5 = vmul.f32 %v4109_v10, %v4105_v12  ;;  %v6099_v12 = vld [vmem:[#allocation16 + $0x1b0] sm:$0xff]  ;;  %v6105_v10 = vld [vmem:[#allocation16 + $0x198] sm:$0xff] }
 0xb21   :  { %v4111_v36 = vpop.eup %4110 }
 0xb22   :  { %v2920_v11 = vmul.f32 %v4111_v36, %v5991_v43  ;;  %v6078_v43 = vld [vmem:[#allocation16 + $0x1c8] sm:$0xff]  ;;  %v6111_v36 = vld [vmem:[#allocation16 + $0x190] sm:$0xff] }
 0xb23   :  { %v4113_v39 = vpop.eup %4112 }
 0xb24   :  { %v6069_v9 = vadd.f32 %v2921_v5, %v2920_v11  ;;  %v6108_v5 = vld [vmem:[#allocation16 + $0x180] sm:$0xff] }
 0xb26   :  { %4114 = vtanh.f32 %v6069_v9 }
 0xb33   :  { %v4115_v22 = vpop.eup %4114 }
 0xb34   :  { %v2924_v14 = vmul.f32 %v4115_v22, %v4113_v39 }
 0xb36   :  { %2998 = vmatmul.mubr.f32.vlgmr.msra.gmra.mxu0 %v2924_v14  ;;  %3833 = vst [vmem:[#allocation17 + $0x10] sm:$0xff] %v2924_v14  ;;  %3069 = vmatmul.mubr.f32.vlgmr.msra.gmra.mxu1 %v2924_v14  ;;  %v6199_v14 = vld [vmem:[#allocation16 + $0x178] sm:$0xff] }
 0xb37   :  { %3113 = vmatpush1.msra.mxu0 %v6072_v7  ;;  %3184 = vmatpush1.msra.mxu1 %v6075_v57 }
 0xb38   :  { %3114 = vmatprep.subr.mxu0 %v6078_v43  ;;  %3185 = vmatprep.subr.mxu1 %v6081_v13 }
 0xb39   :  { %3115 = vmatpush1.msra.mxu0 %v6084_v21  ;;  %3186 = vmatpush1.msra.mxu1 %v6087_v8 }
 0xb3a   :  { %3116 = vmatprep.subr.mxu0 %v6090_v37  ;;  %3187 = vmatprep.subr.mxu1 %v6093_v41 }
 0xb3b   :  { %3117 = vmatpush1.msra.mxu0 %v6096_v61  ;;  %3188 = vmatpush1.msra.mxu1 %v6099_v12 }
 0xb3c   :  { %3118 = vmatprep.subr.mxu0 %v6102_v45  ;;  %3189 = vmatprep.subr.mxu1 %v6105_v10 }
 0xb3d   :  { %3119 = vmatpush1.msra.mxu0 %v6108_v5  ;;  %3190 = vmatpush1.msra.mxu1 %v6111_v36 }
 0xb3e   :  { %3120 = vmatprep.subr.mxu0 %v5613_v23  ;;  %3191 = vmatprep.subr.mxu1 %v5615_v34  ;;  %v7063_v23 = vld [vmem:[#allocation26_spill] sm:$0xff]  ;;  %v7064_v34 = vld [vmem:[#allocation61_spill] sm:$0xff] }
 0xb3f   :  { %3121 = vmatpush1.msra.mxu0 %v5619_v33  ;;  %3192 = vmatpush1.msra.mxu1 %v5621_v28  ;;  %v7065_v33 = vld [vmem:[#allocation63_spill] sm:$0xff]  ;;  %v7066_v28 = vld [vmem:[#allocation64_spill] sm:$0xff] }
 0xb40   :  { %3122 = vmatprep.subr.mxu0 %v5625_v26  ;;  %3193 = vmatprep.subr.mxu1 %v5627_v42  ;;  %v7067_v26 = vld [vmem:[#allocation62_spill] sm:$0xff]  ;;  %v7068_v42 = vld [vmem:[#allocation48_spill] sm:$0xff] }
 0xb41   :  { %3123 = vmatpush1.msra.mxu0 %v5631_v15  ;;  %3194 = vmatpush1.msra.mxu1 %v5633_v58  ;;  %v7069_v15 = vmov 0.0   ;;  %v7070_v58 = vld [vmem:[#allocation46_spill] sm:$0xff] }
 0xb42   :  { %3124 = vmatprep.subr.mxu0 %v5637_v59  ;;  %3195 = vmatprep.subr.mxu1 %v5639_v62  ;;  %v6164_v59 = vld [vmem:[#allocation16 + $0x1e8] sm:$0xff]  ;;  %v6167_v62 = vld [vmem:[#allocation16 + $0x1f8] sm:$0xff] }
 0xb43   :  { %3125 = vmatpush1.msra.mxu0 %v5643_v35  ;;  %3196 = vmatpush1.msra.mxu1 %v5645_v31  ;;  %7071 = vst [vmem:[#allocation28_spill] sm:$0xff] %v6164_v59  ;;  %7072 = vst [vmem:[#allocation30_spill] sm:$0xff] %v6167_v62  ;;  %v7073_v35 = vld [vmem:[#allocation43_spill] sm:$0xff]  ;;  %v7074_v31 = vld [vmem:[#allocation36_spill] sm:$0xff] }
 0xb44   :  { %3126 = vmatprep.subr.mxu0 %v5649_v19  ;;  %3197 = vmatprep.subr.mxu1 %v5651_v46  ;;  %v2154_v19 = vadd.f32 %v7074_v31, %v7073_v35  ;;  %v6223_v31 = vld [vmem:[#allocation16 + $0x138] sm:$0xff] }
 0xb45   :  { %3127 = vmatpush1.msra.mxu0 %v5655_v47  ;;  %3198 = vmatpush1.msra.mxu1 %v5657_v48  ;;  %v7075_v47 = vld [vmem:[#allocation38_spill] sm:$0xff] }
 0xb46   :  { %3128 = vmatprep.subr.mxu0 %v5661_v49  ;;  %3199 = vmatprep.subr.mxu1 %v5663_v50  ;;  %v2156_v48 = vadd.f32 %v7075_v47, %v5893_v38  ;;  %v6232_v47 = vld [vmem:[#allocation16 + $0x108] sm:$0xff] }
 0xb47   :  { %3129 = vmatpush1.msra.mxu0 %v5667_v52  ;;  %3200 = vmatpush1.msra.mxu1 %v5669_v53 }
 0xb48   :  { %3130 = vmatprep.subr.mxu0 %v5673_v55  ;;  %3201 = vmatprep.subr.mxu1 %v5675_v32 }
 0xb49   :  { %3131 = vmatpush1.msra.mxu0 %v5679_v63  ;;  %3202 = vmatpush1.msra.mxu1 %v5681_v1  ;;  %v7076_v1 = vld [vmem:[#allocation39_spill] sm:$0xff] }
 0xb4a   :  { %3132 = vmatprep.subr.mxu0 %v5685_v2  ;;  %3203 = vmatprep.subr.mxu1 %v5687_v3  ;;  %v2269_v2 = vadd.f32 %v7076_v1, %v7031_v40  ;;  %v6259_v1 = vld [vmem:[#allocation16 + $0xd8] sm:$0xff] }
 0xb4b   :  { %3133 = vmatpush1.msra.mxu0 %v5691_v4  ;;  %3204 = vmatpush1.msra.mxu1 %v7034_v30  ;;  %v7077_v4 = vld [vmem:[#allocation37_spill] sm:$0xff] }
 0xb4c   :  { %3134 = vmatprep.subr.mxu0 %v7035_v56  ;;  %3205 = vmatprep.subr.mxu1 %v7036_v54  ;;  %v2267_v30 = vadd.f32 %v7077_v4, %v5910_v51  ;;  %v6268_v4 = vld [vmem:[#allocation16 + $0xa8] sm:$0xff] }
 0xb4d   :  { %3135 = vmatpush1.msra.mxu0 %v7037_v17  ;;  %3206 = vmatpush1.msra.mxu1 %v7038_v18 }
 0xb4e   :  { %3136 = vmatprep.subr.mxu0 %v7039_v16  ;;  %3207 = vmatprep.subr.mxu1 %v7040_v29 }
 0xb4f   :  { %3137 = vmatpush1.msra.mxu0 %v7041_v20  ;;  %3208 = vmatpush1.msra.mxu1 %v7042_v60 }
 0xb50   :  { %3138 = vmatprep.subr.mxu0 %v7043_v0  ;;  %3209 = vmatprep.subr.mxu1 %v7044_v6 }
 0xb51   :  { %3139 = vmatpush1.msra.mxu0 %v7045_v27  ;;  %3210 = vmatpush1.msra.mxu1 %v7046_v25 }
 0xb52   :  { %3140 = vmatprep.subr.mxu0 %v7047_v24  ;;  %3211 = vmatprep.subr.mxu1 %v7063_v23  ;;  %v6202_v23 = vld [vmem:[#allocation16 + $0x160] sm:$0xff] }
 0xb53   :  { %3141 = vmatpush1.msra.mxu0 %v7064_v34  ;;  %3212 = vmatpush1.msra.mxu1 %v7065_v33  ;;  %v6205_v34 = vld [vmem:[#allocation16 + $0x170] sm:$0xff]  ;;  %v6208_v33 = vld [vmem:[#allocation16 + $0x148] sm:$0xff] }
 0xb54   :  { %3142 = vmatprep.subr.mxu0 %v7066_v28  ;;  %3213 = vmatprep.subr.mxu1 %v7067_v26  ;;  %v6211_v28 = vld [vmem:[#allocation16 + $0x158] sm:$0xff]  ;;  %v6214_v26 = vld [vmem:[#allocation16 + $0x140] sm:$0xff] }
 0xb55   :  { %3143 = vmatpush1.msra.mxu0 %v7068_v42  ;;  %3176 = vmatprep.mubr.f32.mxu0 %v7069_v15  ;;  %v6217_v42 = vld [vmem:[#allocation16 + $0x150] sm:$0xff] }
 0xb56   :  { %3214 = vmatpush1.msra.mxu1 %v7070_v58  ;;  %3247 = vmatprep.mubr.f32.mxu1 %v7069_v15  ;;  %v6220_v58 = vld [vmem:[#allocation16 + $0x128] sm:$0xff] }
 0xb57   :  { %3291 = vmatprep.subr.mxu0 %v6164_v59  ;;  %3362 = vmatprep.subr.mxu1 %v6167_v62 }
 0xbf6   :  { %v2999_v46 = vpop.f32.mrf.mxu0  ;;  %v3070_v55 = vpop.f32.mrf.mxu1 }
 0xbf7   :  { %v3075_v49 = vadd.f32 %v2999_v46, %v2154_v19  ;;  %v3077_v56 = vadd.f32 %v3070_v55, %v2267_v30  ;;  %v6226_v19 = vld [vmem:[#allocation16 + $0x120] sm:$0xff]  ;;  %v6229_v46 = vld [vmem:[#allocation16 + $0x130] sm:$0xff]  ;;  %v6271_v30 = vld [vmem:[#allocation16 + $0xb8] sm:$0xff] }
 0xbf8   :  { %v3001_v50 = vpop.f32.mrf.mxu0  ;;  %v3072_v63 = vpop.f32.mrf.mxu1  ;;  %v6250_v55 = vld [vmem:[#allocation16 + $0xe0] sm:$0xff] }
 0xbf9   :  { %v3914_v52 = vmul.f32 -1.442695, %v3075_v49  ;;  %v3076_v53 = vadd.f32 %v3001_v50, %v2156_v48  ;;  %v3078_v3 = vadd.f32 %v3072_v63, %v2269_v2  ;;  %v6235_v48 = vld [vmem:[#allocation16 + $0x118] sm:$0xff]  ;;  %v6238_v49 = vld [vmem:[#allocation16 + $0x100] sm:$0xff]  ;;  %v6241_v50 = vld [vmem:[#allocation16 + $0x110] sm:$0xff] }
 0xbfa   :  { %v6256_v63 = vld [vmem:[#allocation16 + $0xc8] sm:$0xff]  ;;  %v6262_v2 = vld [vmem:[#allocation16 + $0xc0] sm:$0xff] }
 0xbfb   :  { %4116 = vpow2.f32 %v3914_v52  ;;  %v3915_v32 = vmul.f32 -1.442695, %v3076_v53  ;;  %v3916_v54 = vmul.f32 -1.442695, %v3078_v3  ;;  %v6244_v52 = vld [vmem:[#allocation16 + $0xe8] sm:$0xff]  ;;  %v6247_v53 = vld [vmem:[#allocation16 + $0xf8] sm:$0xff] }
 0xbfc   :  { %v6265_v3 = vld [vmem:[#allocation16 + $0xd0] sm:$0xff] }
 0xbfd   :  { %4118 = vpow2.f32 %v3915_v32  ;;  %v6253_v32 = vld [vmem:[#allocation16 + $0xf0] sm:$0xff] }
 0xbfe   :  { %4120 = vtanh.f32 %v3077_v56  ;;  %v6274_v56 = vld [vmem:[#allocation16 + $0xa0] sm:$0xff] }
 0xbff   :  { %4122 = vpow2.f32 %v3916_v54  ;;  %v6277_v54 = vld [vmem:[#allocation16 + $0xb0] sm:$0xff] }
 0xc00   :  { %7078 = vst [vmem:[#allocation74_spill] sm:$0xff] %v6277_v54 }
 0xc08   :  { %v4117_v17 = vpop.eup %4116 }
 0xc09   :  { %v3082_v18 = vadd.f32 1.0, %v4117_v17  ;;  %v6280_v17 = vld [vmem:[#allocation16 + $0x88] sm:$0xff] }
 0xc0a   :  { %v4119_v16 = vpop.eup %4118  ;;  %7079 = vst [vmem:[#allocation31_spill] sm:$0xff] %v6280_v17 }
 0xc0b   :  { %4124 = vrcp.f32 %v3082_v18  ;;  %v3088_v29 = vadd.f32 1.0, %v4119_v16  ;;  %v4121_v20 = vpop.eup %4120  ;;  %v6283_v18 = vld [vmem:[#allocation16 + $0x98] sm:$0xff]  ;;  %v6286_v16 = vld [vmem:[#allocation16 + $0x80] sm:$0xff] }
 0xc0c   :  { %v4123_v60 = vpop.eup %4122  ;;  %7080 = vst [vmem:[#allocation29_spill] sm:$0xff] %v6283_v18  ;;  %7081 = vst [vmem:[#allocation51_spill] sm:$0xff] %v6286_v16 }
 0xc0d   :  { %4126 = vrcp.f32 %v3088_v29  ;;  %v3095_v25 = vadd.f32 1.0, %v4123_v60  ;;  %v6289_v29 = vld [vmem:[#allocation16 + $0x90] sm:$0xff]  ;;  %v6295_v60 = vld [vmem:[#allocation16 + $0x78] sm:$0xff] }
 0xc0e   :  { %7082 = vst [vmem:[#allocation52_spill] sm:$0xff] %v6289_v29  ;;  %7084 = vst [vmem:[#allocation53_spill] sm:$0xff] %v6295_v60 }
 0xc0f   :  { %4128 = vrcp.f32 %v3095_v25  ;;  %v6307_v25 = vld [vmem:[#allocation16 + $0x58] sm:$0xff] }
 0xc10   :  { %7088 = vst [vmem:[#allocation22_spill] sm:$0xff] %v6307_v25 }
 0xc18   :  { %v4125_v0 = vpop.eup %4124 }
 0xc19   :  { %v3100_v6 = vmul.f32 %v4125_v0, %v4121_v20  ;;  %v6292_v20 = vld [vmem:[#allocation16 + $0x68] sm:$0xff]  ;;  %v6298_v0 = vld [vmem:[#allocation16 + $0x60] sm:$0xff] }
 0xc1a   :  { %v4127_v27 = vpop.eup %4126  ;;  %7083 = vst [vmem:[#allocation50_spill] sm:$0xff] %v6292_v20  ;;  %7085 = vst [vmem:[#allocation55_spill] sm:$0xff] %v6298_v0 }
 0xc1b   :  { %v3099_v24 = vmul.f32 %v4127_v27, %v6069_v9  ;;  %v6196_v9 = vld [vmem:[#allocation16 + $0x168] sm:$0xff] }
 0xc1c   :  { %v4129_v11 = vpop.eup %4128  ;;  %v6304_v27 = vld [vmem:[#allocation16 + $0x48] sm:$0xff] }
 0xc1d   :  { %v6179_v44 = vadd.f32 %v3100_v6, %v3099_v24  ;;  %v6301_v6 = vld [vmem:[#allocation16 + $0x70] sm:$0xff]  ;;  %7087 = vst [vmem:[#allocation54_spill] sm:$0xff] %v6304_v27  ;;  %v6310_v24 = vld [vmem:[#allocation16 + $0x40] sm:$0xff] }
 0xc1e   :  { %7086 = vst [vmem:[#allocation56_spill] sm:$0xff] %v6301_v6  ;;  %7089 = vst [vmem:[#allocation23_spill] sm:$0xff] %v6310_v24 }
 0xc1f   :  { %4130 = vtanh.f32 %v6179_v44 }
 0xc2c   :  { %v4131_v39 = vpop.eup %4130 }
 0xc2d   :  { %v3103_v22 = vmul.f32 %v4131_v39, %v4129_v11  ;;  %v6313_v11 = vld [vmem:[#allocation16 + $0x50] sm:$0xff]  ;;  %v6316_v39 = vld [vmem:[#allocation16 + $0x28] sm:$0xff] }
 0xc2e   :  { %7090 = vst [vmem:[#allocation57_spill] sm:$0xff] %v6313_v11  ;;  %7091 = vst [vmem:[#allocation59_spill] sm:$0xff] %v6316_v39 }
 0xc2f   :  { %3177 = vmatmul.mubr.f32.vlgmr.msra.gmra.mxu0 %v3103_v22  ;;  %3834 = vst [vmem:[#allocation17 + $0x18] sm:$0xff] %v3103_v22  ;;  %3248 = vmatmul.mubr.f32.vlgmr.msra.gmra.mxu1 %v3103_v22  ;;  %v6319_v22 = vld [vmem:[#allocation16 + $0x38] sm:$0xff] }
 0xc30   :  { %3292 = vmatpush1.msra.mxu0 %v6072_v7  ;;  %3363 = vmatpush1.msra.mxu1 %v6075_v57  ;;  %7092 = vst [vmem:[#allocation60_spill] sm:$0xff] %v6319_v22 }
 0xc31   :  { %3293 = vmatprep.subr.mxu0 %v6078_v43  ;;  %3364 = vmatprep.subr.mxu1 %v6081_v13 }
 0xc32   :  { %3294 = vmatpush1.msra.mxu0 %v6084_v21  ;;  %3365 = vmatpush1.msra.mxu1 %v6087_v8 }
 0xc33   :  { %3295 = vmatprep.subr.mxu0 %v6090_v37  ;;  %3366 = vmatprep.subr.mxu1 %v6093_v41 }
 0xc34   :  { %3296 = vmatpush1.msra.mxu0 %v6096_v61  ;;  %3367 = vmatpush1.msra.mxu1 %v6099_v12 }
 0xc35   :  { %3297 = vmatprep.subr.mxu0 %v6102_v45  ;;  %3368 = vmatprep.subr.mxu1 %v6105_v10 }
 0xc36   :  { %3298 = vmatpush1.msra.mxu0 %v6108_v5  ;;  %3369 = vmatpush1.msra.mxu1 %v6111_v36 }
 0xc37   :  { %3299 = vmatprep.subr.mxu0 %v6196_v9  ;;  %3370 = vmatprep.subr.mxu1 %v6199_v14 }
 0xc38   :  { %3300 = vmatpush1.msra.mxu0 %v6202_v23  ;;  %3371 = vmatpush1.msra.mxu1 %v6205_v34 }
 0xc39   :  { %3301 = vmatprep.subr.mxu0 %v6208_v33  ;;  %3372 = vmatprep.subr.mxu1 %v6211_v28 }
 0xc3a   :  { %3302 = vmatpush1.msra.mxu0 %v6214_v26  ;;  %3373 = vmatpush1.msra.mxu1 %v6217_v42 }
 0xc3b   :  { %3303 = vmatprep.subr.mxu0 %v6220_v58  ;;  %3374 = vmatprep.subr.mxu1 %v6223_v31 }
 0xc3c   :  { %3304 = vmatpush1.msra.mxu0 %v6226_v19  ;;  %3375 = vmatpush1.msra.mxu1 %v6229_v46 }
 0xc3d   :  { %3305 = vmatprep.subr.mxu0 %v6232_v47  ;;  %3376 = vmatprep.subr.mxu1 %v6235_v48 }
 0xc3e   :  { %3306 = vmatpush1.msra.mxu0 %v6238_v49  ;;  %3377 = vmatpush1.msra.mxu1 %v6241_v50 }
 0xc3f   :  { %3307 = vmatprep.subr.mxu0 %v6244_v52  ;;  %3378 = vmatprep.subr.mxu1 %v6247_v53 }
 0xc40   :  { %3308 = vmatpush1.msra.mxu0 %v6250_v55  ;;  %3379 = vmatpush1.msra.mxu1 %v6253_v32 }
 0xc41   :  { %3309 = vmatprep.subr.mxu0 %v6256_v63  ;;  %3380 = vmatprep.subr.mxu1 %v6259_v1 }
 0xc42   :  { %3310 = vmatpush1.msra.mxu0 %v6262_v2  ;;  %3381 = vmatpush1.msra.mxu1 %v6265_v3 }
 0xc43   :  { %3311 = vmatprep.subr.mxu0 %v6268_v4  ;;  %3382 = vmatprep.subr.mxu1 %v6271_v30 }
 0xc44   :  { %3312 = vmatpush1.msra.mxu0 %v6274_v56  ;;  %3383 = vmatpush1.msra.mxu1 %v6277_v54 }
 0xc45   :  { %3313 = vmatprep.subr.mxu0 %v6280_v17  ;;  %3384 = vmatprep.subr.mxu1 %v6283_v18  ;;  %v7102_v18 = vld [vmem:[#allocation41_spill] sm:$0xff] }
 0xc46   :  { %3314 = vmatpush1.msra.mxu0 %v6286_v16  ;;  %3385 = vmatpush1.msra.mxu1 %v6289_v29 }
 0xc47   :  { %3315 = vmatprep.subr.mxu0 %v6292_v20  ;;  %3386 = vmatprep.subr.mxu1 %v6295_v60 }
 0xc48   :  { %3316 = vmatpush1.msra.mxu0 %v6298_v0  ;;  %3387 = vmatpush1.msra.mxu1 %v6301_v6 }
 0xc49   :  { %3317 = vmatprep.subr.mxu0 %v6304_v27  ;;  %3388 = vmatprep.subr.mxu1 %v6307_v25  ;;  %v6322_v27 = vld [vmem:[#allocation16 + $0x20] sm:$0xff]  ;;  %v6325_v25 = vld [vmem:[#allocation16 + $0x30] sm:$0xff] }
 0xc4a   :  { %3318 = vmatpush1.msra.mxu0 %v6310_v24  ;;  %3389 = vmatpush1.msra.mxu1 %v6313_v11  ;;  %7093 = vst [vmem:[#allocation58_spill] sm:$0xff] %v6322_v27  ;;  %7094 = vst [vmem:[#allocation25_spill] sm:$0xff] %v6325_v25  ;;  %v6328_v24 = vld [vmem:[#allocation16 + $0x8] sm:$0xff]  ;;  %v6331_v11 = vld [vmem:[#allocation16 + $0x18] sm:$0xff] }
 0xc4b   :  { %3319 = vmatprep.subr.mxu0 %v6316_v39  ;;  %3390 = vmatprep.subr.mxu1 %v6319_v22  ;;  %7095 = vst [vmem:[#allocation44_spill] sm:$0xff] %v6328_v24  ;;  %7096 = vst [vmem:[#allocation49_spill] sm:$0xff] %v6331_v11  ;;  %v6334_v39 = vld [vmem:[#allocation16] sm:$0xff]  ;;  %v6338_v22 = vld [vmem:[#allocation16 + $0x10] sm:$0xff] }
 0xc4c   :  { %3320 = vmatpush1.msra.mxu0 %v6322_v27  ;;  %3391 = vmatpush1.msra.mxu1 %v6325_v25  ;;  %7097 = vst [vmem:[#allocation32_spill] sm:$0xff] %v6334_v39  ;;  %7098 = vst [vmem:[#allocation34_spill] sm:$0xff] %v6338_v22  ;;  %v7100_v27 = vld [vmem:[#allocation42_spill] sm:$0xff] }
 0xc4d   :  { %3321 = vmatprep.subr.mxu0 %v6328_v24  ;;  %3392 = vmatprep.subr.mxu1 %v6331_v11  ;;  %v7099_v24 = vld [vmem:[#allocation40_spill] sm:$0xff]  ;;  %v2162_v6 = vadd.f32 %v7100_v27, %v5893_v38 }
 0xc4e   :  { %3322 = vmatpush1.msra.mxu0 %v6334_v39  ;;  %3355 = vmatprep.mubr.f32.mxu0 %v7069_v15  ;;  %v2160_v25 = vadd.f32 %v7099_v24, %v7073_v35  ;;  %v2273_v24 = vadd.f32 %v7102_v18, %v5910_v51  ;;  %v7105_v18 = vld [vmem:[#allocation29_spill] sm:$0xff] }
 0xc4f   :  { %3393 = vmatpush1.msra.mxu1 %v6338_v22  ;;  %3426 = vmatprep.mubr.f32.mxu1 %v7069_v15 }
 0xc50   :  { %3470 = vmatprep.subr.mxu0 %v6164_v59  ;;  %3541 = vmatprep.subr.mxu1 %v6167_v62  ;;  %v7101_v59 = vld [vmem:[#allocation65_spill] sm:$0xff] }
 0xc51   :  { %v2275_v16 = vadd.f32 %v7101_v59, %v7031_v40 }
 0xcef   :  { %v3178_v11 = vpop.f32.mrf.mxu0  ;;  %v3249_v29 = vpop.f32.mrf.mxu1 }
 0xcf0   :  { %v3254_v39 = vadd.f32 %v3178_v11, %v2160_v25  ;;  %v3256_v35 = vadd.f32 %v3249_v29, %v2273_v24  ;;  %v7106_v29 = vld [vmem:[#allocation51_spill] sm:$0xff]  ;;  %v7108_v24 = vld [vmem:[#allocation50_spill] sm:$0xff] }
 0xcf1   :  { %v3180_v0 = vpop.f32.mrf.mxu0  ;;  %v3251_v15 = vpop.f32.mrf.mxu1 }
 0xcf2   :  { %v3917_v60 = vmul.f32 -1.442695, %v3254_v39  ;;  %v3255_v20 = vadd.f32 %v3180_v0, %v2162_v6  ;;  %v3257_v62 = vadd.f32 %v3251_v15, %v2275_v16 }
 0xcf4   :  { %4132 = vpow2.f32 %v3917_v60  ;;  %v3918_v22 = vmul.f32 -1.442695, %v3255_v20  ;;  %v3919_v17 = vmul.f32 -1.442695, %v3257_v62 }
 0xcf6   :  { %4134 = vpow2.f32 %v3918_v22  ;;  %v7107_v22 = vld [vmem:[#allocation52_spill] sm:$0xff] }
 0xcf7   :  { %4136 = vtanh.f32 %v3256_v35 }
 0xcf8   :  { %4138 = vpow2.f32 %v3919_v17  ;;  %v7104_v17 = vld [vmem:[#allocation31_spill] sm:$0xff] }
 0xd01   :  { %v4133_v54 = vpop.eup %4132 }
 0xd02   :  { %v3261_v27 = vadd.f32 1.0, %v4133_v54 }
 0xd03   :  { %v4135_v25 = vpop.eup %4134 }
 0xd04   :  { %4140 = vrcp.f32 %v3261_v27  ;;  %v3267_v60 = vadd.f32 1.0, %v4135_v25  ;;  %v4137_v20 = vpop.eup %4136  ;;  %v7109_v27 = vld [vmem:[#allocation53_spill] sm:$0xff]  ;;  %v7110_v25 = vld [vmem:[#allocation55_spill] sm:$0xff] }
 0xd05   :  { %v4139_v0 = vpop.eup %4138 }
 0xd06   :  { %4142 = vrcp.f32 %v3267_v60  ;;  %v3274_v59 = vadd.f32 1.0, %v4139_v0  ;;  %v7111_v60 = vld [vmem:[#allocation56_spill] sm:$0xff]  ;;  %v7113_v0 = vld [vmem:[#allocation22_spill] sm:$0xff] }
 0xd08   :  { %4144 = vrcp.f32 %v3274_v59  ;;  %v7117_v59 = vld [vmem:[#allocation60_spill] sm:$0xff] }
 0xd11   :  { %v4141_v6 = vpop.eup %4140 }
 0xd12   :  { %v3279_v11 = vmul.f32 %v4141_v6, %v4137_v20  ;;  %v7112_v20 = vld [vmem:[#allocation54_spill] sm:$0xff]  ;;  %v7114_v6 = vld [vmem:[#allocation23_spill] sm:$0xff] }
 0xd13   :  { %v4143_v39 = vpop.eup %4142 }
 0xd14   :  { %v3278_v15 = vmul.f32 %v4143_v39, %v6179_v44  ;;  %v7103_v44 = vld [vmem:[#allocation74_spill] sm:$0xff]  ;;  %v7116_v39 = vld [vmem:[#allocation59_spill] sm:$0xff] }
 0xd15   :  { %v4145_v62 = vpop.eup %4144 }
 0xd16   :  { %v6353_v16 = vadd.f32 %v3279_v11, %v3278_v15  ;;  %v7115_v11 = vld [vmem:[#allocation57_spill] sm:$0xff]  ;;  %v7118_v15 = vld [vmem:[#allocation58_spill] sm:$0xff] }
 0xd18   :  { %4146 = vtanh.f32 %v6353_v16 }
 0xd25   :  { %v4147_v35 = vpop.eup %4146 }
 0xd26   :  { %v3282_v54 = vmul.f32 %v4147_v35, %v4145_v62  ;;  %v7119_v62 = vld [vmem:[#allocation25_spill] sm:$0xff]  ;;  %v7120_v35 = vld [vmem:[#allocation44_spill] sm:$0xff] }
 0xd28   :  { %3356 = vmatmul.mubr.f32.vlgmr.msra.gmra.mxu0 %v3282_v54  ;;  %3835 = vst [vmem:[#allocation17 + $0x20] sm:$0xff] %v3282_v54  ;;  %3427 = vmatmul.mubr.f32.vlgmr.msra.gmra.mxu1 %v3282_v54  ;;  %v7121_v54 = vld [vmem:[#allocation49_spill] sm:$0xff] }
 0xd29   :  { %3471 = vmatpush1.msra.mxu0 %v6072_v7  ;;  %3542 = vmatpush1.msra.mxu1 %v6075_v57 }
 0xd2a   :  { %3472 = vmatprep.subr.mxu0 %v6078_v43  ;;  %3543 = vmatprep.subr.mxu1 %v6081_v13 }
 0xd2b   :  { %3473 = vmatpush1.msra.mxu0 %v6084_v21  ;;  %3544 = vmatpush1.msra.mxu1 %v6087_v8 }
 0xd2c   :  { %3474 = vmatprep.subr.mxu0 %v6090_v37  ;;  %3545 = vmatprep.subr.mxu1 %v6093_v41 }
 0xd2d   :  { %3475 = vmatpush1.msra.mxu0 %v6096_v61  ;;  %3546 = vmatpush1.msra.mxu1 %v6099_v12 }
 0xd2e   :  { %3476 = vmatprep.subr.mxu0 %v6102_v45  ;;  %3547 = vmatprep.subr.mxu1 %v6105_v10 }
 0xd2f   :  { %3477 = vmatpush1.msra.mxu0 %v6108_v5  ;;  %3548 = vmatpush1.msra.mxu1 %v6111_v36 }
 0xd30   :  { %3478 = vmatprep.subr.mxu0 %v6196_v9  ;;  %3549 = vmatprep.subr.mxu1 %v6199_v14 }
 0xd31   :  { %3479 = vmatpush1.msra.mxu0 %v6202_v23  ;;  %3550 = vmatpush1.msra.mxu1 %v6205_v34 }
 0xd32   :  { %3480 = vmatprep.subr.mxu0 %v6208_v33  ;;  %3551 = vmatprep.subr.mxu1 %v6211_v28 }
 0xd33   :  { %3481 = vmatpush1.msra.mxu0 %v6214_v26  ;;  %3552 = vmatpush1.msra.mxu1 %v6217_v42 }
 0xd34   :  { %3482 = vmatprep.subr.mxu0 %v6220_v58  ;;  %3553 = vmatprep.subr.mxu1 %v6223_v31 }
 0xd35   :  { %3483 = vmatpush1.msra.mxu0 %v6226_v19  ;;  %3554 = vmatpush1.msra.mxu1 %v6229_v46 }
 0xd36   :  { %3484 = vmatprep.subr.mxu0 %v6232_v47  ;;  %3555 = vmatprep.subr.mxu1 %v6235_v48 }
 0xd37   :  { %3485 = vmatpush1.msra.mxu0 %v6238_v49  ;;  %3556 = vmatpush1.msra.mxu1 %v6241_v50 }
 0xd38   :  { %3486 = vmatprep.subr.mxu0 %v6244_v52  ;;  %3557 = vmatprep.subr.mxu1 %v6247_v53 }
 0xd39   :  { %3487 = vmatpush1.msra.mxu0 %v6250_v55  ;;  %3558 = vmatpush1.msra.mxu1 %v6253_v32 }
 0xd3a   :  { %3488 = vmatprep.subr.mxu0 %v6256_v63  ;;  %3559 = vmatprep.subr.mxu1 %v6259_v1 }
 0xd3b   :  { %3489 = vmatpush1.msra.mxu0 %v6262_v2  ;;  %3560 = vmatpush1.msra.mxu1 %v6265_v3 }
 0xd3c   :  { %3490 = vmatprep.subr.mxu0 %v6268_v4  ;;  %3561 = vmatprep.subr.mxu1 %v6271_v30 }
 0xd3d   :  { %3491 = vmatpush1.msra.mxu0 %v6274_v56  ;;  %3562 = vmatpush1.msra.mxu1 %v7103_v44 }
 0xd3e   :  { %3492 = vmatprep.subr.mxu0 %v7104_v17  ;;  %3563 = vmatprep.subr.mxu1 %v7105_v18  ;;  %v7131_v18 = vld [vmem:[#allocation68_spill] sm:$0xff] }
 0xd3f   :  { %3493 = vmatpush1.msra.mxu0 %v7106_v29  ;;  %3564 = vmatpush1.msra.mxu1 %v7107_v22 }
 0xd40   :  { %3494 = vmatprep.subr.mxu0 %v7108_v24  ;;  %3565 = vmatprep.subr.mxu1 %v7109_v27 }
 0xd41   :  { %3495 = vmatpush1.msra.mxu0 %v7110_v25  ;;  %3566 = vmatpush1.msra.mxu1 %v7111_v60  ;;  %v7122_v60 = vld [vmem:[#allocation32_spill] sm:$0xff] }
 0xd42   :  { %3496 = vmatprep.subr.mxu0 %v7112_v20  ;;  %3567 = vmatprep.subr.mxu1 %v7113_v0  ;;  %v7123_v20 = vmov 0.0   ;;  %v7124_v0 = vld [vmem:[#allocation34_spill] sm:$0xff] }
 0xd43   :  { %3497 = vmatpush1.msra.mxu0 %v7114_v6  ;;  %3568 = vmatpush1.msra.mxu1 %v7115_v11  ;;  %v7125_v11 = vld [vmem:[#allocation28_spill] sm:$0xff] }
 0xd44   :  { %3498 = vmatprep.subr.mxu0 %v7116_v39  ;;  %3569 = vmatprep.subr.mxu1 %v7117_v59  ;;  %v7126_v39 = vld [vmem:[#allocation30_spill] sm:$0xff]  ;;  %v7127_v59 = vld [vmem:[#allocation43_spill] sm:$0xff] }
 0xd45   :  { %3499 = vmatpush1.msra.mxu0 %v7118_v15  ;;  %3570 = vmatpush1.msra.mxu1 %v7119_v62  ;;  %v7128_v15 = vld [vmem:[#allocation67_spill] sm:$0xff] }
 0xd46   :  { %3500 = vmatprep.subr.mxu0 %v7120_v35  ;;  %3571 = vmatprep.subr.mxu1 %v7121_v54  ;;  %v2166_v6 = vadd.f32 %v7128_v15, %v7127_v59  ;;  %v7129_v35 = vld [vmem:[#allocation66_spill] sm:$0xff]  ;;  %v2279_v15 = vadd.f32 %v7131_v18, %v5910_v51 }
 0xd47   :  { %3501 = vmatpush1.msra.mxu0 %v7122_v60  ;;  %3534 = vmatprep.mubr.f32.mxu0 %v7123_v20  ;;  %v2168_v25 = vadd.f32 %v7129_v35, %v5893_v38 }
 0xd48   :  { %3572 = vmatpush1.msra.mxu1 %v7124_v0  ;;  %3605 = vmatprep.mubr.f32.mxu1 %v7123_v20 }
 0xd49   :  { %3649 = vmatprep.subr.mxu0 %v7125_v11  ;;  %3720 = vmatprep.subr.mxu1 %v7126_v39  ;;  %v7130_v11 = vld [vmem:[#allocation73_spill] sm:$0xff] }
 0xd4a   :  { %v2281_v29 = vadd.f32 %v7130_v11, %v7031_v40 }
 0xde8   :  { %v3357_v62 = vpop.f32.mrf.mxu0  ;;  %v3428_v22 = vpop.f32.mrf.mxu1 }
 0xde9   :  { %v3433_v54 = vadd.f32 %v3357_v62, %v2166_v6  ;;  %v3435_v59 = vadd.f32 %v3428_v22, %v2279_v15 }
 0xdea   :  { %v3359_v27 = vpop.f32.mrf.mxu0  ;;  %v3430_v20 = vpop.f32.mrf.mxu1 }
 0xdeb   :  { %v3920_v60 = vmul.f32 -1.442695, %v3433_v54  ;;  %v3434_v24 = vadd.f32 %v3359_v27, %v2168_v25  ;;  %v3436_v39 = vadd.f32 %v3430_v20, %v2281_v29 }
 0xded   :  { %4148 = vpow2.f32 %v3920_v60  ;;  %v3921_v0 = vmul.f32 -1.442695, %v3434_v24  ;;  %v3922_v17 = vmul.f32 -1.442695, %v3436_v39 }
 0xdef   :  { %4150 = vpow2.f32 %v3921_v0 }
 0xdf0   :  { %4152 = vtanh.f32 %v3435_v59 }
 0xdf1   :  { %4154 = vpow2.f32 %v3922_v17 }
 0xdfa   :  { %v4149_v44 = vpop.eup %4148 }
 0xdfb   :  { %v3440_v35 = vadd.f32 1.0, %v4149_v44 }
 0xdfc   :  { %v4151_v6 = vpop.eup %4150 }
 0xdfd   :  { %4156 = vrcp.f32 %v3440_v35  ;;  %v3446_v27 = vadd.f32 1.0, %v4151_v6  ;;  %v4153_v24 = vpop.eup %4152 }
 0xdfe   :  { %v4155_v25 = vpop.eup %4154 }
 0xdff   :  { %4158 = vrcp.f32 %v3446_v27  ;;  %v3453_v54 = vadd.f32 1.0, %v4155_v25 }
 0xe01   :  { %4160 = vrcp.f32 %v3453_v54 }
 0xe0a   :  { %v4157_v60 = vpop.eup %4156 }
 0xe0b   :  { %v3458_v0 = vmul.f32 %v4157_v60, %v4153_v24 }
 0xe0c   :  { %v4159_v62 = vpop.eup %4158 }
 0xe0d   :  { %v3457_v29 = vmul.f32 %v4159_v62, %v6353_v16 }
 0xe0e   :  { %v4161_v44 = vpop.eup %4160 }
 0xe0f   :  { %v6431_v20 = vadd.f32 %v3458_v0, %v3457_v29 }
 0xe11   :  { %4162 = vtanh.f32 %v6431_v20 }
 0xe1e   :  { %v4163_v18 = vpop.eup %4162 }
 0xe1f   :  { %v3461_v22 = vmul.f32 %v4163_v18, %v4161_v44  ;;  %v7159_v44 = vld [vmem:[#allocation71_spill] sm:$0xff] }
 0xe21   :  { %3535 = vmatmul.mubr.f32.vlgmr.msra.gmra.mxu0 %v3461_v22  ;;  %3836 = vst [vmem:[#allocation17 + $0x28] sm:$0xff] %v3461_v22  ;;  %3606 = vmatmul.mubr.f32.vlgmr.msra.gmra.mxu1 %v3461_v22 }
 0xe22   :  { %3650 = vmatpush1.msra.mxu0 %v6072_v7  ;;  %3721 = vmatpush1.msra.mxu1 %v6075_v57  ;;  %v7132_v7 = vld [vmem:[#allocation74_spill] sm:$0xff]  ;;  %v7133_v57 = vld [vmem:[#allocation31_spill] sm:$0xff] }
 0xe23   :  { %3651 = vmatprep.subr.mxu0 %v6078_v43  ;;  %3722 = vmatprep.subr.mxu1 %v6081_v13  ;;  %v7134_v43 = vld [vmem:[#allocation29_spill] sm:$0xff]  ;;  %v7135_v13 = vld [vmem:[#allocation51_spill] sm:$0xff] }
 0xe24   :  { %3652 = vmatpush1.msra.mxu0 %v6084_v21  ;;  %3723 = vmatpush1.msra.mxu1 %v6087_v8  ;;  %v7136_v21 = vld [vmem:[#allocation52_spill] sm:$0xff]  ;;  %v7137_v8 = vld [vmem:[#allocation50_spill] sm:$0xff] }
 0xe25   :  { %3653 = vmatprep.subr.mxu0 %v6090_v37  ;;  %3724 = vmatprep.subr.mxu1 %v6093_v41  ;;  %v7138_v37 = vld [vmem:[#allocation53_spill] sm:$0xff]  ;;  %v7139_v41 = vld [vmem:[#allocation55_spill] sm:$0xff] }
 0xe26   :  { %3654 = vmatpush1.msra.mxu0 %v6096_v61  ;;  %3725 = vmatpush1.msra.mxu1 %v6099_v12  ;;  %v7140_v61 = vld [vmem:[#allocation56_spill] sm:$0xff]  ;;  %v7141_v12 = vld [vmem:[#allocation54_spill] sm:$0xff] }
 0xe27   :  { %3655 = vmatprep.subr.mxu0 %v6102_v45  ;;  %3726 = vmatprep.subr.mxu1 %v6105_v10  ;;  %v7142_v45 = vld [vmem:[#allocation22_spill] sm:$0xff]  ;;  %v7143_v10 = vld [vmem:[#allocation23_spill] sm:$0xff] }
 0xe28   :  { %3656 = vmatpush1.msra.mxu0 %v6108_v5  ;;  %3727 = vmatpush1.msra.mxu1 %v6111_v36  ;;  %v7144_v5 = vld [vmem:[#allocation57_spill] sm:$0xff]  ;;  %v7145_v36 = vld [vmem:[#allocation59_spill] sm:$0xff] }
 0xe29   :  { %3657 = vmatprep.subr.mxu0 %v6196_v9  ;;  %3728 = vmatprep.subr.mxu1 %v6199_v14  ;;  %v7146_v9 = vld [vmem:[#allocation60_spill] sm:$0xff]  ;;  %v7147_v14 = vld [vmem:[#allocation58_spill] sm:$0xff] }
 0xe2a   :  { %3658 = vmatpush1.msra.mxu0 %v6202_v23  ;;  %3729 = vmatpush1.msra.mxu1 %v6205_v34  ;;  %v7148_v23 = vld [vmem:[#allocation25_spill] sm:$0xff]  ;;  %v7149_v34 = vld [vmem:[#allocation44_spill] sm:$0xff] }
 0xe2b   :  { %3659 = vmatprep.subr.mxu0 %v6208_v33  ;;  %3730 = vmatprep.subr.mxu1 %v6211_v28  ;;  %v7150_v33 = vld [vmem:[#allocation49_spill] sm:$0xff]  ;;  %v7151_v28 = vld [vmem:[#allocation32_spill] sm:$0xff] }
 0xe2c   :  { %3660 = vmatpush1.msra.mxu0 %v6214_v26  ;;  %3731 = vmatpush1.msra.mxu1 %v6217_v42  ;;  %v7152_v26 = vmov 0.0   ;;  %v7153_v42 = vld [vmem:[#allocation34_spill] sm:$0xff] }
 0xe2d   :  { %3661 = vmatprep.subr.mxu0 %v6220_v58  ;;  %3732 = vmatprep.subr.mxu1 %v6223_v31  ;;  %v7154_v58 = vld [vmem:[#allocation43_spill] sm:$0xff]  ;;  %v7155_v31 = vld [vmem:[#allocation24_spill] sm:$0xff] }
 0xe2e   :  { %3662 = vmatpush1.msra.mxu0 %v6226_v19  ;;  %3733 = vmatpush1.msra.mxu1 %v6229_v46  ;;  %v2172_v19 = vadd.f32 %v7155_v31, %v7154_v58  ;;  %v2178_v18 = vadd.f32 %v7159_v44, %v7154_v58 }
 0xe2f   :  { %3663 = vmatprep.subr.mxu0 %v6232_v47  ;;  %3734 = vmatprep.subr.mxu1 %v6235_v48  ;;  %v7156_v47 = vld [vmem:[#allocation47_spill] sm:$0xff] }
 0xe30   :  { %3664 = vmatpush1.msra.mxu0 %v6238_v49  ;;  %3735 = vmatpush1.msra.mxu1 %v6241_v50  ;;  %v2174_v48 = vadd.f32 %v7156_v47, %v5893_v38 }
 0xe31   :  { %3665 = vmatprep.subr.mxu0 %v6244_v52  ;;  %3736 = vmatprep.subr.mxu1 %v6247_v53 }
 0xe32   :  { %3666 = vmatpush1.msra.mxu0 %v6250_v55  ;;  %3737 = vmatpush1.msra.mxu1 %v6253_v32 }
 0xe33   :  { %3667 = vmatprep.subr.mxu0 %v6256_v63  ;;  %3738 = vmatprep.subr.mxu1 %v6259_v1  ;;  %v7157_v1 = vld [vmem:[#allocation69_spill] sm:$0xff] }
 0xe34   :  { %3668 = vmatpush1.msra.mxu0 %v6262_v2  ;;  %3739 = vmatpush1.msra.mxu1 %v6265_v3  ;;  %v2287_v2 = vadd.f32 %v7157_v1, %v7031_v40 }
 0xe35   :  { %3669 = vmatprep.subr.mxu0 %v6268_v4  ;;  %3740 = vmatprep.subr.mxu1 %v6271_v30  ;;  %v7158_v4 = vld [vmem:[#allocation27_spill] sm:$0xff] }
 0xe36   :  { %3670 = vmatpush1.msra.mxu0 %v6274_v56  ;;  %3741 = vmatpush1.msra.mxu1 %v7132_v7  ;;  %v2285_v30 = vadd.f32 %v7158_v4, %v5910_v51  ;;  %v7160_v7 = vld [vmem:[#allocation70_spill] sm:$0xff] }
 0xe37   :  { %3671 = vmatprep.subr.mxu0 %v7133_v57  ;;  %3742 = vmatprep.subr.mxu1 %v7134_v43  ;;  %v2180_v57 = vadd.f32 %v7160_v7, %v5893_v38 }
 0xe38   :  { %3672 = vmatpush1.msra.mxu0 %v7135_v13  ;;  %3743 = vmatpush1.msra.mxu1 %v7136_v21 }
 0xe39   :  { %3673 = vmatprep.subr.mxu0 %v7137_v8  ;;  %3744 = vmatprep.subr.mxu1 %v7138_v37 }
 0xe3a   :  { %3674 = vmatpush1.msra.mxu0 %v7139_v41  ;;  %3745 = vmatpush1.msra.mxu1 %v7140_v61  ;;  %v7161_v61 = vld [vmem:[#allocation45_spill] sm:$0xff] }
 0xe3b   :  { %3675 = vmatprep.subr.mxu0 %v7141_v12  ;;  %3746 = vmatprep.subr.mxu1 %v7142_v45  ;;  %v2293_v12 = vadd.f32 %v7161_v61, %v7031_v40 }
 0xe3c   :  { %3676 = vmatpush1.msra.mxu0 %v7143_v10  ;;  %3747 = vmatpush1.msra.mxu1 %v7144_v5  ;;  %v7162_v10 = vld [vmem:[#allocation72_spill] sm:$0xff] }
 0xe3d   :  { %3677 = vmatprep.subr.mxu0 %v7145_v36  ;;  %3748 = vmatprep.subr.mxu1 %v7146_v9  ;;  %v2291_v5 = vadd.f32 %v7162_v10, %v5910_v51 }
 0xe3e   :  { %3678 = vmatpush1.msra.mxu0 %v7147_v14  ;;  %3749 = vmatpush1.msra.mxu1 %v7148_v23 }
 0xe3f   :  { %3679 = vmatprep.subr.mxu0 %v7149_v34  ;;  %3750 = vmatprep.subr.mxu1 %v7150_v33 }
 0xe40   :  { %3680 = vmatpush1.msra.mxu0 %v7151_v28  ;;  %3713 = vmatprep.mubr.f32.mxu0 %v7152_v26 }
 0xe41   :  { %3751 = vmatpush1.msra.mxu1 %v7153_v42  ;;  %3784 = vmatprep.mubr.f32.mxu1 %v7152_v26 }
 0xee1   :  { %v3536_v46 = vpop.f32.mrf.mxu0  ;;  %v3607_v55 = vpop.f32.mrf.mxu1 }
 0xee2   :  { %v3612_v49 = vadd.f32 %v3536_v46, %v2172_v19  ;;  %v3614_v56 = vadd.f32 %v3607_v55, %v2285_v30 }
 0xee3   :  { %v3538_v50 = vpop.f32.mrf.mxu0  ;;  %v3609_v63 = vpop.f32.mrf.mxu1 }
 0xee4   :  { %v3923_v52 = vmul.f32 -1.442695, %v3612_v49  ;;  %v3613_v53 = vadd.f32 %v3538_v50, %v2174_v48  ;;  %v3615_v3 = vadd.f32 %v3609_v63, %v2287_v2 }
 0xee6   :  { %4164 = vpow2.f32 %v3923_v52  ;;  %v3924_v32 = vmul.f32 -1.442695, %v3613_v53  ;;  %v3925_v16 = vmul.f32 -1.442695, %v3615_v3 }
 0xee8   :  { %4166 = vpow2.f32 %v3924_v32 }
 0xee9   :  { %4168 = vtanh.f32 %v3614_v56 }
 0xeea   :  { %4170 = vpow2.f32 %v3925_v16 }
 0xef3   :  { %v4165_v17 = vpop.eup %4164 }
 0xef4   :  { %v3619_v59 = vadd.f32 1.0, %v4165_v17 }
 0xef5   :  { %v4167_v11 = vpop.eup %4166 }
 0xef6   :  { %4172 = vrcp.f32 %v3619_v59  ;;  %v3625_v39 = vadd.f32 1.0, %v4167_v11  ;;  %v4169_v15 = vpop.eup %4168 }
 0xef7   :  { %v4171_v35 = vpop.eup %4170 }
 0xef8   :  { %4174 = vrcp.f32 %v3625_v39  ;;  %v3632_v25 = vadd.f32 1.0, %v4171_v35 }
 0xefa   :  { %4176 = vrcp.f32 %v3632_v25 }
 0xf03   :  { %v4173_v6 = vpop.eup %4172 }
 0xf04   :  { %v3637_v27 = vmul.f32 %v4173_v6, %v4169_v15 }
 0xf05   :  { %v4175_v24 = vpop.eup %4174 }
 0xf06   :  { %v3636_v60 = vmul.f32 %v4175_v24, %v6431_v20 }
 0xf07   :  { %v4177_v62 = vpop.eup %4176 }
 0xf08   :  { %v3638_v0 = vadd.f32 %v3637_v27, %v3636_v60 }
 0xf0a   :  { %4178 = vtanh.f32 %v3638_v0 }
 0xf17   :  { %v4179_v54 = vpop.eup %4178 }
 0xf18   :  { %v3640_v29 = vmul.f32 %v4179_v54, %v4177_v62 }
 0xf1a   :  { %3714 = vmatmul.mubr.f32.vlgmr.msra.gmra.mxu0 %v3640_v29  ;;  %3837 = vst [vmem:[#allocation17 + $0x30] sm:$0xff] %v3640_v29  ;;  %3785 = vmatmul.mubr.f32.vlgmr.msra.gmra.mxu1 %v3640_v29 }
 0xfda   :  { %v3715_v22 = vpop.f32.mrf.mxu0  ;;  %v3786_v8 = vpop.f32.mrf.mxu1 }
 0xfdb   :  { %v3791_v43 = vadd.f32 %v3715_v22, %v2178_v18  ;;  %v3793_v36 = vadd.f32 %v3786_v8, %v2291_v5 }
 0xfdc   :  { %v3717_v13 = vpop.f32.mrf.mxu0  ;;  %v3788_v41 = vpop.f32.mrf.mxu1 }
 0xfdd   :  { %v3926_v21 = vmul.f32 -1.442695, %v3791_v43  ;;  %v3792_v20 = vadd.f32 %v3717_v13, %v2180_v57  ;;  %v3794_v45 = vadd.f32 %v3788_v41, %v2293_v12 }
 0xfdf   :  { %4180 = vpow2.f32 %v3926_v21  ;;  %v3927_v37 = vmul.f32 -1.442695, %v3792_v20  ;;  %v3928_v9 = vmul.f32 -1.442695, %v3794_v45 }
 0xfe1   :  { %4182 = vpow2.f32 %v3927_v37 }
 0xfe2   :  { %4184 = vtanh.f32 %v3793_v36 }
 0xfe3   :  { %4186 = vpow2.f32 %v3928_v9 }
 0xfec   :  { %v4181_v14 = vpop.eup %4180 }
 0xfed   :  { %v3798_v38 = vadd.f32 1.0, %v4181_v14 }
 0xfee   :  { %v4183_v23 = vpop.eup %4182 }
 0xfef   :  { %4188 = vrcp.f32 %v3798_v38  ;;  %v3804_v34 = vadd.f32 1.0, %v4183_v23  ;;  %v4185_v33 = vpop.eup %4184 }
 0xff0   :  { %v4187_v28 = vpop.eup %4186 }
 0xff1   :  { %4190 = vrcp.f32 %v3804_v34  ;;  %v3811_v40 = vadd.f32 1.0, %v4187_v28 }
 0xff3   :  { %4192 = vrcp.f32 %v3811_v40 }
 0xffc   :  { %v4189_v26 = vpop.eup %4188 }
 0xffd   :  { %v3816_v42 = vmul.f32 %v4189_v26, %v4185_v33 }
 0xffe   :  { %v4191_v58 = vpop.eup %4190 }
 0xfff   :  { %v3815_v31 = vmul.f32 %v4191_v58, %v3638_v0 }
0x1000   :  { %v4193_v51 = vpop.eup %4192 }
0x1001   :  { %v3817_v19 = vadd.f32 %v3816_v42, %v3815_v31 }
0x1003   :  { %4194 = vtanh.f32 %v3817_v19 }
0x1010   :  { %v4195_v46 = vpop.eup %4194 }
0x1011   :  { %v3819_v47 = vmul.f32 %v4195_v46, %v4193_v51 }
0x1013   :  { %3838 = vst [vmem:[#allocation17 + $0x38] sm:$0xff] %v3819_v47 }
0x1014   :  { %4435 = shalt.err (!%p4432_p1)
}
0x1015   :  { %3850 = dma.vmem_to_hbm [thread:$0]  %s3845_s28, 1024, %s6528_s7, [#allocation10], %s4457_s15, %s4457_s15, %s4458_s16  }
0x1016   :  { %4450 = dma.done.wait [#allocation10], 1024  }
0x1017   :  { %4451 = vsyncadd [#allocation10], 4294966272 }
0x1018   :  { %3854 = vsyncpa [#allocation9], 1 }
0x1019   :  { %3855 = vsyncpa [#allocation12], 1 }
0x101a   :  { %3856 = vsyncpa [#allocation15], 1 }
0x101b   :  { %3857 = vsyncpa [#allocation10], 1 }

</bundles_post_ra>
